<compile_context>
chip_gen: v6e
topology: v6e:2x2x1
jax: 0.10.0
libtpu: 0.0.40
codegen_flags: <defaults>
</compile_context>

<pallas_src>
import numpy as np

import jax
import jax.numpy as jnp
from jax.experimental import pallas as pl
from jax.experimental.pallas import tpu as pltpu

# ----------------------------- model dimensions ------------------------------
SENT_DIM = 768          # DistilBERT hidden size
TKG_DIM = 256           # tkg_embedding_dim
RANK = TKG_DIM // 2
NUM_ENTITIES = 32
NUM_TIMES = 8
BN_EPS = 1e-5


def _vmem_specs(n):
    return [pl.BlockSpec(memory_space=pltpu.MemorySpace.VMEM) for _ in range(n)]


def _vmem_out(n=1):
    if n == 1:
        return pl.BlockSpec(memory_space=pltpu.MemorySpace.VMEM)
    return tuple(pl.BlockSpec(memory_space=pltpu.MemorySpace.VMEM) for _ in range(n))


# --------------------------- in-kernel helper math ----------------------------
def _dot_f32(x, wT):
    # bf16 MXU operands, f32 accumulation.
    return jnp.dot(x.astype(jnp.bfloat16), wT, preferred_element_type=jnp.float32)


def _bn_eval(y, gamma, beta, mean, var):
    # BatchNorm1d with running stats (eval); Dropout is identity in eval mode.
    return (y - mean) * jax.lax.rsqrt(var + BN_EPS) * gamma + beta


def _mean_xent(score, lab):
    # nn.CrossEntropyLoss(reduction='mean'): score [N, C] f32, lab [N, 1] int32.
    n, c = score.shape
    m = jnp.max(score, axis=1, keepdims=True)
    lse = m + jnp.log(jnp.sum(jnp.exp(score - m), axis=1, keepdims=True))
    col = jax.lax.broadcasted_iota(jnp.int32, (n, c), 1)
    onehot = (col == lab).astype(jnp.float32)
    correct = jnp.sum(onehot * score, axis=1, keepdims=True)
    return jnp.mean(lse - correct).reshape(1, 1)


# --------------------------------- kernels -----------------------------------
def _linear_kernel(x_ref, wT_ref, b_ref, o_ref):
    # y = x @ W^T + b   (W stored pre-transposed as wT [Din, Dout], bf16)
    o_ref[...] = _dot_f32(x_ref[...], wT_ref[...]) + b_ref[...]


def _tango_proj_kernel(tbl_ref, wep_ref, bep_ref, wyn_ref, byn_ref,
                       wmc_ref, bmc_ref, ep_ref, yn_ref, mc_ref):
    # Project the full frozen TANGO table through ep/yn/mc linears in ONE kernel
    # (table is read from HBM once; three 256x256 MXU matmuls back-to-back).
    tbl = tbl_ref[...].astype(jnp.bfloat16)
    ep_ref[...] = jnp.dot(tbl, wep_ref[...], preferred_element_type=jnp.float32) + bep_ref[...]
    yn_ref[...] = jnp.dot(tbl, wyn_ref[...], preferred_element_type=jnp.float32) + byn_ref[...]
    mc_ref[...] = jnp.dot(tbl, wmc_ref[...], preferred_element_type=jnp.float32) + bmc_ref[...]


def _linear2_bn_kernel(x_ref, w1_ref, b1_ref, w2_ref, b2_ref,
                       g_ref, beta_ref, mu_ref, var_ref, o_ref):
    # BN_eval((x @ w1 + b1) @ w2 + b2); the [N, 256] intermediate stays in VMEM.
    y1 = _dot_f32(x_ref[...], w1_ref[...]) + b1_ref[...]
    y2 = _dot_f32(y1, w2_ref[...]) + b2_ref[...]
    o_ref[...] = _bn_eval(y2, g_ref[...], beta_ref[...], mu_ref[...], var_ref[...])


def _ep_branch_kernel(rel_ref, wbn_ref, bbn_ref, g_ref, beta_ref, mu_ref, var_ref,
                      head_ref, right_ref, lab_ref, s_ref, loss_ref):
    # Fused: relation linear_bn_entity + BN -> entity/time scoring -> CE loss.
    rel = _bn_eval(_dot_f32(rel_ref[...], wbn_ref[...]) + bbn_ref[...],
                   g_ref[...], beta_ref[...], mu_ref[...], var_ref[...])
    h = head_ref[...]
    lhs0, lhs1 = h[:, :RANK], h[:, RANK:]
    rel0, rel1 = rel[:, :RANK], rel[:, RANK:]
    re = lhs0 * rel0 - lhs1 * rel1                       # [N, R]
    im = lhs0 * rel1 + lhs1 * rel0                       # [N, R]
    right = right_ref[...]                               # [N, E, D]
    r0, r1 = right[:, :, :RANK], right[:, :, RANK:]
    score = jnp.sum(re[:, None, :] * r0 + im[:, None, :] * r1, axis=2)   # [N, E]
    s_ref[...] = score
    loss_ref[...] = _mean_xent(score, lab_ref[...])


def _yn_branch_kernel(rel_ref, wbn_ref, bbn_ref, g_ref, beta_ref, mu_ref, var_ref,
                      head_ref, tail_ref, choice_ref, lab_ref, s_ref, loss_ref):
    # Fused: relation linear_bn_yn + BN -> yes/no scoring (2 lane-dense choices,
    # repeat_interleave folded into a broadcast) -> CE loss.
    rel = _bn_eval(_dot_f32(rel_ref[...], wbn_ref[...]) + bbn_ref[...],
                   g_ref[...], beta_ref[...], mu_ref[...], var_ref[...])
    h, t = head_ref[...], tail_ref[...]
    lhs0, lhs1 = h[:, :RANK], h[:, RANK:]
    rel0, rel1 = rel[:, :RANK], rel[:, RANK:]
    rhs0, rhs1 = t[:, :RANK], t[:, RANK:]
    re = (lhs0 * rel0 * rhs0 - lhs1 * rel1 * rhs0
          - lhs1 * rel0 * rhs1 + lhs0 * rel1 * rhs1)     # [N, R]
    im = (lhs1 * rel0 * rhs0 - lhs0 * rel1 * rhs0
          + lhs0 * rel0 * rhs1 - lhs1 * rel1 * rhs1)     # [N, R]
    c = choice_ref[...]                                  # [N, 2, D]
    c0, c1 = c[:, :, :RANK], c[:, :, RANK:]
    score = jnp.sum(re[:, None, :] * c0 + im[:, None, :] * c1, axis=2)   # [N, 2]
    s_ref[...] = score
    loss_ref[...] = _mean_xent(score, lab_ref[...])


def _mc_branch_kernel(rel_ref, wbn_ref, bbn_ref, g_ref, beta_ref, mu_ref, var_ref,
                      hq_ref, tq_ref, wc1_ref, wc2_ref, wc3_ref, bc_ref,
                      hc_ref, ce_ref, tc_ref, lab_ref, s_ref, loss_ref):
    # Fused: relation linear_bn_mc + BN -> mc_cat(concat(hq, rel, tq)) as three
    # partial matmuls -> multiple-choice scoring (4 lane-dense choices,
    # repeat_interleave folded into a broadcast) -> CE loss.
    rel = _bn_eval(_dot_f32(rel_ref[...], wbn_ref[...]) + bbn_ref[...],
                   g_ref[...], beta_ref[...], mu_ref[...], var_ref[...])
    qcat = (_dot_f32(hq_ref[...], wc1_ref[...])
            + _dot_f32(rel, wc2_ref[...])
            + _dot_f32(tq_ref[...], wc3_ref[...])
            + bc_ref[...])                               # [N, D]
    hc, ce, tc = hc_ref[...], ce_ref[...], tc_ref[...]   # each [N, 4, D]
    lhs0, lhs1 = hc[:, :, :RANK], hc[:, :, RANK:]
    rel0, rel1 = ce[:, :, :RANK], ce[:, :, RANK:]
    rhs0, rhs1 = tc[:, :, :RANK], tc[:, :, RANK:]
    re = (lhs0 * rel0 * rhs0 - lhs1 * rel1 * rhs0
          - lhs1 * rel0 * rhs1 + lhs0 * rel1 * rhs1)     # [N, 4, R]
    im = (lhs1 * rel0 * rhs0 - lhs0 * rel1 * rhs0
          + lhs0 * rel0 * rhs1 - lhs1 * rel1 * rhs1)     # [N, 4, R]
    q0, q1 = qcat[:, :RANK], qcat[:, RANK:]
    score = jnp.sum(re * q0[:, None, :] + im * q1[:, None, :], axis=2)   # [N, 4]
    s_ref[...] = score
    loss_ref[...] = _mean_xent(score, lab_ref[...])


# ------------------------------ kernel wrappers -------------------------------
def linear(x, wT, b):
    n = x.shape[0]
    dout = wT.shape[1]
    return pl.pallas_call(
        _linear_kernel,
        out_shape=jax.ShapeDtypeStruct((n, dout), jnp.float32),
        in_specs=_vmem_specs(3),
        out_specs=_vmem_out(),
    )(x, wT, b)


def project_tango(table, ep_lin, yn_lin, mc_lin):
    n = table.shape[0]
    out = jax.ShapeDtypeStruct((n, TKG_DIM), jnp.float32)
    return pl.pallas_call(
        _tango_proj_kernel,
        out_shape=(out, out, out),
        in_specs=_vmem_specs(7),
        out_specs=_vmem_out(3),
    )(table, ep_lin[0], ep_lin[1], yn_lin[0], yn_lin[1], mc_lin[0], mc_lin[1])


def linear2_bn(x, lin1, lin2, bn):
    n = x.shape[0]
    return pl.pallas_call(
        _linear2_bn_kernel,
        out_shape=jax.ShapeDtypeStruct((n, TKG_DIM), jnp.float32),
        in_specs=_vmem_specs(9),
        out_specs=_vmem_out(),
    )(x, lin1[0], lin1[1], lin2[0], lin2[1],
      bn["gamma"], bn["beta"], bn["mean"], bn["var"])


def ep_branch(rel_rows, lin_bn, bn, head_p, right_p, labels):
    n, e, _ = right_p.shape
    scores, loss = pl.pallas_call(
        _ep_branch_kernel,
        out_shape=(jax.ShapeDtypeStruct((n, e), jnp.float32),
                   jax.ShapeDtypeStruct((1, 1), jnp.float32)),
        in_specs=_vmem_specs(10),
        out_specs=_vmem_out(2),
    )(rel_rows, lin_bn[0], lin_bn[1],
      bn["gamma"], bn["beta"], bn["mean"], bn["var"],
      head_p, right_p, labels)
    return scores, loss[0, 0]


def yn_branch(rel_rows, lin_bn, bn, head, tail, choice3, labels):
    n, c, _ = choice3.shape
    scores, loss = pl.pallas_call(
        _yn_branch_kernel,
        out_shape=(jax.ShapeDtypeStruct((n, c), jnp.float32),
                   jax.ShapeDtypeStruct((1, 1), jnp.float32)),
        in_specs=_vmem_specs(11),
        out_specs=_vmem_out(2),
    )(rel_rows, lin_bn[0], lin_bn[1],
      bn["gamma"], bn["beta"], bn["mean"], bn["var"],
      head, tail, choice3, labels)
    return scores, loss[0, 0]


def mc_branch(rel_rows, lin_bn, bn, hq, tq, mc_cat, heads_c, choice3, tails_c, labels):
    n, c, _ = choice3.shape
    w1, w2, w3, bcat = mc_cat
    scores, loss = pl.pallas_call(
        _mc_branch_kernel,
        out_shape=(jax.ShapeDtypeStruct((n, c), jnp.float32),
                   jax.ShapeDtypeStruct((1, 1), jnp.float32)),
        in_specs=_vmem_specs(17),
        out_specs=_vmem_out(2),
    )(rel_rows, lin_bn[0], lin_bn[1],
      bn["gamma"], bn["beta"], bn["mean"], bn["var"],
      hq, tq, w1, w2, w3, bcat, heads_c, choice3, tails_c, labels)
    return scores, loss[0, 0]


# ------------------------------ parameter init --------------------------------
def init_params(key):
    ks = jax.random.split(key, 12)

    def lin_T(k, din, dout):
        # PyTorch nn.Linear stores W as [Dout, Din]; we keep wT = W.T (bf16) so
        # no transpose ever happens per forward call.
        kw, kb = jax.random.split(k)
        w = jax.random.normal(kw, (dout, din), jnp.float32) * 0.02
        b = jax.random.normal(kb, (dout,), jnp.float32) * 0.02
        return w.T.astype(jnp.bfloat16), b.reshape(1, dout)

    def bn(k, d):
        kg, kb = jax.random.split(k)
        return dict(
            gamma=1.0 + 0.1 * jax.random.normal(kg, (1, d), jnp.float32),
            beta=0.1 * jax.random.normal(kb, (1, d), jnp.float32),
            mean=jnp.zeros((1, d), jnp.float32),
            var=jnp.ones((1, d), jnp.float32),
        )

    # mc_cat: W [256, 768]; split W.T into the three row blocks that multiply
    # (heads_q, relation, tails_q) so the concat never materializes.
    kw, kb = jax.random.split(ks[9])
    w_cat = jax.random.normal(kw, (TKG_DIM, 3 * TKG_DIM), jnp.float32) * 0.02
    b_cat = jax.random.normal(kb, (TKG_DIM,), jnp.float32) * 0.02
    w_cat_T = w_cat.T.astype(jnp.bfloat16)                         # [3D, D]
    mc_cat = (w_cat_T[:TKG_DIM], w_cat_T[TKG_DIM:2 * TKG_DIM],
              w_cat_T[2 * TKG_DIM:], b_cat.reshape(1, TKG_DIM))

    return dict(
        linear_relation=lin_T(ks[0], SENT_DIM, TKG_DIM),
        linear_bn_entity=lin_T(ks[1], TKG_DIM, TKG_DIM),
        bn_entity=bn(ks[2], TKG_DIM),
        ep_linear=lin_T(ks[3], TKG_DIM, TKG_DIM),
        linear_bn_yn=lin_T(ks[4], TKG_DIM, TKG_DIM),
        bn_yn=bn(ks[5], TKG_DIM),
        yn_linear=lin_T(ks[6], TKG_DIM, TKG_DIM),
        linear_bn_mc=lin_T(ks[7], TKG_DIM, TKG_DIM),
        bn_mc=bn(ks[8], TKG_DIM),
        mc_cat=mc_cat,
        mc_linear=lin_T(ks[10], TKG_DIM, TKG_DIM),
        # frozen TANGO embeddings: [num_times, num_entities, tkg_dim]
        tango_weights=0.1 * jax.random.normal(
            ks[11], (NUM_TIMES, NUM_ENTITIES, TKG_DIM), jnp.float32),
    )


# --------------------------------- forward ------------------------------------
@jax.jit
def _forward_core(params, sent_embed, heads, tails, times, answers,
                  idx_ep, idx_yn, idx_mc):
    tw = params["tango_weights"]
    num_times, num_entities, dim = tw.shape
    tango_embedding = tw.reshape(-1, dim)

    # Shared question encoding: one [B,768] x [768,256] bf16 MXU matmul.
    question_embedding = sent_embed[:, 0, :]
    relation_embedding = linear(question_embedding, *params["linear_relation"])

    # Project the full frozen TANGO table through ep/yn/mc linears ONCE; every
    # per-question / per-choice projected embedding is then a plain gather.
    tango_ep, tango_yn, tango_mc = project_tango(
        tango_embedding, params["ep_linear"], params["yn_linear"], params["mc_linear"])

    heads_question, heads_choice = heads[:, 0], heads[:, 1:]
    tails_question, tails_choice = tails[:, 0], tails[:, 1:]
    times_question, times_choice = times[:, 0], times[:, 1:]
    head_q_flat = times_question * num_entities + heads_question
    tail_q_flat = times_question * num_entities + tails_question

    n_ep, n_yn, n_mc = idx_ep.shape[0], idx_yn.shape[0], idx_mc.shape[0]
    scores_ep = scores_yn = scores_mc = None
    loss = jnp.zeros((), jnp.float32)

    # ------------------ entity / time prediction branch ------------------
    if n_ep > 1:
        rel_rows = relation_embedding[idx_ep]
        head_p = tango_ep[head_q_flat[idx_ep]]
        right_p = tango_ep.reshape(num_times, num_entities, dim)[times_question[idx_ep]]
        labels = answers[idx_ep].astype(jnp.int32).reshape(-1, 1)
        scores_ep, loss_ep = ep_branch(rel_rows, params["linear_bn_entity"],
                                       params["bn_entity"], head_p, right_p, labels)
        loss = loss + loss_ep

    # --------------------------- yes / no branch -------------------------
    if n_yn > 1:
        rel_rows = relation_embedding[idx_yn]
        head_yn = tango_yn[head_q_flat[idx_yn]]
        tail_yn = tango_yn[tail_q_flat[idx_yn]]
        choice_sent = sent_embed[idx_yn][:, 1:3, :].reshape(-1, SENT_DIM)
        choice_emb = linear2_bn(choice_sent, params["linear_relation"],
                                params["linear_bn_yn"], params["bn_yn"])
        choice_emb = choice_emb.reshape(n_yn, 2, dim)
        labels = answers[idx_yn].astype(jnp.int32).reshape(-1, 1)
        scores_yn, loss_yn = yn_branch(rel_rows, params["linear_bn_yn"], params["bn_yn"],
                                       head_yn, tail_yn, choice_emb, labels)
        loss = loss + loss_yn

    # ----------------------- multiple choice branch ----------------------
    if n_mc > 1:
        rel_rows = relation_embedding[idx_mc]
        hq = tango_mc[head_q_flat[idx_mc]]
        tq = tango_mc[tail_q_flat[idx_mc]]
        n_choices = heads_choice.shape[1]
        hc_idx = (times_choice[idx_mc] * num_entities + heads_choice[idx_mc]).reshape(-1)
        tc_idx = (times_choice[idx_mc] * num_entities + tails_choice[idx_mc]).reshape(-1)
        heads_c = tango_mc[hc_idx].reshape(n_mc, n_choices, dim)
        tails_c = tango_mc[tc_idx].reshape(n_mc, n_choices, dim)
        choice_sent = sent_embed[idx_mc][:, 1:, :].reshape(-1, SENT_DIM)
        choice_emb = linear2_bn(choice_sent, params["linear_relation"],
                                params["linear_bn_mc"], params["bn_mc"])
        choice_emb = choice_emb.reshape(n_mc, n_choices, dim)
        labels = answers[idx_mc].astype(jnp.int32).reshape(-1, 1)
        scores_mc, loss_mc = mc_branch(rel_rows, params["linear_bn_mc"], params["bn_mc"],
                                       hq, tq, params["mc_cat"],
                                       heads_c, choice_emb, tails_c, labels)
        loss = loss + loss_mc

    mask_dis = None
    return mask_dis, scores_ep, scores_yn, scores_mc, loss


def forecast_tkgqa_forward(params, sent_embed, heads, tails, times, types, answers):
    """sent_embed: [B, S, 768] precomputed CLS sentence embeddings
       (column 0 = question, columns 1: = answer-choice sentences).
       The batch is partitioned by question type on the host so every array the
       jitted core sees has a static shape (jit-able, no retracing per kernel)."""
    types_np = np.asarray(types)
    idx_ep = jnp.asarray(np.flatnonzero(types_np < 2), dtype=jnp.int32)
    idx_yn = jnp.asarray(np.flatnonzero(types_np == 2), dtype=jnp.int32)
    idx_mc = jnp.asarray(np.flatnonzero(types_np == 3), dtype=jnp.int32)
    return _forward_core(params, sent_embed, heads, tails, times, answers,
                         idx_ep, idx_yn, idx_mc)


# ----------------------------------- main -------------------------------------
if __name__ == "__main__":
    key = jax.random.PRNGKey(0)
    kp, kd = jax.random.split(key)
    params = init_params(kp)

    B = 6          # batch of questions
    S = 5          # 1 question sentence + 4 choice sentences
    ks = jax.random.split(kd, 4)
    sent_embed = jax.random.normal(ks[0], (B, S, SENT_DIM), jnp.float32)
    heads = jax.random.randint(ks[1], (B, S), 0, NUM_ENTITIES)
    tails = jax.random.randint(ks[2], (B, S), 0, NUM_ENTITIES)
    times = jax.random.randint(ks[3], (B, S), 0, NUM_TIMES)
    # question types: 0/1 -> entity/time prediction, 2 -> yes/no, 3 -> multiple choice
    types = jnp.array([0, 1, 2, 2, 3, 3], dtype=jnp.int32)
    # answers: entity id for ep rows, {0,1} for yn rows, {0..3} for mc rows
    answers = jnp.array([5, 17, 1, 0, 2, 3], dtype=jnp.int32)

    mask_dis, scores_ep, scores_yn, scores_mc, loss = forecast_tkgqa_forward(
        params, sent_embed, heads, tails, times, types, answers)

    jax.block_until_ready((scores_ep, scores_yn, scores_mc, loss))
    assert scores_ep.shape == (2, NUM_ENTITIES)
    assert scores_yn.shape == (2, 2)
    assert scores_mc.shape == (2, 4)
    assert loss.shape == ()
    assert bool(jnp.isfinite(loss))
    print("KERNEL_OK")
</pallas_src>

<mosaic_0001>
module attributes {stable_mosaic.version = 11 : i64} {
  func.func @_tango_proj_kernel(%arg0: memref<256x256xf32, #tpu.memory_space<vmem>>, %arg1: memref<256x256xbf16, #tpu.memory_space<vmem>>, %arg2: memref<1x256xf32, #tpu.memory_space<vmem>>, %arg3: memref<256x256xbf16, #tpu.memory_space<vmem>>, %arg4: memref<1x256xf32, #tpu.memory_space<vmem>>, %arg5: memref<256x256xbf16, #tpu.memory_space<vmem>>, %arg6: memref<1x256xf32, #tpu.memory_space<vmem>>, %arg7: memref<256x256xf32, #tpu.memory_space<vmem>>, %arg8: memref<256x256xf32, #tpu.memory_space<vmem>>, %arg9: memref<256x256xf32, #tpu.memory_space<vmem>>) attributes {dimension_semantics = [], scalar_prefetch = 0 : i64, scratch_operands = 0 : i64, tpu.core_type = #tpu.core_type<tc>} {
    %c0 = arith.constant 0 : index
    %c0_0 = arith.constant 0 : index
    %0 = vector.load %arg0[%c0, %c0_0] : memref<256x256xf32, #tpu.memory_space<vmem>>, vector<256x256xf32>
    %1 = arith.truncf %0 : vector<256x256xf32> to vector<256x256xbf16>
    %c0_1 = arith.constant 0 : index
    %c0_2 = arith.constant 0 : index
    %2 = vector.load %arg1[%c0_1, %c0_2] : memref<256x256xbf16, #tpu.memory_space<vmem>>, vector<256x256xbf16>
    %cst = arith.constant dense<0.000000e+00> : vector<256x256xf32>
    %3 = tpu.matmul %1, %2, %cst {dimension_numbers = #tpu.dot_dimension_numbers<[1], [0], [0], [1], [0, 0, 1, 1], [], []>} : vector<256x256xbf16>, vector<256x256xbf16>, vector<256x256xf32> -> vector<256x256xf32>
    %c0_3 = arith.constant 0 : index
    %c0_4 = arith.constant 0 : index
    %4 = vector.load %arg2[%c0_3, %c0_4] : memref<1x256xf32, #tpu.memory_space<vmem>>, vector<1x256xf32>
    %5 = vector.broadcast %4 : vector<1x256xf32> to vector<256x256xf32>
    %6 = arith.addf %3, %5 : vector<256x256xf32>
    %c0_5 = arith.constant 0 : index
    %c0_6 = arith.constant 0 : index
    %7 = vector.load %arg7[%c0_5, %c0_6] : memref<256x256xf32, #tpu.memory_space<vmem>>, vector<256x256xf32>
    tpu.vector_store %arg7[%c0_5, %c0_6], %6 {strides = array<i32>} : memref<256x256xf32, #tpu.memory_space<vmem>>, vector<256x256xf32>,
    %c0_7 = arith.constant 0 : index
    %c0_8 = arith.constant 0 : index
    %8 = vector.load %arg3[%c0_7, %c0_8] : memref<256x256xbf16, #tpu.memory_space<vmem>>, vector<256x256xbf16>
    %cst_9 = arith.constant dense<0.000000e+00> : vector<256x256xf32>
    %9 = tpu.matmul %1, %8, %cst_9 {dimension_numbers = #tpu.dot_dimension_numbers<[1], [0], [0], [1], [0, 0, 1, 1], [], []>} : vector<256x256xbf16>, vector<256x256xbf16>, vector<256x256xf32> -> vector<256x256xf32>
    %c0_10 = arith.constant 0 : index
    %c0_11 = arith.constant 0 : index
    %10 = vector.load %arg4[%c0_10, %c0_11] : memref<1x256xf32, #tpu.memory_space<vmem>>, vector<1x256xf32>
    %11 = vector.broadcast %10 : vector<1x256xf32> to vector<256x256xf32>
    %12 = arith.addf %9, %11 : vector<256x256xf32>
    %c0_12 = arith.constant 0 : index
    %c0_13 = arith.constant 0 : index
    %13 = vector.load %arg8[%c0_12, %c0_13] : memref<256x256xf32, #tpu.memory_space<vmem>>, vector<256x256xf32>
    tpu.vector_store %arg8[%c0_12, %c0_13], %12 {strides = array<i32>} : memref<256x256xf32, #tpu.memory_space<vmem>>, vector<256x256xf32>,
    %c0_14 = arith.constant 0 : index
    %c0_15 = arith.constant 0 : index
    %14 = vector.load %arg5[%c0_14, %c0_15] : memref<256x256xbf16, #tpu.memory_space<vmem>>, vector<256x256xbf16>
    %cst_16 = arith.constant dense<0.000000e+00> : vector<256x256xf32>
    %15 = tpu.matmul %1, %14, %cst_16 {dimension_numbers = #tpu.dot_dimension_numbers<[1], [0], [0], [1], [0, 0, 1, 1], [], []>} : vector<256x256xbf16>, vector<256x256xbf16>, vector<256x256xf32> -> vector<256x256xf32>
    %c0_17 = arith.constant 0 : index
    %c0_18 = arith.constant 0 : index
    %16 = vector.load %arg6[%c0_17, %c0_18] : memref<1x256xf32, #tpu.memory_space<vmem>>, vector<1x256xf32>
    %17 = vector.broadcast %16 : vector<1x256xf32> to vector<256x256xf32>
    %18 = arith.addf %15, %17 : vector<256x256xf32>
    %c0_19 = arith.constant 0 : index
    %c0_20 = arith.constant 0 : index
    %19 = vector.load %arg9[%c0_19, %c0_20] : memref<256x256xf32, #tpu.memory_space<vmem>>, vector<256x256xf32>
    tpu.vector_store %arg9[%c0_19, %c0_20], %18 {strides = array<i32>} : memref<256x256xf32, #tpu.memory_space<vmem>>, vector<256x256xf32>,
    return
  }
}

module attributes {stable_mosaic.version = 11 : i64} {
  func.func @_linear_kernel(%arg0: memref<6x768xf32, #tpu.memory_space<vmem>>, %arg1: memref<768x256xbf16, #tpu.memory_space<vmem>>, %arg2: memref<1x256xf32, #tpu.memory_space<vmem>>, %arg3: memref<6x256xf32, #tpu.memory_space<vmem>>) attributes {dimension_semantics = [], scalar_prefetch = 0 : i64, scratch_operands = 0 : i64, tpu.core_type = #tpu.core_type<tc>} {
    %c0 = arith.constant 0 : index
    %c0_0 = arith.constant 0 : index
    %0 = vector.load %arg0[%c0, %c0_0] : memref<6x768xf32, #tpu.memory_space<vmem>>, vector<6x768xf32>
    %c0_1 = arith.constant 0 : index
    %c0_2 = arith.constant 0 : index
    %1 = vector.load %arg1[%c0_1, %c0_2] : memref<768x256xbf16, #tpu.memory_space<vmem>>, vector<768x256xbf16>
    %2 = arith.truncf %0 : vector<6x768xf32> to vector<6x768xbf16>
    %cst = arith.constant dense<0.000000e+00> : vector<6x256xf32>
    %3 = tpu.matmul %2, %1, %cst {dimension_numbers = #tpu.dot_dimension_numbers<[1], [0], [0], [1], [0, 0, 1, 1], [], []>} : vector<6x768xbf16>, vector<768x256xbf16>, vector<6x256xf32> -> vector<6x256xf32>
    %c0_3 = arith.constant 0 : index
    %c0_4 = arith.constant 0 : index
    %4 = vector.load %arg2[%c0_3, %c0_4] : memref<1x256xf32, #tpu.memory_space<vmem>>, vector<1x256xf32>
    %5 = vector.broadcast %4 : vector<1x256xf32> to vector<6x256xf32>
    %6 = arith.addf %3, %5 : vector<6x256xf32>
    %c0_5 = arith.constant 0 : index
    %c0_6 = arith.constant 0 : index
    %7 = vector.load %arg3[%c0_5, %c0_6] : memref<6x256xf32, #tpu.memory_space<vmem>>, vector<6x256xf32>
    tpu.vector_store %arg3[%c0_5, %c0_6], %6 {strides = array<i32>} : memref<6x256xf32, #tpu.memory_space<vmem>>, vector<6x256xf32>,
    return
  }
}

module attributes {stable_mosaic.version = 11 : i64} {
  func.func @_linear2_bn_kernel(%arg0: memref<8x768xf32, #tpu.memory_space<vmem>>, %arg1: memref<768x256xbf16, #tpu.memory_space<vmem>>, %arg2: memref<1x256xf32, #tpu.memory_space<vmem>>, %arg3: memref<256x256xbf16, #tpu.memory_space<vmem>>, %arg4: memref<1x256xf32, #tpu.memory_space<vmem>>, %arg5: memref<1x256xf32, #tpu.memory_space<vmem>>, %arg6: memref<1x256xf32, #tpu.memory_space<vmem>>, %arg7: memref<1x256xf32, #tpu.memory_space<vmem>>, %arg8: memref<1x256xf32, #tpu.memory_space<vmem>>, %arg9: memref<8x256xf32, #tpu.memory_space<vmem>>) attributes {dimension_semantics = [], scalar_prefetch = 0 : i64, scratch_operands = 0 : i64, tpu.core_type = #tpu.core_type<tc>} {
    %c0 = arith.constant 0 : index
    %c0_0 = arith.constant 0 : index
    %0 = vector.load %arg0[%c0, %c0_0] : memref<8x768xf32, #tpu.memory_space<vmem>>, vector<8x768xf32>
    %c0_1 = arith.constant 0 : index
    %c0_2 = arith.constant 0 : index
    %1 = vector.load %arg1[%c0_1, %c0_2] : memref<768x256xbf16, #tpu.memory_space<vmem>>, vector<768x256xbf16>
    %2 = arith.truncf %0 : vector<8x768xf32> to vector<8x768xbf16>
    %cst = arith.constant dense<0.000000e+00> : vector<8x256xf32>
    %3 = tpu.matmul %2, %1, %cst {dimension_numbers = #tpu.dot_dimension_numbers<[1], [0], [0], [1], [0, 0, 1, 1], [], []>} : vector<8x768xbf16>, vector<768x256xbf16>, vector<8x256xf32> -> vector<8x256xf32>
    %c0_3 = arith.constant 0 : index
    %c0_4 = arith.constant 0 : index
    %4 = vector.load %arg2[%c0_3, %c0_4] : memref<1x256xf32, #tpu.memory_space<vmem>>, vector<1x256xf32>
    %5 = vector.broadcast %4 : vector<1x256xf32> to vector<8x256xf32>
    %6 = arith.addf %3, %5 : vector<8x256xf32>
    %c0_5 = arith.constant 0 : index
    %c0_6 = arith.constant 0 : index
    %7 = vector.load %arg3[%c0_5, %c0_6] : memref<256x256xbf16, #tpu.memory_space<vmem>>, vector<256x256xbf16>
    %8 = arith.truncf %6 : vector<8x256xf32> to vector<8x256xbf16>
    %cst_7 = arith.constant dense<0.000000e+00> : vector<8x256xf32>
    %9 = tpu.matmul %8, %7, %cst_7 {dimension_numbers = #tpu.dot_dimension_numbers<[1], [0], [0], [1], [0, 0, 1, 1], [], []>} : vector<8x256xbf16>, vector<256x256xbf16>, vector<8x256xf32> -> vector<8x256xf32>
    %c0_8 = arith.constant 0 : index
    %c0_9 = arith.constant 0 : index
    %10 = vector.load %arg4[%c0_8, %c0_9] : memref<1x256xf32, #tpu.memory_space<vmem>>, vector<1x256xf32>
    %11 = vector.broadcast %10 : vector<1x256xf32> to vector<8x256xf32>
    %12 = arith.addf %9, %11 : vector<8x256xf32>
    %c0_10 = arith.constant 0 : index
    %c0_11 = arith.constant 0 : index
    %13 = vector.load %arg5[%c0_10, %c0_11] : memref<1x256xf32, #tpu.memory_space<vmem>>, vector<1x256xf32>
    %c0_12 = arith.constant 0 : index
    %c0_13 = arith.constant 0 : index
    %14 = vector.load %arg6[%c0_12, %c0_13] : memref<1x256xf32, #tpu.memory_space<vmem>>, vector<1x256xf32>
    %c0_14 = arith.constant 0 : index
    %c0_15 = arith.constant 0 : index
    %15 = vector.load %arg7[%c0_14, %c0_15] : memref<1x256xf32, #tpu.memory_space<vmem>>, vector<1x256xf32>
    %c0_16 = arith.constant 0 : index
    %c0_17 = arith.constant 0 : index
    %16 = vector.load %arg8[%c0_16, %c0_17] : memref<1x256xf32, #tpu.memory_space<vmem>>, vector<1x256xf32>
    %17 = vector.broadcast %15 : vector<1x256xf32> to vector<8x256xf32>
    %18 = arith.subf %12, %17 : vector<8x256xf32>
    %cst_18 = arith.constant 9.99999974E-6 : f32
    %19 = vector.broadcast %cst_18 : f32 to vector<1x256xf32>
    %20 = arith.addf %16, %19 : vector<1x256xf32>
    %21 = math.rsqrt %20 : vector<1x256xf32>
    %22 = vector.broadcast %21 : vector<1x256xf32> to vector<8x256xf32>
    %23 = arith.mulf %18, %22 : vector<8x256xf32>
    %24 = vector.broadcast %13 : vector<1x256xf32> to vector<8x256xf32>
    %25 = arith.mulf %23, %24 : vector<8x256xf32>
    %26 = vector.broadcast %14 : vector<1x256xf32> to vector<8x256xf32>
    %27 = arith.addf %25, %26 : vector<8x256xf32>
    %c0_19 = arith.constant 0 : index
    %c0_20 = arith.constant 0 : index
    %28 = vector.load %arg9[%c0_19, %c0_20] : memref<8x256xf32, #tpu.memory_space<vmem>>, vector<8x256xf32>
    tpu.vector_store %arg9[%c0_19, %c0_20], %27 {strides = array<i32>} : memref<8x256xf32, #tpu.memory_space<vmem>>, vector<8x256xf32>,
    return
  }
}

module attributes {stable_mosaic.version = 11 : i64} {
  func.func @_mc_branch_kernel(%arg0: memref<2x256xf32, #tpu.memory_space<vmem>>, %arg1: memref<256x256xbf16, #tpu.memory_space<vmem>>, %arg2: memref<1x256xf32, #tpu.memory_space<vmem>>, %arg3: memref<1x256xf32, #tpu.memory_space<vmem>>, %arg4: memref<1x256xf32, #tpu.memory_space<vmem>>, %arg5: memref<1x256xf32, #tpu.memory_space<vmem>>, %arg6: memref<1x256xf32, #tpu.memory_space<vmem>>, %arg7: memref<2x256xf32, #tpu.memory_space<vmem>>, %arg8: memref<2x256xf32, #tpu.memory_space<vmem>>, %arg9: memref<256x256xbf16, #tpu.memory_space<vmem>>, %arg10: memref<256x256xbf16, #tpu.memory_space<vmem>>, %arg11: memref<256x256xbf16, #tpu.memory_space<vmem>>, %arg12: memref<1x256xf32, #tpu.memory_space<vmem>>, %arg13: memref<2x4x256xf32, #tpu.memory_space<vmem>>, %arg14: memref<2x4x256xf32, #tpu.memory_space<vmem>>, %arg15: memref<2x4x256xf32, #tpu.memory_space<vmem>>, %arg16: memref<2x1xi32, #tpu.memory_space<vmem>>, %arg17: memref<2x4xf32, #tpu.memory_space<vmem>>, %arg18: memref<1x1xf32, #tpu.memory_space<vmem>>) attributes {dimension_semantics = [], scalar_prefetch = 0 : i64, scratch_operands = 0 : i64, tpu.core_type = #tpu.core_type<tc>} {
    %c0 = arith.constant 0 : index
    %c0_0 = arith.constant 0 : index
    %0 = vector.load %arg0[%c0, %c0_0] : memref<2x256xf32, #tpu.memory_space<vmem>>, vector<2x256xf32>
    %c0_1 = arith.constant 0 : index
    %c0_2 = arith.constant 0 : index
    %1 = vector.load %arg1[%c0_1, %c0_2] : memref<256x256xbf16, #tpu.memory_space<vmem>>, vector<256x256xbf16>
    %2 = arith.truncf %0 : vector<2x256xf32> to vector<2x256xbf16>
    %cst = arith.constant dense<0.000000e+00> : vector<2x256xf32>
    %3 = tpu.matmul %2, %1, %cst {dimension_numbers = #tpu.dot_dimension_numbers<[1], [0], [0], [1], [0, 0, 1, 1], [], []>} : vector<2x256xbf16>, vector<256x256xbf16>, vector<2x256xf32> -> vector<2x256xf32>
    %c0_3 = arith.constant 0 : index
    %c0_4 = arith.constant 0 : index
    %4 = vector.load %arg2[%c0_3, %c0_4] : memref<1x256xf32, #tpu.memory_space<vmem>>, vector<1x256xf32>
    %5 = vector.broadcast %4 : vector<1x256xf32> to vector<2x256xf32>
    %6 = arith.addf %3, %5 : vector<2x256xf32>
    %c0_5 = arith.constant 0 : index
    %c0_6 = arith.constant 0 : index
    %7 = vector.load %arg3[%c0_5, %c0_6] : memref<1x256xf32, #tpu.memory_space<vmem>>, vector<1x256xf32>
    %c0_7 = arith.constant 0 : index
    %c0_8 = arith.constant 0 : index
    %8 = vector.load %arg4[%c0_7, %c0_8] : memref<1x256xf32, #tpu.memory_space<vmem>>, vector<1x256xf32>
    %c0_9 = arith.constant 0 : index
    %c0_10 = arith.constant 0 : index
    %9 = vector.load %arg5[%c0_9, %c0_10] : memref<1x256xf32, #tpu.memory_space<vmem>>, vector<1x256xf32>
    %c0_11 = arith.constant 0 : index
    %c0_12 = arith.constant 0 : index
    %10 = vector.load %arg6[%c0_11, %c0_12] : memref<1x256xf32, #tpu.memory_space<vmem>>, vector<1x256xf32>
    %11 = vector.broadcast %9 : vector<1x256xf32> to vector<2x256xf32>
    %12 = arith.subf %6, %11 : vector<2x256xf32>
    %cst_13 = arith.constant 9.99999974E-6 : f32
    %13 = vector.broadcast %cst_13 : f32 to vector<1x256xf32>
    %14 = arith.addf %10, %13 : vector<1x256xf32>
    %15 = math.rsqrt %14 : vector<1x256xf32>
    %16 = vector.broadcast %15 : vector<1x256xf32> to vector<2x256xf32>
    %17 = arith.mulf %12, %16 : vector<2x256xf32>
    %18 = vector.broadcast %7 : vector<1x256xf32> to vector<2x256xf32>
    %19 = arith.mulf %17, %18 : vector<2x256xf32>
    %20 = vector.broadcast %8 : vector<1x256xf32> to vector<2x256xf32>
    %21 = arith.addf %19, %20 : vector<2x256xf32>
    %c0_14 = arith.constant 0 : index
    %c0_15 = arith.constant 0 : index
    %22 = vector.load %arg7[%c0_14, %c0_15] : memref<2x256xf32, #tpu.memory_space<vmem>>, vector<2x256xf32>
    %c0_16 = arith.constant 0 : index
    %c0_17 = arith.constant 0 : index
    %23 = vector.load %arg9[%c0_16, %c0_17] : memref<256x256xbf16, #tpu.memory_space<vmem>>, vector<256x256xbf16>
    %24 = arith.truncf %22 : vector<2x256xf32> to vector<2x256xbf16>
    %cst_18 = arith.constant dense<0.000000e+00> : vector<2x256xf32>
    %25 = tpu.matmul %24, %23, %cst_18 {dimension_numbers = #tpu.dot_dimension_numbers<[1], [0], [0], [1], [0, 0, 1, 1], [], []>} : vector<2x256xbf16>, vector<256x256xbf16>, vector<2x256xf32> -> vector<2x256xf32>
    %c0_19 = arith.constant 0 : index
    %c0_20 = arith.constant 0 : index
    %26 = vector.load %arg10[%c0_19, %c0_20] : memref<256x256xbf16, #tpu.memory_space<vmem>>, vector<256x256xbf16>
    %27 = arith.truncf %21 : vector<2x256xf32> to vector<2x256xbf16>
    %cst_21 = arith.constant dense<0.000000e+00> : vector<2x256xf32>
    %28 = tpu.matmul %27, %26, %cst_21 {dimension_numbers = #tpu.dot_dimension_numbers<[1], [0], [0], [1], [0, 0, 1, 1], [], []>} : vector<2x256xbf16>, vector<256x256xbf16>, vector<2x256xf32> -> vector<2x256xf32>
    %29 = arith.addf %25, %28 : vector<2x256xf32>
    %c0_22 = arith.constant 0 : index
    %c0_23 = arith.constant 0 : index
    %30 = vector.load %arg8[%c0_22, %c0_23] : memref<2x256xf32, #tpu.memory_space<vmem>>, vector<2x256xf32>
    %c0_24 = arith.constant 0 : index
    %c0_25 = arith.constant 0 : index
    %31 = vector.load %arg11[%c0_24, %c0_25] : memref<256x256xbf16, #tpu.memory_space<vmem>>, vector<256x256xbf16>
    %32 = arith.truncf %30 : vector<2x256xf32> to vector<2x256xbf16>
    %cst_26 = arith.constant dense<0.000000e+00> : vector<2x256xf32>
    %33 = tpu.matmul %32, %31, %cst_26 {dimension_numbers = #tpu.dot_dimension_numbers<[1], [0], [0], [1], [0, 0, 1, 1], [], []>} : vector<2x256xbf16>, vector<256x256xbf16>, vector<2x256xf32> -> vector<2x256xf32>
    %34 = arith.addf %29, %33 : vector<2x256xf32>
    %c0_27 = arith.constant 0 : index
    %c0_28 = arith.constant 0 : index
    %35 = vector.load %arg12[%c0_27, %c0_28] : memref<1x256xf32, #tpu.memory_space<vmem>>, vector<1x256xf32>
    %36 = vector.broadcast %35 : vector<1x256xf32> to vector<2x256xf32>
    %37 = arith.addf %34, %36 : vector<2x256xf32>
    %c0_29 = arith.constant 0 : index
    %c0_30 = arith.constant 0 : index
    %c0_31 = arith.constant 0 : index
    %38 = vector.load %arg13[%c0_29, %c0_30, %c0_31] : memref<2x4x256xf32, #tpu.memory_space<vmem>>, vector<2x4x256xf32>
    %c0_32 = arith.constant 0 : index
    %c0_33 = arith.constant 0 : index
    %c0_34 = arith.constant 0 : index
    %39 = vector.load %arg14[%c0_32, %c0_33, %c0_34] : memref<2x4x256xf32, #tpu.memory_space<vmem>>, vector<2x4x256xf32>
    %c0_35 = arith.constant 0 : index
    %c0_36 = arith.constant 0 : index
    %c0_37 = arith.constant 0 : index
    %40 = vector.load %arg15[%c0_35, %c0_36, %c0_37] : memref<2x4x256xf32, #tpu.memory_space<vmem>>, vector<2x4x256xf32>
    %41 = vector.extract_strided_slice %38 {offsets = [0, 0, 0], sizes = [2, 4, 128], strides = [1, 1, 1]} : vector<2x4x256xf32> to vector<2x4x128xf32>
    %42 = vector.extract_strided_slice %38 {offsets = [0, 0, 128], sizes = [2, 4, 128], strides = [1, 1, 1]} : vector<2x4x256xf32> to vector<2x4x128xf32>
    %43 = vector.extract_strided_slice %39 {offsets = [0, 0, 0], sizes = [2, 4, 128], strides = [1, 1, 1]} : vector<2x4x256xf32> to vector<2x4x128xf32>
    %44 = vector.extract_strided_slice %39 {offsets = [0, 0, 128], sizes = [2, 4, 128], strides = [1, 1, 1]} : vector<2x4x256xf32> to vector<2x4x128xf32>
    %45 = vector.extract_strided_slice %40 {offsets = [0, 0, 0], sizes = [2, 4, 128], strides = [1, 1, 1]} : vector<2x4x256xf32> to vector<2x4x128xf32>
    %46 = vector.extract_strided_slice %40 {offsets = [0, 0, 128], sizes = [2, 4, 128], strides = [1, 1, 1]} : vector<2x4x256xf32> to vector<2x4x128xf32>
    %47 = arith.mulf %41, %43 : vector<2x4x128xf32>
    %48 = arith.mulf %47, %45 : vector<2x4x128xf32>
    %49 = arith.mulf %42, %44 : vector<2x4x128xf32>
    %50 = arith.mulf %49, %45 : vector<2x4x128xf32>
    %51 = arith.subf %48, %50 : vector<2x4x128xf32>
    %52 = arith.mulf %42, %43 : vector<2x4x128xf32>
    %53 = arith.mulf %52, %46 : vector<2x4x128xf32>
    %54 = arith.subf %51, %53 : vector<2x4x128xf32>
    %55 = arith.mulf %41, %44 : vector<2x4x128xf32>
    %56 = arith.mulf %55, %46 : vector<2x4x128xf32>
    %57 = arith.addf %54, %56 : vector<2x4x128xf32>
    %58 = arith.mulf %42, %43 : vector<2x4x128xf32>
    %59 = arith.mulf %58, %45 : vector<2x4x128xf32>
    %60 = arith.mulf %41, %44 : vector<2x4x128xf32>
    %61 = arith.mulf %60, %45 : vector<2x4x128xf32>
    %62 = arith.subf %59, %61 : vector<2x4x128xf32>
    %63 = arith.mulf %41, %43 : vector<2x4x128xf32>
    %64 = arith.mulf %63, %46 : vector<2x4x128xf32>
    %65 = arith.addf %62, %64 : vector<2x4x128xf32>
    %66 = arith.mulf %42, %44 : vector<2x4x128xf32>
    %67 = arith.mulf %66, %46 : vector<2x4x128xf32>
    %68 = arith.subf %65, %67 : vector<2x4x128xf32>
    %69 = vector.extract_strided_slice %37 {offsets = [0, 0], sizes = [2, 128], strides = [1, 1]} : vector<2x256xf32> to vector<2x128xf32>
    %70 = vector.extract_strided_slice %37 {offsets = [0, 128], sizes = [2, 128], strides = [1, 1]} : vector<2x256xf32> to vector<2x128xf32>
    %71 = vector.shape_cast %69 : vector<2x128xf32> to vector<2x1x128xf32>
    %72 = vector.broadcast %71 : vector<2x1x128xf32> to vector<2x4x128xf32>
    %73 = arith.mulf %57, %72 : vector<2x4x128xf32>
    %74 = vector.shape_cast %70 : vector<2x128xf32> to vector<2x1x128xf32>
    %75 = vector.broadcast %74 : vector<2x1x128xf32> to vector<2x4x128xf32>
    %76 = arith.mulf %68, %75 : vector<2x4x128xf32>
    %77 = arith.addf %73, %76 : vector<2x4x128xf32>
    %cst_38 = arith.constant dense<0.000000e+00> : vector<2x4xf32>
    %78 = vector.multi_reduction <add>, %77, %cst_38 [2] : vector<2x4x128xf32> to vector<2x4xf32>
    %c0_39 = arith.constant 0 : index
    %c0_40 = arith.constant 0 : index
    %79 = vector.load %arg17[%c0_39, %c0_40] : memref<2x4xf32, #tpu.memory_space<vmem>>, vector<2x4xf32>
    tpu.vector_store %arg17[%c0_39, %c0_40], %78 {strides = array<i32>} : memref<2x4xf32, #tpu.memory_space<vmem>>, vector<2x4xf32>,
    %c0_41 = arith.constant 0 : index
    %c0_42 = arith.constant 0 : index
    %80 = vector.load %arg16[%c0_41, %c0_42] : memref<2x1xi32, #tpu.memory_space<vmem>>, vector<2x1xi32>
    %cst_43 = arith.constant dense<0xFF800000> : vector<2xf32>
    %81 = vector.multi_reduction <maximumf>, %78, %cst_43 [1] : vector<2x4xf32> to vector<2xf32>
    %82 = vector.shape_cast %81 : vector<2xf32> to vector<2x1xf32>
    %83 = vector.broadcast %82 : vector<2x1xf32> to vector<2x4xf32>
    %84 = arith.subf %78, %83 : vector<2x4xf32>
    %85 = math.exp %84 : vector<2x4xf32>
    %cst_44 = arith.constant dense<0.000000e+00> : vector<2xf32>
    %86 = vector.multi_reduction <add>, %85, %cst_44 [1] : vector<2x4xf32> to vector<2xf32>
    %87 = vector.shape_cast %86 : vector<2xf32> to vector<2x1xf32>
    %88 = math.log %87 : vector<2x1xf32>
    %89 = arith.addf %82, %88 : vector<2x1xf32>
    %90 = tpu.iota {dimensions = array<i32: 1>} : vector<2x4xi32>
    %91 = vector.broadcast %80 : vector<2x1xi32> to vector<2x4xi32>
    %92 = arith.cmpi eq, %90, %91 : vector<2x4xi32>
    %93 = arith.extui %92 : vector<2x4xi1> to vector<2x4xi32>
    %94 = arith.sitofp %93 : vector<2x4xi32> to vector<2x4xf32>
    %95 = arith.mulf %94, %78 : vector<2x4xf32>
    %cst_45 = arith.constant dense<0.000000e+00> : vector<2xf32>
    %96 = vector.multi_reduction <add>, %95, %cst_45 [1] : vector<2x4xf32> to vector<2xf32>
    %97 = vector.shape_cast %96 : vector<2xf32> to vector<2x1xf32>
    %98 = arith.subf %89, %97 : vector<2x1xf32>
    %99 = vector.shape_cast %98 : vector<2x1xf32> to vector<1x2x1xf32>
    %cst_46 = arith.constant dense<0.000000e+00> : vector<1xf32>
    %100 = vector.multi_reduction <add>, %99, %cst_46 [1, 2] : vector<1x2x1xf32> to vector<1xf32>
    %101 = vector.shape_cast %100 : vector<1xf32> to vector<1x1x1xf32>
    %102 = vector.extract %101[0, 0, 0] : f32 from vector<1x1x1xf32>
    %cst_47 = arith.constant 2.000000e+00 : f32
    %103 = arith.divf %102, %cst_47 : f32
    %104 = vector.broadcast %103 : f32 to vector<1x1xf32>
    %c0_48 = arith.constant 0 : index
    %c0_49 = arith.constant 0 : index
    %105 = vector.load %arg18[%c0_48, %c0_49] : memref<1x1xf32, #tpu.memory_space<vmem>>, vector<1x1xf32>
    tpu.vector_store %arg18[%c0_48, %c0_49], %104 {strides = array<i32>} : memref<1x1xf32, #tpu.memory_space<vmem>>, vector<1x1xf32>,
    return
  }
}

module attributes {stable_mosaic.version = 11 : i64} {
  func.func @_linear2_bn_kernel(%arg0: memref<4x768xf32, #tpu.memory_space<vmem>>, %arg1: memref<768x256xbf16, #tpu.memory_space<vmem>>, %arg2: memref<1x256xf32, #tpu.memory_space<vmem>>, %arg3: memref<256x256xbf16, #tpu.memory_space<vmem>>, %arg4: memref<1x256xf32, #tpu.memory_space<vmem>>, %arg5: memref<1x256xf32, #tpu.memory_space<vmem>>, %arg6: memref<1x256xf32, #tpu.memory_space<vmem>>, %arg7: memref<1x256xf32, #tpu.memory_space<vmem>>, %arg8: memref<1x256xf32, #tpu.memory_space<vmem>>, %arg9: memref<4x256xf32, #tpu.memory_space<vmem>>) attributes {dimension_semantics = [], scalar_prefetch = 0 : i64, scratch_operands = 0 : i64, tpu.core_type = #tpu.core_type<tc>} {
    %c0 = arith.constant 0 : index
    %c0_0 = arith.constant 0 : index
    %0 = vector.load %arg0[%c0, %c0_0] : memref<4x768xf32, #tpu.memory_space<vmem>>, vector<4x768xf32>
    %c0_1 = arith.constant 0 : index
    %c0_2 = arith.constant 0 : index
    %1 = vector.load %arg1[%c0_1, %c0_2] : memref<768x256xbf16, #tpu.memory_space<vmem>>, vector<768x256xbf16>
    %2 = arith.truncf %0 : vector<4x768xf32> to vector<4x768xbf16>
    %cst = arith.constant dense<0.000000e+00> : vector<4x256xf32>
    %3 = tpu.matmul %2, %1, %cst {dimension_numbers = #tpu.dot_dimension_numbers<[1], [0], [0], [1], [0, 0, 1, 1], [], []>} : vector<4x768xbf16>, vector<768x256xbf16>, vector<4x256xf32> -> vector<4x256xf32>
    %c0_3 = arith.constant 0 : index
    %c0_4 = arith.constant 0 : index
    %4 = vector.load %arg2[%c0_3, %c0_4] : memref<1x256xf32, #tpu.memory_space<vmem>>, vector<1x256xf32>
    %5 = vector.broadcast %4 : vector<1x256xf32> to vector<4x256xf32>
    %6 = arith.addf %3, %5 : vector<4x256xf32>
    %c0_5 = arith.constant 0 : index
    %c0_6 = arith.constant 0 : index
    %7 = vector.load %arg3[%c0_5, %c0_6] : memref<256x256xbf16, #tpu.memory_space<vmem>>, vector<256x256xbf16>
    %8 = arith.truncf %6 : vector<4x256xf32> to vector<4x256xbf16>
    %cst_7 = arith.constant dense<0.000000e+00> : vector<4x256xf32>
    %9 = tpu.matmul %8, %7, %cst_7 {dimension_numbers = #tpu.dot_dimension_numbers<[1], [0], [0], [1], [0, 0, 1, 1], [], []>} : vector<4x256xbf16>, vector<256x256xbf16>, vector<4x256xf32> -> vector<4x256xf32>
    %c0_8 = arith.constant 0 : index
    %c0_9 = arith.constant 0 : index
    %10 = vector.load %arg4[%c0_8, %c0_9] : memref<1x256xf32, #tpu.memory_space<vmem>>, vector<1x256xf32>
    %11 = vector.broadcast %10 : vector<1x256xf32> to vector<4x256xf32>
    %12 = arith.addf %9, %11 : vector<4x256xf32>
    %c0_10 = arith.constant 0 : index
    %c0_11 = arith.constant 0 : index
    %13 = vector.load %arg5[%c0_10, %c0_11] : memref<1x256xf32, #tpu.memory_space<vmem>>, vector<1x256xf32>
    %c0_12 = arith.constant 0 : index
    %c0_13 = arith.constant 0 : index
    %14 = vector.load %arg6[%c0_12, %c0_13] : memref<1x256xf32, #tpu.memory_space<vmem>>, vector<1x256xf32>
    %c0_14 = arith.constant 0 : index
    %c0_15 = arith.constant 0 : index
    %15 = vector.load %arg7[%c0_14, %c0_15] : memref<1x256xf32, #tpu.memory_space<vmem>>, vector<1x256xf32>
    %c0_16 = arith.constant 0 : index
    %c0_17 = arith.constant 0 : index
    %16 = vector.load %arg8[%c0_16, %c0_17] : memref<1x256xf32, #tpu.memory_space<vmem>>, vector<1x256xf32>
    %17 = vector.broadcast %15 : vector<1x256xf32> to vector<4x256xf32>
    %18 = arith.subf %12, %17 : vector<4x256xf32>
    %cst_18 = arith.constant 9.99999974E-6 : f32
    %19 = vector.broadcast %cst_18 : f32 to vector<1x256xf32>
    %20 = arith.addf %16, %19 : vector<1x256xf32>
    %21 = math.rsqrt %20 : vector<1x256xf32>
    %22 = vector.broadcast %21 : vector<1x256xf32> to vector<4x256xf32>
    %23 = arith.mulf %18, %22 : vector<4x256xf32>
    %24 = vector.broadcast %13 : vector<1x256xf32> to vector<4x256xf32>
    %25 = arith.mulf %23, %24 : vector<4x256xf32>
    %26 = vector.broadcast %14 : vector<1x256xf32> to vector<4x256xf32>
    %27 = arith.addf %25, %26 : vector<4x256xf32>
    %c0_19 = arith.constant 0 : index
    %c0_20 = arith.constant 0 : index
    %28 = vector.load %arg9[%c0_19, %c0_20] : memref<4x256xf32, #tpu.memory_space<vmem>>, vector<4x256xf32>
    tpu.vector_store %arg9[%c0_19, %c0_20], %27 {strides = array<i32>} : memref<4x256xf32, #tpu.memory_space<vmem>>, vector<4x256xf32>,
    return
  }
}

module attributes {stable_mosaic.version = 11 : i64} {
  func.func @_yn_branch_kernel(%arg0: memref<2x256xf32, #tpu.memory_space<vmem>>, %arg1: memref<256x256xbf16, #tpu.memory_space<vmem>>, %arg2: memref<1x256xf32, #tpu.memory_space<vmem>>, %arg3: memref<1x256xf32, #tpu.memory_space<vmem>>, %arg4: memref<1x256xf32, #tpu.memory_space<vmem>>, %arg5: memref<1x256xf32, #tpu.memory_space<vmem>>, %arg6: memref<1x256xf32, #tpu.memory_space<vmem>>, %arg7: memref<2x256xf32, #tpu.memory_space<vmem>>, %arg8: memref<2x256xf32, #tpu.memory_space<vmem>>, %arg9: memref<2x2x256xf32, #tpu.memory_space<vmem>>, %arg10: memref<2x1xi32, #tpu.memory_space<vmem>>, %arg11: memref<2x2xf32, #tpu.memory_space<vmem>>, %arg12: memref<1x1xf32, #tpu.memory_space<vmem>>) attributes {dimension_semantics = [], scalar_prefetch = 0 : i64, scratch_operands = 0 : i64, tpu.core_type = #tpu.core_type<tc>} {
    %c0 = arith.constant 0 : index
    %c0_0 = arith.constant 0 : index
    %0 = vector.load %arg0[%c0, %c0_0] : memref<2x256xf32, #tpu.memory_space<vmem>>, vector<2x256xf32>
    %c0_1 = arith.constant 0 : index
    %c0_2 = arith.constant 0 : index
    %1 = vector.load %arg1[%c0_1, %c0_2] : memref<256x256xbf16, #tpu.memory_space<vmem>>, vector<256x256xbf16>
    %2 = arith.truncf %0 : vector<2x256xf32> to vector<2x256xbf16>
    %cst = arith.constant dense<0.000000e+00> : vector<2x256xf32>
    %3 = tpu.matmul %2, %1, %cst {dimension_numbers = #tpu.dot_dimension_numbers<[1], [0], [0], [1], [0, 0, 1, 1], [], []>} : vector<2x256xbf16>, vector<256x256xbf16>, vector<2x256xf32> -> vector<2x256xf32>
    %c0_3 = arith.constant 0 : index
    %c0_4 = arith.constant 0 : index
    %4 = vector.load %arg2[%c0_3, %c0_4] : memref<1x256xf32, #tpu.memory_space<vmem>>, vector<1x256xf32>
    %5 = vector.broadcast %4 : vector<1x256xf32> to vector<2x256xf32>
    %6 = arith.addf %3, %5 : vector<2x256xf32>
    %c0_5 = arith.constant 0 : index
    %c0_6 = arith.constant 0 : index
    %7 = vector.load %arg3[%c0_5, %c0_6] : memref<1x256xf32, #tpu.memory_space<vmem>>, vector<1x256xf32>
    %c0_7 = arith.constant 0 : index
    %c0_8 = arith.constant 0 : index
    %8 = vector.load %arg4[%c0_7, %c0_8] : memref<1x256xf32, #tpu.memory_space<vmem>>, vector<1x256xf32>
    %c0_9 = arith.constant 0 : index
    %c0_10 = arith.constant 0 : index
    %9 = vector.load %arg5[%c0_9, %c0_10] : memref<1x256xf32, #tpu.memory_space<vmem>>, vector<1x256xf32>
    %c0_11 = arith.constant 0 : index
    %c0_12 = arith.constant 0 : index
    %10 = vector.load %arg6[%c0_11, %c0_12] : memref<1x256xf32, #tpu.memory_space<vmem>>, vector<1x256xf32>
    %11 = vector.broadcast %9 : vector<1x256xf32> to vector<2x256xf32>
    %12 = arith.subf %6, %11 : vector<2x256xf32>
    %cst_13 = arith.constant 9.99999974E-6 : f32
    %13 = vector.broadcast %cst_13 : f32 to vector<1x256xf32>
    %14 = arith.addf %10, %13 : vector<1x256xf32>
    %15 = math.rsqrt %14 : vector<1x256xf32>
    %16 = vector.broadcast %15 : vector<1x256xf32> to vector<2x256xf32>
    %17 = arith.mulf %12, %16 : vector<2x256xf32>
    %18 = vector.broadcast %7 : vector<1x256xf32> to vector<2x256xf32>
    %19 = arith.mulf %17, %18 : vector<2x256xf32>
    %20 = vector.broadcast %8 : vector<1x256xf32> to vector<2x256xf32>
    %21 = arith.addf %19, %20 : vector<2x256xf32>
    %c0_14 = arith.constant 0 : index
    %c0_15 = arith.constant 0 : index
    %22 = vector.load %arg7[%c0_14, %c0_15] : memref<2x256xf32, #tpu.memory_space<vmem>>, vector<2x256xf32>
    %c0_16 = arith.constant 0 : index
    %c0_17 = arith.constant 0 : index
    %23 = vector.load %arg8[%c0_16, %c0_17] : memref<2x256xf32, #tpu.memory_space<vmem>>, vector<2x256xf32>
    %24 = vector.extract_strided_slice %22 {offsets = [0, 0], sizes = [2, 128], strides = [1, 1]} : vector<2x256xf32> to vector<2x128xf32>
    %25 = vector.extract_strided_slice %22 {offsets = [0, 128], sizes = [2, 128], strides = [1, 1]} : vector<2x256xf32> to vector<2x128xf32>
    %26 = vector.extract_strided_slice %21 {offsets = [0, 0], sizes = [2, 128], strides = [1, 1]} : vector<2x256xf32> to vector<2x128xf32>
    %27 = vector.extract_strided_slice %21 {offsets = [0, 128], sizes = [2, 128], strides = [1, 1]} : vector<2x256xf32> to vector<2x128xf32>
    %28 = vector.extract_strided_slice %23 {offsets = [0, 0], sizes = [2, 128], strides = [1, 1]} : vector<2x256xf32> to vector<2x128xf32>
    %29 = vector.extract_strided_slice %23 {offsets = [0, 128], sizes = [2, 128], strides = [1, 1]} : vector<2x256xf32> to vector<2x128xf32>
    %30 = arith.mulf %24, %26 : vector<2x128xf32>
    %31 = arith.mulf %30, %28 : vector<2x128xf32>
    %32 = arith.mulf %25, %27 : vector<2x128xf32>
    %33 = arith.mulf %32, %28 : vector<2x128xf32>
    %34 = arith.subf %31, %33 : vector<2x128xf32>
    %35 = arith.mulf %25, %26 : vector<2x128xf32>
    %36 = arith.mulf %35, %29 : vector<2x128xf32>
    %37 = arith.subf %34, %36 : vector<2x128xf32>
    %38 = arith.mulf %24, %27 : vector<2x128xf32>
    %39 = arith.mulf %38, %29 : vector<2x128xf32>
    %40 = arith.addf %37, %39 : vector<2x128xf32>
    %41 = arith.mulf %25, %26 : vector<2x128xf32>
    %42 = arith.mulf %41, %28 : vector<2x128xf32>
    %43 = arith.mulf %24, %27 : vector<2x128xf32>
    %44 = arith.mulf %43, %28 : vector<2x128xf32>
    %45 = arith.subf %42, %44 : vector<2x128xf32>
    %46 = arith.mulf %24, %26 : vector<2x128xf32>
    %47 = arith.mulf %46, %29 : vector<2x128xf32>
    %48 = arith.addf %45, %47 : vector<2x128xf32>
    %49 = arith.mulf %25, %27 : vector<2x128xf32>
    %50 = arith.mulf %49, %29 : vector<2x128xf32>
    %51 = arith.subf %48, %50 : vector<2x128xf32>
    %c0_18 = arith.constant 0 : index
    %c0_19 = arith.constant 0 : index
    %c0_20 = arith.constant 0 : index
    %52 = vector.load %arg9[%c0_18, %c0_19, %c0_20] : memref<2x2x256xf32, #tpu.memory_space<vmem>>, vector<2x2x256xf32>
    %53 = vector.extract_strided_slice %52 {offsets = [0, 0, 0], sizes = [2, 2, 128], strides = [1, 1, 1]} : vector<2x2x256xf32> to vector<2x2x128xf32>
    %54 = vector.extract_strided_slice %52 {offsets = [0, 0, 128], sizes = [2, 2, 128], strides = [1, 1, 1]} : vector<2x2x256xf32> to vector<2x2x128xf32>
    %55 = vector.shape_cast %40 : vector<2x128xf32> to vector<2x1x128xf32>
    %56 = vector.broadcast %55 : vector<2x1x128xf32> to vector<2x2x128xf32>
    %57 = arith.mulf %56, %53 : vector<2x2x128xf32>
    %58 = vector.shape_cast %51 : vector<2x128xf32> to vector<2x1x128xf32>
    %59 = vector.broadcast %58 : vector<2x1x128xf32> to vector<2x2x128xf32>
    %60 = arith.mulf %59, %54 : vector<2x2x128xf32>
    %61 = arith.addf %57, %60 : vector<2x2x128xf32>
    %cst_21 = arith.constant dense<0.000000e+00> : vector<2x2xf32>
    %62 = vector.multi_reduction <add>, %61, %cst_21 [2] : vector<2x2x128xf32> to vector<2x2xf32>
    %c0_22 = arith.constant 0 : index
    %c0_23 = arith.constant 0 : index
    %63 = vector.load %arg11[%c0_22, %c0_23] : memref<2x2xf32, #tpu.memory_space<vmem>>, vector<2x2xf32>
    tpu.vector_store %arg11[%c0_22, %c0_23], %62 {strides = array<i32>} : memref<2x2xf32, #tpu.memory_space<vmem>>, vector<2x2xf32>,
    %c0_24 = arith.constant 0 : index
    %c0_25 = arith.constant 0 : index
    %64 = vector.load %arg10[%c0_24, %c0_25] : memref<2x1xi32, #tpu.memory_space<vmem>>, vector<2x1xi32>
    %cst_26 = arith.constant dense<0xFF800000> : vector<2xf32>
    %65 = vector.multi_reduction <maximumf>, %62, %cst_26 [1] : vector<2x2xf32> to vector<2xf32>
    %66 = vector.shape_cast %65 : vector<2xf32> to vector<2x1xf32>
    %67 = vector.broadcast %66 : vector<2x1xf32> to vector<2x2xf32>
    %68 = arith.subf %62, %67 : vector<2x2xf32>
    %69 = math.exp %68 : vector<2x2xf32>
    %cst_27 = arith.constant dense<0.000000e+00> : vector<2xf32>
    %70 = vector.multi_reduction <add>, %69, %cst_27 [1] : vector<2x2xf32> to vector<2xf32>
    %71 = vector.shape_cast %70 : vector<2xf32> to vector<2x1xf32>
    %72 = math.log %71 : vector<2x1xf32>
    %73 = arith.addf %66, %72 : vector<2x1xf32>
    %74 = tpu.iota {dimensions = array<i32: 1>} : vector<2x2xi32>
    %75 = vector.broadcast %64 : vector<2x1xi32> to vector<2x2xi32>
    %76 = arith.cmpi eq, %74, %75 : vector<2x2xi32>
    %77 = arith.extui %76 : vector<2x2xi1> to vector<2x2xi32>
    %78 = arith.sitofp %77 : vector<2x2xi32> to vector<2x2xf32>
    %79 = arith.mulf %78, %62 : vector<2x2xf32>
    %cst_28 = arith.constant dense<0.000000e+00> : vector<2xf32>
    %80 = vector.multi_reduction <add>, %79, %cst_28 [1] : vector<2x2xf32> to vector<2xf32>
    %81 = vector.shape_cast %80 : vector<2xf32> to vector<2x1xf32>
    %82 = arith.subf %73, %81 : vector<2x1xf32>
    %83 = vector.shape_cast %82 : vector<2x1xf32> to vector<1x2x1xf32>
    %cst_29 = arith.constant dense<0.000000e+00> : vector<1xf32>
    %84 = vector.multi_reduction <add>, %83, %cst_29 [1, 2] : vector<1x2x1xf32> to vector<1xf32>
    %85 = vector.shape_cast %84 : vector<1xf32> to vector<1x1x1xf32>
    %86 = vector.extract %85[0, 0, 0] : f32 from vector<1x1x1xf32>
    %cst_30 = arith.constant 2.000000e+00 : f32
    %87 = arith.divf %86, %cst_30 : f32
    %88 = vector.broadcast %87 : f32 to vector<1x1xf32>
    %c0_31 = arith.constant 0 : index
    %c0_32 = arith.constant 0 : index
    %89 = vector.load %arg12[%c0_31, %c0_32] : memref<1x1xf32, #tpu.memory_space<vmem>>, vector<1x1xf32>
    tpu.vector_store %arg12[%c0_31, %c0_32], %88 {strides = array<i32>} : memref<1x1xf32, #tpu.memory_space<vmem>>, vector<1x1xf32>,
    return
  }
}

module attributes {stable_mosaic.version = 11 : i64} {
  func.func @_ep_branch_kernel(%arg0: memref<2x256xf32, #tpu.memory_space<vmem>>, %arg1: memref<256x256xbf16, #tpu.memory_space<vmem>>, %arg2: memref<1x256xf32, #tpu.memory_space<vmem>>, %arg3: memref<1x256xf32, #tpu.memory_space<vmem>>, %arg4: memref<1x256xf32, #tpu.memory_space<vmem>>, %arg5: memref<1x256xf32, #tpu.memory_space<vmem>>, %arg6: memref<1x256xf32, #tpu.memory_space<vmem>>, %arg7: memref<2x256xf32, #tpu.memory_space<vmem>>, %arg8: memref<2x32x256xf32, #tpu.memory_space<vmem>>, %arg9: memref<2x1xi32, #tpu.memory_space<vmem>>, %arg10: memref<2x32xf32, #tpu.memory_space<vmem>>, %arg11: memref<1x1xf32, #tpu.memory_space<vmem>>) attributes {dimension_semantics = [], scalar_prefetch = 0 : i64, scratch_operands = 0 : i64, tpu.core_type = #tpu.core_type<tc>} {
    %c0 = arith.constant 0 : index
    %c0_0 = arith.constant 0 : index
    %0 = vector.load %arg0[%c0, %c0_0] : memref<2x256xf32, #tpu.memory_space<vmem>>, vector<2x256xf32>
    %c0_1 = arith.constant 0 : index
    %c0_2 = arith.constant 0 : index
    %1 = vector.load %arg1[%c0_1, %c0_2] : memref<256x256xbf16, #tpu.memory_space<vmem>>, vector<256x256xbf16>
    %2 = arith.truncf %0 : vector<2x256xf32> to vector<2x256xbf16>
    %cst = arith.constant dense<0.000000e+00> : vector<2x256xf32>
    %3 = tpu.matmul %2, %1, %cst {dimension_numbers = #tpu.dot_dimension_numbers<[1], [0], [0], [1], [0, 0, 1, 1], [], []>} : vector<2x256xbf16>, vector<256x256xbf16>, vector<2x256xf32> -> vector<2x256xf32>
    %c0_3 = arith.constant 0 : index
    %c0_4 = arith.constant 0 : index
    %4 = vector.load %arg2[%c0_3, %c0_4] : memref<1x256xf32, #tpu.memory_space<vmem>>, vector<1x256xf32>
    %5 = vector.broadcast %4 : vector<1x256xf32> to vector<2x256xf32>
    %6 = arith.addf %3, %5 : vector<2x256xf32>
    %c0_5 = arith.constant 0 : index
    %c0_6 = arith.constant 0 : index
    %7 = vector.load %arg3[%c0_5, %c0_6] : memref<1x256xf32, #tpu.memory_space<vmem>>, vector<1x256xf32>
    %c0_7 = arith.constant 0 : index
    %c0_8 = arith.constant 0 : index
    %8 = vector.load %arg4[%c0_7, %c0_8] : memref<1x256xf32, #tpu.memory_space<vmem>>, vector<1x256xf32>
    %c0_9 = arith.constant 0 : index
    %c0_10 = arith.constant 0 : index
    %9 = vector.load %arg5[%c0_9, %c0_10] : memref<1x256xf32, #tpu.memory_space<vmem>>, vector<1x256xf32>
    %c0_11 = arith.constant 0 : index
    %c0_12 = arith.constant 0 : index
    %10 = vector.load %arg6[%c0_11, %c0_12] : memref<1x256xf32, #tpu.memory_space<vmem>>, vector<1x256xf32>
    %11 = vector.broadcast %9 : vector<1x256xf32> to vector<2x256xf32>
    %12 = arith.subf %6, %11 : vector<2x256xf32>
    %cst_13 = arith.constant 9.99999974E-6 : f32
    %13 = vector.broadcast %cst_13 : f32 to vector<1x256xf32>
    %14 = arith.addf %10, %13 : vector<1x256xf32>
    %15 = math.rsqrt %14 : vector<1x256xf32>
    %16 = vector.broadcast %15 : vector<1x256xf32> to vector<2x256xf32>
    %17 = arith.mulf %12, %16 : vector<2x256xf32>
    %18 = vector.broadcast %7 : vector<1x256xf32> to vector<2x256xf32>
    %19 = arith.mulf %17, %18 : vector<2x256xf32>
    %20 = vector.broadcast %8 : vector<1x256xf32> to vector<2x256xf32>
    %21 = arith.addf %19, %20 : vector<2x256xf32>
    %c0_14 = arith.constant 0 : index
    %c0_15 = arith.constant 0 : index
    %22 = vector.load %arg7[%c0_14, %c0_15] : memref<2x256xf32, #tpu.memory_space<vmem>>, vector<2x256xf32>
    %23 = vector.extract_strided_slice %22 {offsets = [0, 0], sizes = [2, 128], strides = [1, 1]} : vector<2x256xf32> to vector<2x128xf32>
    %24 = vector.extract_strided_slice %22 {offsets = [0, 128], sizes = [2, 128], strides = [1, 1]} : vector<2x256xf32> to vector<2x128xf32>
    %25 = vector.extract_strided_slice %21 {offsets = [0, 0], sizes = [2, 128], strides = [1, 1]} : vector<2x256xf32> to vector<2x128xf32>
    %26 = vector.extract_strided_slice %21 {offsets = [0, 128], sizes = [2, 128], strides = [1, 1]} : vector<2x256xf32> to vector<2x128xf32>
    %27 = arith.mulf %23, %25 : vector<2x128xf32>
    %28 = arith.mulf %24, %26 : vector<2x128xf32>
    %29 = arith.subf %27, %28 : vector<2x128xf32>
    %30 = arith.mulf %23, %26 : vector<2x128xf32>
    %31 = arith.mulf %24, %25 : vector<2x128xf32>
    %32 = arith.addf %30, %31 : vector<2x128xf32>
    %c0_16 = arith.constant 0 : index
    %c0_17 = arith.constant 0 : index
    %c0_18 = arith.constant 0 : index
    %33 = vector.load %arg8[%c0_16, %c0_17, %c0_18] : memref<2x32x256xf32, #tpu.memory_space<vmem>>, vector<2x32x256xf32>
    %34 = vector.extract_strided_slice %33 {offsets = [0, 0, 0], sizes = [2, 32, 128], strides = [1, 1, 1]} : vector<2x32x256xf32> to vector<2x32x128xf32>
    %35 = vector.extract_strided_slice %33 {offsets = [0, 0, 128], sizes = [2, 32, 128], strides = [1, 1, 1]} : vector<2x32x256xf32> to vector<2x32x128xf32>
    %36 = vector.shape_cast %29 : vector<2x128xf32> to vector<2x1x128xf32>
    %37 = vector.broadcast %36 : vector<2x1x128xf32> to vector<2x32x128xf32>
    %38 = arith.mulf %37, %34 : vector<2x32x128xf32>
    %39 = vector.shape_cast %32 : vector<2x128xf32> to vector<2x1x128xf32>
    %40 = vector.broadcast %39 : vector<2x1x128xf32> to vector<2x32x128xf32>
    %41 = arith.mulf %40, %35 : vector<2x32x128xf32>
    %42 = arith.addf %38, %41 : vector<2x32x128xf32>
    %cst_19 = arith.constant dense<0.000000e+00> : vector<2x32xf32>
    %43 = vector.multi_reduction <add>, %42, %cst_19 [2] : vector<2x32x128xf32> to vector<2x32xf32>
    %c0_20 = arith.constant 0 : index
    %c0_21 = arith.constant 0 : index
    %44 = vector.load %arg10[%c0_20, %c0_21] : memref<2x32xf32, #tpu.memory_space<vmem>>, vector<2x32xf32>
    tpu.vector_store %arg10[%c0_20, %c0_21], %43 {strides = array<i32>} : memref<2x32xf32, #tpu.memory_space<vmem>>, vector<2x32xf32>,
    %c0_22 = arith.constant 0 : index
    %c0_23 = arith.constant 0 : index
    %45 = vector.load %arg9[%c0_22, %c0_23] : memref<2x1xi32, #tpu.memory_space<vmem>>, vector<2x1xi32>
    %cst_24 = arith.constant dense<0xFF800000> : vector<2xf32>
    %46 = vector.multi_reduction <maximumf>, %43, %cst_24 [1] : vector<2x32xf32> to vector<2xf32>
    %47 = vector.shape_cast %46 : vector<2xf32> to vector<2x1xf32>
    %48 = vector.broadcast %47 : vector<2x1xf32> to vector<2x32xf32>
    %49 = arith.subf %43, %48 : vector<2x32xf32>
    %50 = math.exp %49 : vector<2x32xf32>
    %cst_25 = arith.constant dense<0.000000e+00> : vector<2xf32>
    %51 = vector.multi_reduction <add>, %50, %cst_25 [1] : vector<2x32xf32> to vector<2xf32>
    %52 = vector.shape_cast %51 : vector<2xf32> to vector<2x1xf32>
    %53 = math.log %52 : vector<2x1xf32>
    %54 = arith.addf %47, %53 : vector<2x1xf32>
    %55 = tpu.iota {dimensions = array<i32: 1>} : vector<2x32xi32>
    %56 = vector.broadcast %45 : vector<2x1xi32> to vector<2x32xi32>
    %57 = arith.cmpi eq, %55, %56 : vector<2x32xi32>
    %58 = arith.extui %57 : vector<2x32xi1> to vector<2x32xi32>
    %59 = arith.sitofp %58 : vector<2x32xi32> to vector<2x32xf32>
    %60 = arith.mulf %59, %43 : vector<2x32xf32>
    %cst_26 = arith.constant dense<0.000000e+00> : vector<2xf32>
    %61 = vector.multi_reduction <add>, %60, %cst_26 [1] : vector<2x32xf32> to vector<2xf32>
    %62 = vector.shape_cast %61 : vector<2xf32> to vector<2x1xf32>
    %63 = arith.subf %54, %62 : vector<2x1xf32>
    %64 = vector.shape_cast %63 : vector<2x1xf32> to vector<1x2x1xf32>
    %cst_27 = arith.constant dense<0.000000e+00> : vector<1xf32>
    %65 = vector.multi_reduction <add>, %64, %cst_27 [1, 2] : vector<1x2x1xf32> to vector<1xf32>
    %66 = vector.shape_cast %65 : vector<1xf32> to vector<1x1x1xf32>
    %67 = vector.extract %66[0, 0, 0] : f32 from vector<1x1x1xf32>
    %cst_28 = arith.constant 2.000000e+00 : f32
    %68 = arith.divf %67, %cst_28 : f32
    %69 = vector.broadcast %68 : f32 to vector<1x1xf32>
    %c0_29 = arith.constant 0 : index
    %c0_30 = arith.constant 0 : index
    %70 = vector.load %arg11[%c0_29, %c0_30] : memref<1x1xf32, #tpu.memory_space<vmem>>, vector<1x1xf32>
    tpu.vector_store %arg11[%c0_29, %c0_30], %69 {strides = array<i32>} : memref<1x1xf32, #tpu.memory_space<vmem>>, vector<1x1xf32>,
    return
  }
}

</mosaic_0001>

<bundles_post_ra>
// kernel: _forward_core.7
= control target key start
LH: loop header
LB: loop body
LE: loop exit
PB: predicated region body
PF: predicated region fallthrough
CT: control target
= control target key end

     0   :  { %s1318_s1 = inlined_call_operand.vmem [shape: bf16[768,256], index: 1, kind: input, shape index: {}]   ;;  %s1319_s0 = inlined_call_operand.vmem [shape: f32[6,768], index: 0, kind: input, shape index: {}]   ;;  %s1320_s2 = inlined_call_operand.vmem [shape: f32[1,256], index: 2, kind: input, shape index: {}]   ;;  %s1321_s3 = inlined_call_operand.vmem [shape: f32[6,256], index: 3, kind: output, shape index: {}]  }
   0x1   :  { %v839_v0 = vld [vmem:[%s1318_s1 + $0x74] ss:$8 sps:$4 sm:$0xff]   ;;  %v841_v1 = vld [vmem:[%s1318_s1 + $0x70] ss:$8 sps:$4 sm:$0xff]   ;;  %v845_v4 = vld [vmem:[%s1318_s1 + $0x64] ss:$8 sps:$4 sm:$0xff]  }
   0x2   :  { %614 = vmatprep.subr.bf16.mxu0 %v839_v0  ;;  %v842_v2 = vld [vmem:[%s1318_s1 + $0x174] ss:$8 sps:$4 sm:$0xff]   ;;  %v844_v3 = vld [vmem:[%s1318_s1 + $0x170] ss:$8 sps:$4 sm:$0xff]   ;;  %v847_v5 = vld [vmem:[%s1318_s1 + $0x60] ss:$8 sps:$4 sm:$0xff]  }
   0x3   :  { %615 = vmatpush1.bf16.msra.mxu0 %v841_v1  ;;  %655 = vmatprep.subr.bf16.mxu1 %v842_v2  ;;  %v848_v6 = vld [vmem:[%s1318_s1 + $0x164] ss:$8 sps:$4 sm:$0xff]   ;;  %v850_v7 = vld [vmem:[%s1318_s1 + $0x160] ss:$8 sps:$4 sm:$0xff]   ;;  %v851_v8 = vld [vmem:[%s1318_s1 + $0x54] ss:$8 sps:$4 sm:$0xff]  }
   0x4   :  { %656 = vmatpush1.bf16.msra.mxu1 %v844_v3  ;;  %616 = vmatprep.subr.bf16.mxu0 %v845_v4  ;;  %v853_v9 = vld [vmem:[%s1318_s1 + $0x50] ss:$8 sps:$4 sm:$0xff]   ;;  %v854_v10 = vld [vmem:[%s1318_s1 + $0x154] ss:$8 sps:$4 sm:$0xff]   ;;  %v857_v11 = vld [vmem:[%s1318_s1 + $0x44] ss:$8 sps:$4 sm:$0xff]  }
   0x5   :  { %657 = vmatprep.subr.bf16.mxu1 %v848_v6  ;;  %v856_v12 = vld [vmem:[%s1318_s1 + $0x150] ss:$8 sps:$4 sm:$0xff]   ;;  %v860_v13 = vld [vmem:[%s1318_s1 + $0x144] ss:$8 sps:$4 sm:$0xff]   ;;  %v859_v14 = vld [vmem:[%s1318_s1 + $0x40] ss:$8 sps:$4 sm:$0xff]  }
   0x6   :  { %v863_v15 = vld [vmem:[%s1318_s1 + $0x34] ss:$8 sps:$4 sm:$0xff]   ;;  %v862_v16 = vld [vmem:[%s1318_s1 + $0x140] ss:$8 sps:$4 sm:$0xff]   ;;  %v865_v18 = vld [vmem:[%s1318_s1 + $0x30] ss:$8 sps:$4 sm:$0xff]  }
   0x7   :  { %617 = vmatpush1.bf16.msra.mxu0 %v847_v5  ;;  %v866_v17 = vld [vmem:[%s1318_s1 + $0x134] ss:$8 sps:$4 sm:$0xff]   ;;  %v869_v19 = vld [vmem:[%s1318_s1 + $0x24] ss:$8 sps:$4 sm:$0xff]   ;;  %v868_v20 = vld [vmem:[%s1318_s1 + $0x130] ss:$8 sps:$4 sm:$0xff]  }
   0x8   :  { %618 = vmatprep.subr.bf16.mxu0 %v851_v8  ;;  %658 = vmatpush1.bf16.msra.mxu1 %v850_v7  ;;  %v872_v21 = vld [vmem:[%s1318_s1 + $0x124] ss:$8 sps:$4 sm:$0xff]   ;;  %v871_v22 = vld [vmem:[%s1318_s1 + $0x20] ss:$8 sps:$4 sm:$0xff]   ;;  %v875_v23 = vld [vmem:[%s1318_s1 + $0x14] ss:$8 sps:$4 sm:$0xff]  }
   0x9   :  { %659 = vmatprep.subr.bf16.mxu1 %v854_v10  ;;  %v874_v24 = vld [vmem:[%s1318_s1 + $0x120] ss:$8 sps:$4 sm:$0xff]   ;;  %v878_v25 = vld [vmem:[%s1318_s1 + $0x114] ss:$8 sps:$4 sm:$0xff]   ;;  %v877_v26 = vld [vmem:[%s1318_s1 + $0x10] ss:$8 sps:$4 sm:$0xff]  }
   0xa   :  { %v881_v27 = vld [vmem:[%s1318_s1 + $0x4] ss:$8 sps:$4 sm:$0xff]   ;;  %v880_v28 = vld [vmem:[%s1318_s1 + $0x110] ss:$8 sps:$4 sm:$0xff]   ;;  %v883_v30 = vld [vmem:[%s1318_s1] ss:$8 sps:$4 sm:$0xff]  }
   0xb   :  { %619 = vmatpush1.bf16.msra.mxu0 %v853_v9  ;;  %v884_v29 = vld [vmem:[%s1318_s1 + $0x104] ss:$8 sps:$4 sm:$0xff]   ;;  %v887_v31 = vld [vmem:[%s1318_s1 + $0xf4] ss:$8 sps:$4 sm:$0xff]   ;;  %v886_v32 = vld [vmem:[%s1318_s1 + $0x100] ss:$8 sps:$4 sm:$0xff]  }
   0xc   :  { %620 = vmatprep.subr.bf16.mxu0 %v857_v11  ;;  %660 = vmatpush1.bf16.msra.mxu1 %v856_v12  ;;  %v890_v33 = vld [vmem:[%s1318_s1 + $0x1f4] ss:$8 sps:$4 sm:$0xff]   ;;  %v889_v34 = vld [vmem:[%s1318_s1 + $0xf0] ss:$8 sps:$4 sm:$0xff]   ;;  %v893_v35 = vld [vmem:[%s1318_s1 + $0xe4] ss:$8 sps:$4 sm:$0xff]  }
   0xd   :  { %661 = vmatprep.subr.bf16.mxu1 %v860_v13  ;;  %v892_v36 = vld [vmem:[%s1318_s1 + $0x1f0] ss:$8 sps:$4 sm:$0xff]   ;;  %v896_v37 = vld [vmem:[%s1318_s1 + $0x1e4] ss:$8 sps:$4 sm:$0xff]   ;;  %v895_v38 = vld [vmem:[%s1318_s1 + $0xe0] ss:$8 sps:$4 sm:$0xff]  }
   0xe   :  { %v899_v39 = vld [vmem:[%s1318_s1 + $0xd4] ss:$8 sps:$4 sm:$0xff]   ;;  %v898_v40 = vld [vmem:[%s1318_s1 + $0x1e0] ss:$8 sps:$4 sm:$0xff]   ;;  %v901_v42 = vld [vmem:[%s1318_s1 + $0xd0] ss:$8 sps:$4 sm:$0xff]  }
   0xf   :  { %621 = vmatpush1.bf16.msra.mxu0 %v859_v14  ;;  %v902_v41 = vld [vmem:[%s1318_s1 + $0x1d4] ss:$8 sps:$4 sm:$0xff]   ;;  %v905_v43 = vld [vmem:[%s1318_s1 + $0xc4] ss:$8 sps:$4 sm:$0xff]   ;;  %v904_v44 = vld [vmem:[%s1318_s1 + $0x1d0] ss:$8 sps:$4 sm:$0xff]  }
  0x10   :  { %622 = vmatprep.subr.bf16.mxu0 %v863_v15  ;;  %662 = vmatpush1.bf16.msra.mxu1 %v862_v16  ;;  %v908_v45 = vld [vmem:[%s1318_s1 + $0x1c4] ss:$8 sps:$4 sm:$0xff]   ;;  %v907_v47 = vld [vmem:[%s1318_s1 + $0xc0] ss:$8 sps:$4 sm:$0xff]   ;;  %v911_v49 = vld [vmem:[%s1318_s1 + $0xb4] ss:$8 sps:$4 sm:$0xff]  }
  0x11   :  { %663 = vmatprep.subr.bf16.mxu1 %v866_v17  ;;  %v15_v46 = vld [vmem:[%s1319_s0 + $0x8] sm:$0x3f]  ;;  %v17_v50 = vld [vmem:[%s1319_s0 + $0x18] sm:$0x3f]  ;;  %v14_v4 = vld [vmem:[%s1319_s0] sm:$0x3f] }
  0x12   :  { %v117_v48 = vpack.c.bf16 %v15_v46, %v15_v46  ;;  %v910_v51 = vld [vmem:[%s1318_s1 + $0x1c0] ss:$8 sps:$4 sm:$0xff]   ;;  %v119_v52 = vpack.c.bf16 %v17_v50, %v17_v50  ;;  %v914_v53 = vld [vmem:[%s1318_s1 + $0x1b4] ss:$8 sps:$4 sm:$0xff]   ;;  %v913_v54 = vld [vmem:[%s1318_s1 + $0xb0] ss:$8 sps:$4 sm:$0xff]   ;;  %v116_v7 = vpack.c.bf16 %v14_v4, %v14_v4 }
  0x13   :  { %623 = vmatpush1.bf16.msra.mxu0 %v865_v18  ;;  %v917_v55 = vld [vmem:[%s1318_s1 + $0xa4] ss:$8 sps:$4 sm:$0xff]   ;;  %v916_v56 = vld [vmem:[%s1318_s1 + $0x1b0] ss:$8 sps:$4 sm:$0xff]   ;;  %v919_v58 = vld [vmem:[%s1318_s1 + $0xa0] ss:$8 sps:$4 sm:$0xff]  }
  0x14   :  { %624 = vmatprep.subr.bf16.mxu0 %v869_v19  ;;  %664 = vmatpush1.bf16.msra.mxu1 %v868_v20  ;;  %v920_v57 = vld [vmem:[%s1318_s1 + $0x1a4] ss:$8 sps:$4 sm:$0xff]   ;;  %v923_v59 = vld [vmem:[%s1318_s1 + $0x94] ss:$8 sps:$4 sm:$0xff]   ;;  %v922_v60 = vld [vmem:[%s1318_s1 + $0x1a0] ss:$8 sps:$4 sm:$0xff]  }
  0x15   :  { %665 = vmatprep.subr.bf16.mxu1 %v872_v21  ;;  %646 = vmatprep.mubr.bf16.mxu0 %v117_v48  ;;  %v926_v61 = vld [vmem:[%s1318_s1 + $0x194] ss:$8 sps:$4 sm:$0xff]   ;;  %v925_v62 = vld [vmem:[%s1318_s1 + $0x90] ss:$8 sps:$4 sm:$0xff]   ;;  %v929_v63 = vld [vmem:[%s1318_s1 + $0x84] ss:$8 sps:$4 sm:$0xff]  }
  0x16   :  { %687 = vmatprep.mubr.bf16.mxu1 %v119_v52  ;;  %v928_v0 = vld [vmem:[%s1318_s1 + $0x190] ss:$8 sps:$4 sm:$0xff]   ;;  %v931_v1 = vld [vmem:[%s1318_s1 + $0x80] ss:$8 sps:$4 sm:$0xff]   ;;  %v932_v2 = vld [vmem:[%s1318_s1 + $0x184] ss:$8 sps:$4 sm:$0xff]   ;;  %v124_v52 = vlaneseq }
  0x17   :  { %625 = vmatpush1.bf16.msra.mxu0 %v871_v22  ;;  %v934_v3 = vld [vmem:[%s1318_s1 + $0x180] ss:$8 sps:$4 sm:$0xff]   ;;  %v937_v5 = vld [vmem:[%s1318_s1 + $0x274] ss:$8 sps:$4 sm:$0xff]   ;;  %v935_v8 = vld [vmem:[%s1318_s1 + $0x270] ss:$8 sps:$4 sm:$0xff]  }
  0x18   :  { %626 = vmatprep.subr.bf16.mxu0 %v875_v23  ;;  %666 = vmatpush1.bf16.msra.mxu1 %v874_v24  ;;  %v16_v6 = vld [vmem:[%s1319_s0 + $0x10] sm:$0x3f]  ;;  %v940_v10 = vld [vmem:[%s1318_s1 + $0x264] ss:$8 sps:$4 sm:$0xff]   ;;  %v938_v13 = vld [vmem:[%s1318_s1 + $0x260] ss:$8 sps:$4 sm:$0xff]  }
  0x19   :  { %667 = vmatprep.subr.bf16.mxu1 %v878_v25  ;;  %v118_v9 = vpack.c.bf16 %v16_v6, %v16_v6  ;;  %v19_v11 = vld [vmem:[%s1319_s0 + $0x28] sm:$0x3f]  ;;  %v943_v14 = vld [vmem:[%s1318_s1 + $0x254] ss:$8 sps:$4 sm:$0xff]   ;;  %v941_v15 = vld [vmem:[%s1318_s1 + $0x250] ss:$8 sps:$4 sm:$0xff]  }
  0x1a   :  { %v121_v12 = vpack.c.bf16 %v19_v11, %v19_v11  ;;  %v946_v16 = vld [vmem:[%s1318_s1 + $0x244] ss:$8 sps:$4 sm:$0xff]   ;;  %v944_v17 = vld [vmem:[%s1318_s1 + $0x240] ss:$8 sps:$4 sm:$0xff]   ;;  %v949_v18 = vld [vmem:[%s1318_s1 + $0x234] ss:$8 sps:$4 sm:$0xff]  }
  0x1b   :  { %627 = vmatpush1.bf16.msra.mxu0 %v877_v26  ;;  %v947_v19 = vld [vmem:[%s1318_s1 + $0x230] ss:$8 sps:$4 sm:$0xff]   ;;  %v952_v20 = vld [vmem:[%s1318_s1 + $0x224] ss:$8 sps:$4 sm:$0xff]   ;;  %v950_v21 = vld [vmem:[%s1318_s1 + $0x220] ss:$8 sps:$4 sm:$0xff]  }
  0x1c   :  { %628 = vmatprep.subr.bf16.mxu0 %v881_v27  ;;  %668 = vmatpush1.bf16.msra.mxu1 %v880_v28  ;;  %v955_v22 = vld [vmem:[%s1318_s1 + $0x214] ss:$8 sps:$4 sm:$0xff]   ;;  %v953_v23 = vld [vmem:[%s1318_s1 + $0x210] ss:$8 sps:$4 sm:$0xff]   ;;  %v958_v24 = vld [vmem:[%s1318_s1 + $0x204] ss:$8 sps:$4 sm:$0xff]  }
  0x1d   :  { %669 = vmatprep.subr.bf16.mxu1 %v884_v29  ;;  %v956_v25 = vld [vmem:[%s1318_s1 + $0x200] ss:$8 sps:$4 sm:$0xff]   ;;  %v961_v26 = vld [vmem:[%s1318_s1 + $0x2f4] ss:$8 sps:$4 sm:$0xff]   ;;  %v959_v27 = vld [vmem:[%s1318_s1 + $0x2f0] ss:$8 sps:$4 sm:$0xff]  }
  0x1e   :  { %v964_v28 = vld [vmem:[%s1318_s1 + $0x2e4] ss:$8 sps:$4 sm:$0xff]   ;;  %v962_v29 = vld [vmem:[%s1318_s1 + $0x2e0] ss:$8 sps:$4 sm:$0xff]  }
  0x1f   :  { %629 = vmatpush1.bf16.msra.mxu0 %v883_v30  ;;  %v967_v30 = vld [vmem:[%s1318_s1 + $0x2d4] ss:$8 sps:$4 sm:$0xff]  }
  0x20   :  { %630 = vmatprep.subr.bf16.mxu0 %v887_v31  ;;  %670 = vmatpush1.bf16.msra.mxu1 %v886_v32  ;;  %v965_v31 = vld [vmem:[%s1318_s1 + $0x2d0] ss:$8 sps:$4 sm:$0xff]   ;;  %v970_v32 = vld [vmem:[%s1318_s1 + $0x2c4] ss:$8 sps:$4 sm:$0xff]  }
  0x21   :  { %671 = vmatprep.subr.bf16.mxu1 %v890_v33  ;;  %v968_v33 = vld [vmem:[%s1318_s1 + $0x2c0] ss:$8 sps:$4 sm:$0xff]  }
  0x23   :  { %631 = vmatpush2.bf16.msra.mxu0 %v889_v34  ;;  %v973_v34 = vld [vmem:[%s1318_s1 + $0x2b4] ss:$8 sps:$4 sm:$0xff]  }
  0x24   :  { %632 = vmatprep.subr.bf16.mxu0 %v893_v35  ;;  %672 = vmatpush2.bf16.msra.mxu1 %v892_v36  ;;  %v971_v35 = vld [vmem:[%s1318_s1 + $0x2b0] ss:$8 sps:$4 sm:$0xff]   ;;  %v976_v36 = vld [vmem:[%s1318_s1 + $0x2a4] ss:$8 sps:$4 sm:$0xff]  }
  0x25   :  { %673 = vmatprep.subr.bf16.mxu1 %v896_v37  ;;  %v974_v37 = vld [vmem:[%s1318_s1 + $0x2a0] ss:$8 sps:$4 sm:$0xff]  }
  0x27   :  { %633 = vmatpush2.bf16.msra.mxu0 %v895_v38  ;;  %v979_v38 = vld [vmem:[%s1318_s1 + $0x294] ss:$8 sps:$4 sm:$0xff]  }
  0x28   :  { %634 = vmatprep.subr.bf16.mxu0 %v899_v39  ;;  %674 = vmatpush2.bf16.msra.mxu1 %v898_v40  ;;  %v977_v39 = vld [vmem:[%s1318_s1 + $0x290] ss:$8 sps:$4 sm:$0xff]   ;;  %v982_v40 = vld [vmem:[%s1318_s1 + $0x284] ss:$8 sps:$4 sm:$0xff]  }
  0x29   :  { %675 = vmatprep.subr.bf16.mxu1 %v902_v41  ;;  %v980_v41 = vld [vmem:[%s1318_s1 + $0x280] ss:$8 sps:$4 sm:$0xff]  }
  0x2b   :  { %635 = vmatpush2.bf16.msra.mxu0 %v901_v42  ;;  %v18_v42 = vld [vmem:[%s1319_s0 + $0x20] sm:$0x3f] }
  0x2c   :  { %636 = vmatprep.subr.bf16.mxu0 %v905_v43  ;;  %676 = vmatpush2.bf16.msra.mxu1 %v904_v44  ;;  %v120_v43 = vpack.c.bf16 %v18_v42, %v18_v42 }
  0x2d   :  { %677 = vmatprep.subr.bf16.mxu1 %v908_v45 }
  0x2f   :  { %637 = vmatpush2.bf16.msra.mxu0 %v907_v47 }
  0x30   :  { %638 = vmatprep.subr.bf16.mxu0 %v911_v49  ;;  %678 = vmatpush2.bf16.msra.mxu1 %v910_v51 }
  0x31   :  { %679 = vmatprep.subr.bf16.mxu1 %v914_v53  ;;  %v125_v53 = vshrl.u32 %v124_v52, 7 }
  0x33   :  { %639 = vmatpush2.bf16.msra.mxu0 %v913_v54  ;;  %v126_v54 = vsub.s32 0, %v125_v53 }
  0x34   :  { %640 = vmatprep.subr.bf16.mxu0 %v917_v55  ;;  %680 = vmatpush2.bf16.msra.mxu1 %v916_v56  ;;  %v122_v55 = vld [vmem:[%s1320_s2] sm:$0x3]  ;;  %v130_v56 = vsub.s32 1, %v125_v53 }
  0x35   :  { %681 = vmatprep.subr.bf16.mxu1 %v920_v57  ;;  %v127_v57 = vrot.slane %v122_v55, %v126_v54 }
  0x37   :  { %641 = vmatpush2.bf16.msra.mxu0 %v919_v58  ;;  %v131_v58 = vrot.slane %v122_v55, %v130_v56 }
  0x38   :  { %642 = vmatprep.subr.bf16.mxu0 %v923_v59  ;;  %682 = vmatpush2.bf16.msra.mxu1 %v922_v60 }
  0x39   :  { %683 = vmatprep.subr.bf16.mxu1 %v926_v61 }
  0x3b   :  { %643 = vmatpush2.bf16.msra.mxu0 %v925_v62 }
  0x3c   :  { %644 = vmatprep.subr.bf16.mxu0 %v929_v63  ;;  %684 = vmatpush2.bf16.msra.mxu1 %v928_v0 }
  0x3d   :  { %685 = vmatprep.subr.bf16.mxu1 %v932_v2 }
  0x3f   :  { %645 = vmatpush2.bf16.msra.mxu0 %v931_v1 }
  0x40   :  { %696 = vmatprep.subr.bf16.mxu0 %v937_v5  ;;  %686 = vmatpush2.bf16.msra.mxu1 %v934_v3 }
  0x42   :  { %647 = vmatmul.mubr.bf16.vlgmr.msra.gmra.mxu0 %v116_v7 }
  0x43   :  { %697 = vmatpush1.bf16.msra.mxu0 %v935_v8  ;;  %688 = vmatmul.mubr.bf16.vlgmr.msra.gmra.mxu1 %v118_v9 }
  0x44   :  { %698 = vmatprep.subr.bf16.mxu0 %v940_v10  ;;  %728 = vmatprep.mubr.bf16.mxu0 %v121_v12 }
  0x47   :  { %699 = vmatpush1.bf16.msra.mxu0 %v938_v13 }
  0x48   :  { %700 = vmatprep.subr.bf16.mxu0 %v943_v14 }
  0x4b   :  { %701 = vmatpush1.bf16.msra.mxu0 %v941_v15 }
  0x4c   :  { %702 = vmatprep.subr.bf16.mxu0 %v946_v16 }
  0x4f   :  { %703 = vmatpush1.bf16.msra.mxu0 %v944_v17 }
  0x50   :  { %704 = vmatprep.subr.bf16.mxu0 %v949_v18 }
  0x53   :  { %705 = vmatpush1.bf16.msra.mxu0 %v947_v19 }
  0x54   :  { %706 = vmatprep.subr.bf16.mxu0 %v952_v20 }
  0x57   :  { %707 = vmatpush1.bf16.msra.mxu0 %v950_v21 }
  0x58   :  { %708 = vmatprep.subr.bf16.mxu0 %v955_v22 }
  0x5b   :  { %709 = vmatpush1.bf16.msra.mxu0 %v953_v23 }
  0x5c   :  { %710 = vmatprep.subr.bf16.mxu0 %v958_v24 }
  0x5f   :  { %711 = vmatpush1.bf16.msra.mxu0 %v956_v25 }
  0x60   :  { %712 = vmatprep.subr.bf16.mxu0 %v961_v26 }
  0x63   :  { %713 = vmatpush2.bf16.msra.mxu0 %v959_v27 }
  0x64   :  { %714 = vmatprep.subr.bf16.mxu0 %v964_v28 }
  0x67   :  { %715 = vmatpush2.bf16.msra.mxu0 %v962_v29 }
  0x68   :  { %716 = vmatprep.subr.bf16.mxu0 %v967_v30 }
  0x6b   :  { %717 = vmatpush2.bf16.msra.mxu0 %v965_v31 }
  0x6c   :  { %718 = vmatprep.subr.bf16.mxu0 %v970_v32 }
  0x6f   :  { %719 = vmatpush2.bf16.msra.mxu0 %v968_v33 }
  0x70   :  { %720 = vmatprep.subr.bf16.mxu0 %v973_v34 }
  0x73   :  { %721 = vmatpush2.bf16.msra.mxu0 %v971_v35 }
  0x74   :  { %722 = vmatprep.subr.bf16.mxu0 %v976_v36 }
  0x77   :  { %723 = vmatpush2.bf16.msra.mxu0 %v974_v37 }
  0x78   :  { %724 = vmatprep.subr.bf16.mxu0 %v979_v38 }
  0x7b   :  { %725 = vmatpush2.bf16.msra.mxu0 %v977_v39 }
  0x7c   :  { %726 = vmatprep.subr.bf16.mxu0 %v982_v40 }
  0x7f   :  { %727 = vmatpush2.bf16.msra.mxu0 %v980_v41 }
  0x82   :  { %729 = vmatmul.mubr.bf16.vlgmr.msra.gmra.mxu0 %v120_v43 }
 0x102   :  { %v648_v44 = vpop.f32.mrf.mxu0 }
 0x103   :  { %v689_v46 = vpop.f32.mrf.mxu1  ;;  %v649_v59 = vadd.f32 %v648_v44, %v127_v57 }
 0x104   :  { %v650_v45 = vpop.f32.mrf.mxu0 }
 0x105   :  { %v691_v48 = vpop.f32.mrf.mxu1  ;;  %v651_v60 = vadd.f32 %v650_v45, %v131_v58  ;;  %v690_v61 = vadd.f32 %v689_v46, %v649_v59 }
 0x106   :  { %v652_v47 = vpop.f32.mrf.mxu0 }
 0x107   :  { %v693_v50 = vpop.f32.mrf.mxu1  ;;  %v692_v63 = vadd.f32 %v691_v48, %v651_v60 }
 0x108   :  { %v653_v49 = vpop.f32.mrf.mxu0 }
 0x109   :  { %v694_v51 = vpop.f32.mrf.mxu1 }
 0x142   :  { %v730_v62 = vpop.f32.mrf.mxu0 }
 0x143   :  { %v731_v0 = vadd.f32 %v730_v62, %v690_v61 }
 0x144   :  { %v732_v1 = vpop.f32.mrf.mxu0 }
 0x145   :  { %737 = vst [vmem:[%s1321_s3] sm:$0x3f] %v731_v0  ;;  %v733_v2 = vadd.f32 %v732_v1, %v692_v63 }
 0x146   :  { %v734_v3 = vpop.f32.mrf.mxu0 }
 0x147   :  { %738 = vst [vmem:[%s1321_s3 + $0x8] sm:$0x3f] %v733_v2 }
 0x148   :  { %v735_v4 = vpop.f32.mrf.mxu0 }

// kernel: _forward_core.8
= control target key start
LH: loop header
LB: loop body
LE: loop exit
PB: predicated region body
PF: predicated region fallthrough
CT: control target
= control target key end

     0   :  { %15 = vsyncpa [#allocation3], 0  ;;  %s2977_s0 = inlined_call_operand.hbm [shape: f32[256,256], index: 0, kind: input, shape index: {}]   ;;  %s2978_s1 = inlined_call_operand.hbm [shape: bf16[256,256], index: 1, kind: input, shape index: {}]   ;;  %s2979_s2 = inlined_call_operand.vmem [shape: f32[1,256], index: 2, kind: input, shape index: {}]   ;;  %s2980_s3 = inlined_call_operand.hbm [shape: bf16[256,256], index: 3, kind: input, shape index: {}]   ;;  %s2981_s4 = inlined_call_operand.vmem [shape: f32[1,256], index: 4, kind: input, shape index: {}]   ;;  %s2982_s5 = inlined_call_operand.hbm [shape: bf16[256,256], index: 5, kind: input, shape index: {}]   ;;  %s2983_s6 = inlined_call_operand.vmem [shape: f32[1,256], index: 6, kind: input, shape index: {}]   ;;  %s2984_s7 = inlined_call_operand.vmem [shape: f32[256,256], index: 7, kind: output, shape index: {0}]   ;;  %s2985_s8 = inlined_call_operand.vmem [shape: f32[256,256], index: 8, kind: output, shape index: {1}]   ;;  %s2986_s9 = inlined_call_operand.vmem [shape: f32[256,256], index: 9, kind: output, shape index: {2}]  }
   0x1   :  { %16 = vsyncpa [#allocation5], 0 }
   0x2   :  { %17 = vsyncpa [#allocation8], 0  ;;  %s1944_s30 = smov [#allocation4]  }
   0x3   :  { %s35_s10 = sshll.u32 %s1944_s30, 4  ;;  %s36_s10 = int_to_ptr.vmem [resolvable:$true] %s35_s10 }
   0x4   :  { %s1866_s11 = scalar_lea.vmem %s36_s10, 4096  ;;  %p1871_p1 = scmp.lt.s32.totalorder %s36_s10, %s36_s10 }
   0x5   :  { %p1867_p0 = scmp.ne.s32.totalorder %s36_s10, %s1866_s11  ;;  %p1872_p2 = scmp.lt.s32.totalorder %s1866_s11, %s1866_s11 }
   0x7   :  { %p1873_p3 = por %p1872_p2, %p1871_p1 }
   0x9   :  { %p1874_p4 = pnand %p1873_p3, %p1867_p0 }
   0xb   :  { %1877 = shalt.err (!%p1874_p4)
}
   0xc   :  { %s1945_s12 = smov 128   ;;  %s1946_s13 = smov 8  }
   0xd   :  { %41 = dma.hbm_to_vmem [thread:$0]  %s2978_s1, 4096, %s36_s10, [#allocation5], %s1945_s12, %s1945_s12, %s1946_s13  }
   0xe   :  { %s1947_s16 = smov [#allocation2]  }
   0xf   :  { %s23_s17 = sshll.u32 %s1947_s16, 4  ;;  %s24_s17 = int_to_ptr.vmem [resolvable:$true] %s23_s17 }
  0x10   :  { %s1886_s18 = scalar_lea.vmem %s24_s17, 8192  ;;  %p1891_p6 = scmp.lt.s32.totalorder %s24_s17, %s24_s17 }
  0x11   :  { %p1887_p5 = scmp.ne.s32.totalorder %s24_s17, %s1886_s18  ;;  %p1892_p7 = scmp.lt.s32.totalorder %s1886_s18, %s1886_s18 }
  0x13   :  { %p1893_p8 = por %p1892_p7, %p1891_p6 }
  0x15   :  { %p1894_p9 = pnand %p1893_p8, %p1887_p5 }
  0x17   :  { %1897 = shalt.err (!%p1894_p9)
}
  0x18   :  { %s1948_s19 = smov 256   ;;  %s1949_s20 = smov 16  }
  0x19   :  { %29 = dma.hbm_to_vmem [thread:$0]  %s2977_s0, 8192, %s24_s17, [#allocation3], %s1948_s19, %s1948_s19, %s1949_s20  }
  0x1a   :  { %s1950_s23 = smov [#allocation6]   ;;  %s1951_s25 = smov [#allocation7]  }
  0x1b   :  { %s49_s24 = sshll.u32 %s1950_s23, 4  ;;  %s63_s1 = sshll.u32 %s1951_s25, 4  ;;  %s50_s24 = int_to_ptr.vmem [resolvable:$true] %s49_s24  ;;  %s64_s1 = int_to_ptr.vmem [resolvable:$true] %s63_s1 }
  0x1c   :  { %s1906_s26 = scalar_lea.vmem %s50_s24, 4096  ;;  %p1911_p11 = scmp.lt.s32.totalorder %s50_s24, %s50_s24 }
  0x1d   :  { %p1907_p10 = scmp.ne.s32.totalorder %s50_s24, %s1906_s26  ;;  %p1912_p12 = scmp.lt.s32.totalorder %s1906_s26, %s1906_s26 }
  0x1f   :  { %p1913_p13 = por %p1912_p12, %p1911_p11 }
  0x21   :  { %p1914_p0 = pnand %p1913_p13, %p1907_p10 }
  0x23   :  { %1917 = shalt.err (!%p1914_p0)
}
  0x24   :  { %55 = dma.hbm_to_vmem [thread:$0]  %s2980_s3, 4096, %s50_s24, [#allocation5], %s1945_s12, %s1945_s12, %s1946_s13  }
  0x25   :  { %s1926_s0 = scalar_lea.vmem %s64_s1, 4096  ;;  %p1931_p2 = scmp.lt.s32.totalorder %s64_s1, %s64_s1 }
  0x26   :  { %p1927_p1 = scmp.ne.s32.totalorder %s64_s1, %s1926_s0  ;;  %p1932_p3 = scmp.lt.s32.totalorder %s1926_s0, %s1926_s0 }
  0x28   :  { %p1933_p4 = por %p1932_p3, %p1931_p2 }
  0x2a   :  { %p1934_p5 = pnand %p1933_p4, %p1927_p1 }
  0x2c   :  { %1937 = shalt.err (!%p1934_p5)
}
  0x2d   :  { %69 = dma.hbm_to_vmem [thread:$0]  %s2982_s5, 4096, %s64_s1, [#allocation8], %s1945_s12, %s1945_s12, %s1946_s13  }
  0x2e   :  { %1938 = dma.done.wait [#allocation3], 8192  }
  0x2f   :  { %1939 = vsyncadd [#allocation3], 4294959104 }
  0x30   :  { %1940 = dma.done.wait [#allocation5], 8192  }
  0x31   :  { %1941 = vsyncadd [#allocation5], 4294959104 }
  0x32   :  { %1942 = dma.done.wait [#allocation8], 4096  }
  0x33   :  { %1943 = vsyncadd [#allocation8], 4294963200  ;;  %v1714_v0 = vld [vmem:[#allocation4 + $0x74] ss:$8 sps:$4 sm:$0xff]   ;;  %v1716_v1 = vld [vmem:[#allocation4 + $0x70] ss:$8 sps:$4 sm:$0xff]  }
  0x34   :  { %384 = vmatprep.subr.bf16.mxu0 %v1714_v0  ;;  %1674 = vmatprep.subr.bf16.mxu1 %v1714_v0  ;;  %v1717_v2 = vld [vmem:[#allocation4 + $0x64] ss:$8 sps:$4 sm:$0xff]   ;;  %v1719_v3 = vld [vmem:[#allocation4 + $0x60] ss:$8 sps:$4 sm:$0xff]   ;;  %v1720_v4 = vld [vmem:[#allocation4 + $0x54] ss:$8 sps:$4 sm:$0xff]  }
  0x35   :  { %385 = vmatpush1.bf16.msra.mxu0 %v1716_v1  ;;  %1690 = vmatpush1.bf16.msra.mxu1 %v1716_v1  ;;  %v1722_v5 = vld [vmem:[#allocation4 + $0x50] ss:$8 sps:$4 sm:$0xff]   ;;  %v1723_v6 = vld [vmem:[#allocation4 + $0x44] ss:$8 sps:$4 sm:$0xff]   ;;  %v1725_v7 = vld [vmem:[#allocation4 + $0x40] ss:$8 sps:$4 sm:$0xff]  }
  0x36   :  { %386 = vmatprep.subr.bf16.mxu0 %v1717_v2  ;;  %1675 = vmatprep.subr.bf16.mxu1 %v1717_v2  ;;  %v1726_v8 = vld [vmem:[#allocation4 + $0x34] ss:$8 sps:$4 sm:$0xff]   ;;  %v1728_v9 = vld [vmem:[#allocation4 + $0x30] ss:$8 sps:$4 sm:$0xff]   ;;  %v1729_v10 = vld [vmem:[#allocation4 + $0x24] ss:$8 sps:$4 sm:$0xff]  }
  0x37   :  { %v1731_v11 = vld [vmem:[#allocation4 + $0x20] ss:$8 sps:$4 sm:$0xff]   ;;  %v1732_v12 = vld [vmem:[#allocation4 + $0x14] ss:$8 sps:$4 sm:$0xff]   ;;  %v1734_v18 = vld [vmem:[#allocation4 + $0x10] ss:$8 sps:$4 sm:$0xff]  }
  0x38   :  { %v85_v13 = vld [vmem:[#allocation2 + $0x8] sm:$0xff]  ;;  %v87_v14 = vld [vmem:[#allocation2 + $0x18] sm:$0xff]  ;;  %v84_v38 = vld [vmem:[#allocation2] sm:$0xff] }
  0x39   :  { %387 = vmatpush1.bf16.msra.mxu0 %v1719_v3  ;;  %1691 = vmatpush1.bf16.msra.mxu1 %v1719_v3  ;;  %v2023_v15 = vpack.c.bf16 %v87_v14, %v85_v13  ;;  %v117_v16 = vld [vmem:[#allocation2 + $0x108] sm:$0xff]  ;;  %v119_v17 = vld [vmem:[#allocation2 + $0x118] sm:$0xff]  ;;  %v86_v39 = vld [vmem:[#allocation2 + $0x10] sm:$0xff] }
  0x3a   :  { %388 = vmatprep.subr.bf16.mxu0 %v1720_v4  ;;  %1676 = vmatprep.subr.bf16.mxu1 %v1720_v4  ;;  %v2025_v19 = vpack.c.bf16 %v119_v17, %v117_v16  ;;  %v1735_v20 = vld [vmem:[#allocation4 + $0x4] ss:$8 sps:$4 sm:$0xff]   ;;  %v1737_v21 = vld [vmem:[#allocation4] ss:$8 sps:$4 sm:$0xff]   ;;  %v1738_v22 = vld [vmem:[#allocation4 + $0xf4] ss:$8 sps:$4 sm:$0xff]   ;;  %v2029_v45 = vpack.c.bf16 %v86_v39, %v84_v38 }
  0x3b   :  { %416 = vmatprep.mubr.bf16.mxu0 %v2023_v15  ;;  %v1740_v23 = vld [vmem:[#allocation4 + $0xf0] ss:$8 sps:$4 sm:$0xff]   ;;  %v1741_v24 = vld [vmem:[#allocation4 + $0xe4] ss:$8 sps:$4 sm:$0xff]   ;;  %v1743_v25 = vld [vmem:[#allocation4 + $0xe0] ss:$8 sps:$4 sm:$0xff]  }
  0x3c   :  { %496 = vmatprep.mubr.bf16.mxu1 %v2025_v19  ;;  %v1744_v26 = vld [vmem:[#allocation4 + $0xd4] ss:$8 sps:$4 sm:$0xff]   ;;  %v1746_v27 = vld [vmem:[#allocation4 + $0xd0] ss:$8 sps:$4 sm:$0xff]   ;;  %v1747_v28 = vld [vmem:[#allocation4 + $0xc4] ss:$8 sps:$4 sm:$0xff]  }
  0x3d   :  { %389 = vmatpush1.bf16.msra.mxu0 %v1722_v5  ;;  %1692 = vmatpush1.bf16.msra.mxu1 %v1722_v5  ;;  %v1749_v29 = vld [vmem:[#allocation4 + $0xc0] ss:$8 sps:$4 sm:$0xff]   ;;  %v1750_v30 = vld [vmem:[#allocation4 + $0xb4] ss:$8 sps:$4 sm:$0xff]   ;;  %v1752_v31 = vld [vmem:[#allocation4 + $0xb0] ss:$8 sps:$4 sm:$0xff]  }
  0x3e   :  { %390 = vmatprep.subr.bf16.mxu0 %v1723_v6  ;;  %1677 = vmatprep.subr.bf16.mxu1 %v1723_v6  ;;  %v1753_v32 = vld [vmem:[#allocation4 + $0xa4] ss:$8 sps:$4 sm:$0xff]   ;;  %v1755_v33 = vld [vmem:[#allocation4 + $0xa0] ss:$8 sps:$4 sm:$0xff]   ;;  %v1756_v34 = vld [vmem:[#allocation4 + $0x94] ss:$8 sps:$4 sm:$0xff]  }
  0x3f   :  { %v1758_v35 = vld [vmem:[#allocation4 + $0x90] ss:$8 sps:$4 sm:$0xff]   ;;  %v1759_v36 = vld [vmem:[#allocation4 + $0x84] ss:$8 sps:$4 sm:$0xff]   ;;  %v1761_v37 = vld [vmem:[#allocation4 + $0x80] ss:$8 sps:$4 sm:$0xff]  }
  0x40   :  { %v116_v40 = vld [vmem:[#allocation2 + $0x100] sm:$0xff]  ;;  %v118_v41 = vld [vmem:[#allocation2 + $0x110] sm:$0xff]  ;;  %v89_v44 = vld [vmem:[#allocation2 + $0x28] sm:$0xff] }
  0x41   :  { %391 = vmatpush1.bf16.msra.mxu0 %v1725_v7  ;;  %1693 = vmatpush1.bf16.msra.mxu1 %v1725_v7  ;;  %v1764_v42 = vld [vmem:[#allocation6 + $0x74] ss:$8 sps:$4 sm:$0xff]   ;;  %v2031_v46 = vpack.c.bf16 %v118_v41, %v116_v40  ;;  %v121_v48 = vld [vmem:[#allocation2 + $0x128] sm:$0xff]  ;;  %v1762_v50 = vld [vmem:[#allocation6 + $0x70] ss:$8 sps:$4 sm:$0xff]  }
  0x42   :  { %392 = vmatprep.subr.bf16.mxu0 %v1726_v8  ;;  %1678 = vmatprep.subr.bf16.mxu1 %v1726_v8  ;;  %v1767_v43 = vld [vmem:[#allocation7 + $0x74] ss:$8 sps:$4 sm:$0xff]   ;;  %v1765_v51 = vld [vmem:[#allocation7 + $0x70] ss:$8 sps:$4 sm:$0xff]   ;;  %v1770_v52 = vld [vmem:[#allocation6 + $0x64] ss:$8 sps:$4 sm:$0xff]  }
  0x43   :  { %v91_v47 = vld [vmem:[#allocation2 + $0x38] sm:$0xff]  ;;  %v1773_v53 = vld [vmem:[#allocation7 + $0x64] ss:$8 sps:$4 sm:$0xff]   ;;  %v1768_v54 = vld [vmem:[#allocation6 + $0x60] ss:$8 sps:$4 sm:$0xff]  }
  0x44   :  { %v123_v49 = vld [vmem:[#allocation2 + $0x138] sm:$0xff]  ;;  %v1771_v55 = vld [vmem:[#allocation7 + $0x60] ss:$8 sps:$4 sm:$0xff]   ;;  %v2033_v56 = vpack.c.bf16 %v91_v47, %v89_v44  ;;  %v90_v59 = vld [vmem:[#allocation2 + $0x30] sm:$0xff] }
  0x45   :  { %393 = vmatpush1.bf16.msra.mxu0 %v1728_v9  ;;  %1694 = vmatpush1.bf16.msra.mxu1 %v1728_v9  ;;  %v2035_v57 = vpack.c.bf16 %v123_v49, %v121_v48  ;;  %v88_v58 = vld [vmem:[#allocation2 + $0x20] sm:$0xff]  ;;  %v122_v61 = vld [vmem:[#allocation2 + $0x130] sm:$0xff]  ;;  %v93_v0 = vld [vmem:[#allocation2 + $0x48] sm:$0xff] }
  0x46   :  { %394 = vmatprep.subr.bf16.mxu0 %v1729_v10  ;;  %1679 = vmatprep.subr.bf16.mxu1 %v1729_v10  ;;  %v120_v60 = vld [vmem:[#allocation2 + $0x120] sm:$0xff]  ;;  %v1776_v62 = vld [vmem:[#allocation6 + $0x54] ss:$8 sps:$4 sm:$0xff]   ;;  %v2041_v1 = vpack.c.bf16 %v90_v59, %v88_v58  ;;  %v125_v4 = vld [vmem:[#allocation2 + $0x148] sm:$0xff] }
  0x47   :  { %v1779_v63 = vld [vmem:[#allocation7 + $0x54] ss:$8 sps:$4 sm:$0xff]   ;;  %v2043_v2 = vpack.c.bf16 %v122_v61, %v120_v60  ;;  %v1774_v6 = vld [vmem:[#allocation6 + $0x50] ss:$8 sps:$4 sm:$0xff]   ;;  %v1782_v8 = vld [vmem:[#allocation6 + $0x44] ss:$8 sps:$4 sm:$0xff]  }
  0x48   :  { %v95_v3 = vld [vmem:[#allocation2 + $0x58] sm:$0xff]  ;;  %v1785_v9 = vld [vmem:[#allocation7 + $0x44] ss:$8 sps:$4 sm:$0xff]   ;;  %v1780_v10 = vld [vmem:[#allocation6 + $0x40] ss:$8 sps:$4 sm:$0xff]  }
  0x49   :  { %395 = vmatpush1.bf16.msra.mxu0 %v1731_v11  ;;  %1695 = vmatpush1.bf16.msra.mxu1 %v1731_v11  ;;  %v127_v5 = vld [vmem:[#allocation2 + $0x158] sm:$0xff]  ;;  %v1783_v11 = vld [vmem:[#allocation7 + $0x40] ss:$8 sps:$4 sm:$0xff]   ;;  %v94_v16 = vld [vmem:[#allocation2 + $0x50] sm:$0xff] }
  0x4a   :  { %396 = vmatprep.subr.bf16.mxu0 %v1732_v12  ;;  %1680 = vmatprep.subr.bf16.mxu1 %v1732_v12  ;;  %v1777_v7 = vld [vmem:[#allocation7 + $0x50] ss:$8 sps:$4 sm:$0xff]   ;;  %v2045_v12 = vpack.c.bf16 %v95_v3, %v93_v0  ;;  %v2047_v13 = vpack.c.bf16 %v127_v5, %v125_v4  ;;  %v92_v14 = vld [vmem:[#allocation2 + $0x40] sm:$0xff]  ;;  %v1800_v40 = vld [vmem:[#allocation6 + $0x14] ss:$8 sps:$4 sm:$0xff]  }
  0x4b   :  { %v124_v17 = vld [vmem:[#allocation2 + $0x140] sm:$0xff]  ;;  %v130_v39 = vld [vmem:[#allocation2 + $0x170] sm:$0xff]  ;;  %v103_v47 = vld [vmem:[#allocation2 + $0x98] sm:$0xff] }
  0x4c   :  { %v128_v38 = vld [vmem:[#allocation2 + $0x160] sm:$0xff]  ;;  %v1803_v41 = vld [vmem:[#allocation7 + $0x14] ss:$8 sps:$4 sm:$0xff]   ;;  %v133_v48 = vld [vmem:[#allocation2 + $0x188] sm:$0xff] }
  0x4d   :  { %397 = vmatpush1.bf16.msra.mxu0 %v1734_v18  ;;  %1696 = vmatpush1.bf16.msra.mxu1 %v1734_v18  ;;  %v126_v18 = vld [vmem:[#allocation2 + $0x150] sm:$0xff]  ;;  %v2067_v44 = vpack.c.bf16 %v130_v39, %v128_v38  ;;  %v135_v49 = vld [vmem:[#allocation2 + $0x198] sm:$0xff]  ;;  %v1804_v58 = vld [vmem:[#allocation6] ss:$8 sps:$4 sm:$0xff]  }
  0x4e   :  { %398 = vmatprep.subr.bf16.mxu0 %v1735_v20  ;;  %1681 = vmatprep.subr.bf16.mxu1 %v1735_v20  ;;  %v1788_v20 = vld [vmem:[#allocation6 + $0x34] ss:$8 sps:$4 sm:$0xff]   ;;  %v1807_v59 = vld [vmem:[#allocation7] ss:$8 sps:$4 sm:$0xff]   ;;  %v1822_v38 = vld [vmem:[#allocation6 + $0xd0] ss:$8 sps:$4 sm:$0xff]  }
  0x4f   :  { %v100_v60 = vld [vmem:[#allocation2 + $0x80] sm:$0xff]  ;;  %v102_v61 = vld [vmem:[#allocation2 + $0x90] sm:$0xff]  ;;  %v105_v4 = vld [vmem:[#allocation2 + $0xa8] sm:$0xff] }
  0x50   :  { %v1812_v0 = vld [vmem:[#allocation6 + $0xf4] ss:$8 sps:$4 sm:$0xff]   ;;  %v2077_v5 = vpack.c.bf16 %v102_v61, %v100_v60  ;;  %v1825_v39 = vld [vmem:[#allocation7 + $0xd0] ss:$8 sps:$4 sm:$0xff]   ;;  %v113_v60 = vld [vmem:[#allocation2 + $0xe8] sm:$0xff] }
  0x51   :  { %399 = vmatpush1.bf16.msra.mxu0 %v1737_v21  ;;  %1697 = vmatpush1.bf16.msra.mxu1 %v1737_v21  ;;  %v1791_v21 = vld [vmem:[#allocation7 + $0x34] ss:$8 sps:$4 sm:$0xff]  }
  0x52   :  { %400 = vmatprep.subr.bf16.mxu0 %v1738_v22  ;;  %1682 = vmatprep.subr.bf16.mxu1 %v1738_v22  ;;  %v97_v22 = vld [vmem:[#allocation2 + $0x68] sm:$0xff]  ;;  %v1815_v3 = vld [vmem:[#allocation7 + $0xf4] ss:$8 sps:$4 sm:$0xff]  }
  0x55   :  { %401 = vmatpush2.bf16.msra.mxu0 %v1740_v23  ;;  %1698 = vmatpush2.bf16.msra.mxu1 %v1740_v23  ;;  %v2053_v23 = vpack.c.bf16 %v94_v16, %v92_v14  ;;  %v1818_v14 = vld [vmem:[#allocation6 + $0xe4] ss:$8 sps:$4 sm:$0xff]  }
  0x56   :  { %402 = vmatprep.subr.bf16.mxu0 %v1741_v24  ;;  %1683 = vmatprep.subr.bf16.mxu1 %v1741_v24  ;;  %v2055_v24 = vpack.c.bf16 %v126_v18, %v124_v17  ;;  %v1821_v16 = vld [vmem:[#allocation7 + $0xe4] ss:$8 sps:$4 sm:$0xff]  }
  0x59   :  { %403 = vmatpush2.bf16.msra.mxu0 %v1743_v25  ;;  %1699 = vmatpush2.bf16.msra.mxu1 %v1743_v25  ;;  %v99_v25 = vld [vmem:[#allocation2 + $0x78] sm:$0xff] }
  0x5a   :  { %404 = vmatprep.subr.bf16.mxu0 %v1744_v26  ;;  %1684 = vmatprep.subr.bf16.mxu1 %v1744_v26  ;;  %v129_v26 = vld [vmem:[#allocation2 + $0x168] sm:$0xff] }
  0x5d   :  { %405 = vmatpush2.bf16.msra.mxu0 %v1746_v27  ;;  %1700 = vmatpush2.bf16.msra.mxu1 %v1746_v27  ;;  %v131_v27 = vld [vmem:[#allocation2 + $0x178] sm:$0xff] }
  0x5e   :  { %406 = vmatprep.subr.bf16.mxu0 %v1747_v28  ;;  %1685 = vmatprep.subr.bf16.mxu1 %v1747_v28  ;;  %v1786_v28 = vld [vmem:[#allocation6 + $0x30] ss:$8 sps:$4 sm:$0xff]  }
  0x61   :  { %407 = vmatpush2.bf16.msra.mxu0 %v1749_v29  ;;  %1701 = vmatpush2.bf16.msra.mxu1 %v1749_v29  ;;  %v1789_v29 = vld [vmem:[#allocation7 + $0x30] ss:$8 sps:$4 sm:$0xff]  }
  0x62   :  { %408 = vmatprep.subr.bf16.mxu0 %v1750_v30  ;;  %1686 = vmatprep.subr.bf16.mxu1 %v1750_v30  ;;  %v1794_v30 = vld [vmem:[#allocation6 + $0x24] ss:$8 sps:$4 sm:$0xff]  }
  0x65   :  { %409 = vmatpush2.bf16.msra.mxu0 %v1752_v31  ;;  %1702 = vmatpush2.bf16.msra.mxu1 %v1752_v31  ;;  %v1797_v31 = vld [vmem:[#allocation7 + $0x24] ss:$8 sps:$4 sm:$0xff]  }
  0x66   :  { %410 = vmatprep.subr.bf16.mxu0 %v1753_v32  ;;  %1687 = vmatprep.subr.bf16.mxu1 %v1753_v32  ;;  %v1792_v32 = vld [vmem:[#allocation6 + $0x20] ss:$8 sps:$4 sm:$0xff]  }
  0x69   :  { %411 = vmatpush2.bf16.msra.mxu0 %v1755_v33  ;;  %1703 = vmatpush2.bf16.msra.mxu1 %v1755_v33  ;;  %v1795_v33 = vld [vmem:[#allocation7 + $0x20] ss:$8 sps:$4 sm:$0xff]  }
  0x6a   :  { %412 = vmatprep.subr.bf16.mxu0 %v1756_v34  ;;  %1688 = vmatprep.subr.bf16.mxu1 %v1756_v34  ;;  %v2057_v34 = vpack.c.bf16 %v99_v25, %v97_v22  ;;  %v104_v22 = vld [vmem:[#allocation2 + $0xa0] sm:$0xff]  ;;  %v106_v25 = vld [vmem:[#allocation2 + $0xb0] sm:$0xff] }
  0x6d   :  { %413 = vmatpush2.bf16.msra.mxu0 %v1758_v35  ;;  %1704 = vmatpush2.bf16.msra.mxu1 %v1758_v35  ;;  %v2059_v35 = vpack.c.bf16 %v131_v27, %v129_v26  ;;  %v136_v26 = vld [vmem:[#allocation2 + $0x1a0] sm:$0xff]  ;;  %v138_v27 = vld [vmem:[#allocation2 + $0x1b0] sm:$0xff] }
  0x6e   :  { %414 = vmatprep.subr.bf16.mxu0 %v1759_v36  ;;  %1689 = vmatprep.subr.bf16.mxu1 %v1759_v36  ;;  %v96_v36 = vld [vmem:[#allocation2 + $0x60] sm:$0xff] }
  0x71   :  { %415 = vmatpush2.bf16.msra.mxu0 %v1761_v37  ;;  %1705 = vmatpush2.bf16.msra.mxu1 %v1761_v37  ;;  %v98_v37 = vld [vmem:[#allocation2 + $0x70] sm:$0xff] }
  0x72   :  { %845 = vmatprep.subr.bf16.mxu1 %v1764_v42  ;;  %1306 = vmatprep.subr.bf16.mxu0 %v1767_v43  ;;  %v101_v42 = vld [vmem:[#allocation2 + $0x88] sm:$0xff]  ;;  %v2065_v43 = vpack.c.bf16 %v98_v37, %v96_v36  ;;  %v143_v37 = vld [vmem:[#allocation2 + $0x1d8] sm:$0xff] }
  0x73   :  { %v141_v36 = vld [vmem:[#allocation2 + $0x1c8] sm:$0xff] }
  0x74   :  { %417 = vmatmul.mubr.bf16.vlgmr.msra.gmra.mxu0 %v2029_v45  ;;  %497 = vmatmul.mubr.bf16.vlgmr.msra.gmra.mxu1 %v2031_v46 }
  0x75   :  { %846 = vmatpush1.bf16.msra.mxu1 %v1762_v50  ;;  %1307 = vmatpush1.bf16.msra.mxu0 %v1765_v51  ;;  %v1798_v50 = vld [vmem:[#allocation6 + $0x10] ss:$8 sps:$4 sm:$0xff]  }
  0x76   :  { %847 = vmatprep.subr.bf16.mxu1 %v1770_v52  ;;  %1308 = vmatprep.subr.bf16.mxu0 %v1773_v53  ;;  %v1801_v51 = vld [vmem:[#allocation7 + $0x10] ss:$8 sps:$4 sm:$0xff]   ;;  %v1806_v52 = vld [vmem:[#allocation6 + $0x4] ss:$8 sps:$4 sm:$0xff]  }
  0x77   :  { %426 = vmatprep.mubr.bf16.mxu0 %v2033_v56  ;;  %506 = vmatprep.mubr.bf16.mxu1 %v2035_v57  ;;  %v1809_v53 = vld [vmem:[#allocation7 + $0x4] ss:$8 sps:$4 sm:$0xff]  }
  0x79   :  { %848 = vmatpush1.bf16.msra.mxu1 %v1768_v54  ;;  %1309 = vmatpush1.bf16.msra.mxu0 %v1771_v55  ;;  %v2069_v54 = vpack.c.bf16 %v103_v47, %v101_v42  ;;  %v2071_v55 = vpack.c.bf16 %v135_v49, %v133_v48  ;;  %v2095_v47 = vpack.c.bf16 %v143_v37, %v141_v36  ;;  %v1828_v48 = vld [vmem:[#allocation6 + $0xc0] ss:$8 sps:$4 sm:$0xff]   ;;  %v1854_v36 = vld [vmem:[#allocation6 + $0x84] ss:$8 sps:$4 sm:$0xff]  }
  0x7a   :  { %849 = vmatprep.subr.bf16.mxu1 %v1776_v62  ;;  %1310 = vmatprep.subr.bf16.mxu0 %v1779_v63  ;;  %v132_v62 = vld [vmem:[#allocation2 + $0x180] sm:$0xff]  ;;  %v134_v63 = vld [vmem:[#allocation2 + $0x190] sm:$0xff] }
  0x7b   :  { %v1831_v49 = vld [vmem:[#allocation7 + $0xc0] ss:$8 sps:$4 sm:$0xff]   ;;  %v1857_v37 = vld [vmem:[#allocation7 + $0x84] ss:$8 sps:$4 sm:$0xff]  }
  0x7c   :  { %427 = vmatmul.mubr.bf16.gmra.mxu0 %v2041_v1  ;;  %507 = vmatmul.mubr.bf16.gmra.mxu1 %v2043_v2 }
  0x7d   :  { %850 = vmatpush1.bf16.msra.mxu1 %v1774_v6  ;;  %1311 = vmatpush1.bf16.msra.mxu0 %v1777_v7  ;;  %v2079_v6 = vpack.c.bf16 %v134_v63, %v132_v62  ;;  %v107_v7 = vld [vmem:[#allocation2 + $0xb8] sm:$0xff] }
  0x7e   :  { %851 = vmatprep.subr.bf16.mxu1 %v1782_v8  ;;  %1312 = vmatprep.subr.bf16.mxu0 %v1785_v9  ;;  %v137_v8 = vld [vmem:[#allocation2 + $0x1a8] sm:$0xff]  ;;  %v139_v9 = vld [vmem:[#allocation2 + $0x1b8] sm:$0xff]  ;;  %v2081_v17 = vpack.c.bf16 %v107_v7, %v105_v4 }
  0x7f   :  { %436 = vmatprep.mubr.bf16.mxu0 %v2045_v12  ;;  %516 = vmatprep.mubr.bf16.mxu1 %v2047_v13  ;;  %v2083_v18 = vpack.c.bf16 %v139_v9, %v137_v8  ;;  %v115_v63 = vld [vmem:[#allocation2 + $0xf8] sm:$0xff]  ;;  %v1842_v8 = vld [vmem:[#allocation6 + $0xa4] ss:$8 sps:$4 sm:$0xff]  }
  0x80   :  { %v1834_v4 = vld [vmem:[#allocation6 + $0xb0] ss:$8 sps:$4 sm:$0xff]   ;;  %v1845_v9 = vld [vmem:[#allocation7 + $0xa4] ss:$8 sps:$4 sm:$0xff]  }
  0x81   :  { %852 = vmatpush1.bf16.msra.mxu1 %v1780_v10  ;;  %1313 = vmatpush1.bf16.msra.mxu0 %v1783_v11  ;;  %v1810_v10 = vld [vmem:[#allocation6 + $0xf0] ss:$8 sps:$4 sm:$0xff]  }
  0x82   :  { %853 = vmatprep.subr.bf16.mxu1 %v1788_v20  ;;  %1314 = vmatprep.subr.bf16.mxu0 %v1791_v21  ;;  %v1813_v11 = vld [vmem:[#allocation7 + $0xf0] ss:$8 sps:$4 sm:$0xff]   ;;  %v1816_v20 = vld [vmem:[#allocation6 + $0xe0] ss:$8 sps:$4 sm:$0xff]  }
  0x83   :  { %v1819_v21 = vld [vmem:[#allocation7 + $0xe0] ss:$8 sps:$4 sm:$0xff]   ;;  %v1837_v7 = vld [vmem:[#allocation7 + $0xb0] ss:$8 sps:$4 sm:$0xff]  }
  0x84   :  { %437 = vmatmul.mubr.bf16.gmra.mxu0 %v2053_v23  ;;  %517 = vmatmul.mubr.bf16.gmra.mxu1 %v2055_v24 }
  0x85   :  { %854 = vmatpush1.bf16.msra.mxu1 %v1786_v28  ;;  %1315 = vmatpush1.bf16.msra.mxu0 %v1789_v29  ;;  %v1824_v28 = vld [vmem:[#allocation6 + $0xd4] ss:$8 sps:$4 sm:$0xff]  }
  0x86   :  { %855 = vmatprep.subr.bf16.mxu1 %v1794_v30  ;;  %1316 = vmatprep.subr.bf16.mxu0 %v1797_v31  ;;  %v1827_v29 = vld [vmem:[#allocation7 + $0xd4] ss:$8 sps:$4 sm:$0xff]   ;;  %v109_v30 = vld [vmem:[#allocation2 + $0xc8] sm:$0xff]  ;;  %v2089_v31 = vpack.c.bf16 %v106_v25, %v104_v22  ;;  %v144_v22 = vld [vmem:[#allocation2 + $0x1e0] sm:$0xff] }
  0x87   :  { %446 = vmatprep.mubr.bf16.mxu0 %v2057_v34  ;;  %526 = vmatprep.mubr.bf16.mxu1 %v2059_v35  ;;  %v146_v25 = vld [vmem:[#allocation2 + $0x1f0] sm:$0xff] }
  0x89   :  { %856 = vmatpush1.bf16.msra.mxu1 %v1792_v32  ;;  %1317 = vmatpush1.bf16.msra.mxu0 %v1795_v33  ;;  %v2091_v32 = vpack.c.bf16 %v138_v27, %v136_v26  ;;  %v111_v33 = vld [vmem:[#allocation2 + $0xd8] sm:$0xff] }
  0x8a   :  { %857 = vmatprep.subr.bf16.mxu1 %v1800_v40  ;;  %1318 = vmatprep.subr.bf16.mxu0 %v1803_v41  ;;  %v1830_v40 = vld [vmem:[#allocation6 + $0xc4] ss:$8 sps:$4 sm:$0xff]   ;;  %v2093_v42 = vpack.c.bf16 %v111_v33, %v109_v30  ;;  %v1848_v26 = vld [vmem:[#allocation6 + $0x94] ss:$8 sps:$4 sm:$0xff]   ;;  %v1846_v30 = vld [vmem:[#allocation6 + $0x90] ss:$8 sps:$4 sm:$0xff]  }
  0x8b   :  { %v1833_v41 = vld [vmem:[#allocation7 + $0xc4] ss:$8 sps:$4 sm:$0xff]   ;;  %v1851_v27 = vld [vmem:[#allocation7 + $0x94] ss:$8 sps:$4 sm:$0xff]   ;;  %v1849_v33 = vld [vmem:[#allocation7 + $0x90] ss:$8 sps:$4 sm:$0xff]  }
  0x8c   :  { %447 = vmatmul.mubr.bf16.gmra.mxu0 %v2065_v43  ;;  %527 = vmatmul.mubr.bf16.gmra.mxu1 %v2067_v44 }
  0x8d   :  { %858 = vmatpush1.bf16.msra.mxu1 %v1798_v50  ;;  %1319 = vmatpush1.bf16.msra.mxu0 %v1801_v51  ;;  %v108_v50 = vld [vmem:[#allocation2 + $0xc0] sm:$0xff]  ;;  %v110_v51 = vld [vmem:[#allocation2 + $0xd0] sm:$0xff] }
  0x8e   :  { %859 = vmatprep.subr.bf16.mxu1 %v1806_v52  ;;  %1320 = vmatprep.subr.bf16.mxu0 %v1809_v53  ;;  %v140_v52 = vld [vmem:[#allocation2 + $0x1c0] sm:$0xff]  ;;  %v142_v53 = vld [vmem:[#allocation2 + $0x1d0] sm:$0xff]  ;;  %v2101_v61 = vpack.c.bf16 %v110_v51, %v108_v50 }
  0x8f   :  { %456 = vmatprep.mubr.bf16.mxu0 %v2069_v54  ;;  %536 = vmatprep.mubr.bf16.mxu1 %v2071_v55  ;;  %v2103_v62 = vpack.c.bf16 %v142_v53, %v140_v52 }
  0x91   :  { %860 = vmatpush1.bf16.msra.mxu1 %v1804_v58  ;;  %1321 = vmatpush1.bf16.msra.mxu0 %v1807_v59  ;;  %v1836_v58 = vld [vmem:[#allocation6 + $0xb4] ss:$8 sps:$4 sm:$0xff]  }
  0x92   :  { %861 = vmatprep.subr.bf16.mxu1 %v1812_v0  ;;  %1322 = vmatprep.subr.bf16.mxu0 %v1815_v3  ;;  %v1839_v59 = vld [vmem:[#allocation7 + $0xb4] ss:$8 sps:$4 sm:$0xff]   ;;  %v145_v0 = vld [vmem:[#allocation2 + $0x1e8] sm:$0xff] }
  0x93   :  { %v147_v3 = vld [vmem:[#allocation2 + $0x1f8] sm:$0xff] }
  0x94   :  { %457 = vmatmul.mubr.bf16.gmra.mxu0 %v2077_v5  ;;  %537 = vmatmul.mubr.bf16.gmra.mxu1 %v2079_v6 }
  0x95   :  { %862 = vmatpush2.bf16.msra.mxu1 %v1810_v10  ;;  %1323 = vmatpush2.bf16.msra.mxu0 %v1813_v11  ;;  %v2105_v10 = vpack.c.bf16 %v115_v63, %v113_v60  ;;  %v2107_v11 = vpack.c.bf16 %v147_v3, %v145_v0 }
  0x96   :  { %863 = vmatprep.subr.bf16.mxu1 %v1818_v14  ;;  %1324 = vmatprep.subr.bf16.mxu0 %v1821_v16  ;;  %v1840_v14 = vld [vmem:[#allocation6 + $0xa0] ss:$8 sps:$4 sm:$0xff]  }
  0x97   :  { %466 = vmatprep.mubr.bf16.mxu0 %v2081_v17  ;;  %546 = vmatprep.mubr.bf16.mxu1 %v2083_v18  ;;  %v1843_v16 = vld [vmem:[#allocation7 + $0xa0] ss:$8 sps:$4 sm:$0xff]  }
  0x99   :  { %864 = vmatpush2.bf16.msra.mxu1 %v1816_v20  ;;  %1325 = vmatpush2.bf16.msra.mxu0 %v1819_v21  ;;  %v112_v20 = vld [vmem:[#allocation2 + $0xe0] sm:$0xff]  ;;  %v114_v21 = vld [vmem:[#allocation2 + $0xf0] sm:$0xff] }
  0x9a   :  { %865 = vmatprep.subr.bf16.mxu1 %v1824_v28  ;;  %1326 = vmatprep.subr.bf16.mxu0 %v1827_v29  ;;  %v162_v28 = vpack.c.bf16 %v114_v21, %v112_v20  ;;  %v2113_v29 = vpack.c.bf16 %v146_v25, %v144_v22 }
  0x9c   :  { %467 = vmatmul.mubr.bf16.gmra.mxu0 %v2089_v31  ;;  %547 = vmatmul.mubr.bf16.gmra.mxu1 %v2091_v32 }
  0x9d   :  { %866 = vmatpush2.bf16.msra.mxu1 %v1822_v38  ;;  %1327 = vmatpush2.bf16.msra.mxu0 %v1825_v39  ;;  %v1852_v38 = vld [vmem:[#allocation6 + $0x80] ss:$8 sps:$4 sm:$0xff]  }
  0x9e   :  { %867 = vmatprep.subr.bf16.mxu1 %v1830_v40  ;;  %1328 = vmatprep.subr.bf16.mxu0 %v1833_v41  ;;  %v1855_v39 = vld [vmem:[#allocation7 + $0x80] ss:$8 sps:$4 sm:$0xff]  }
  0x9f   :  { %476 = vmatprep.mubr.bf16.mxu0 %v2093_v42  ;;  %556 = vmatprep.mubr.bf16.mxu1 %v2095_v47 }
  0xa1   :  { %868 = vmatpush2.bf16.msra.mxu1 %v1828_v48  ;;  %1329 = vmatpush2.bf16.msra.mxu0 %v1831_v49 }
  0xa2   :  { %869 = vmatprep.subr.bf16.mxu1 %v1836_v58  ;;  %1330 = vmatprep.subr.bf16.mxu0 %v1839_v59 }
  0xa4   :  { %477 = vmatmul.mubr.bf16.gmra.mxu0 %v2101_v61  ;;  %557 = vmatmul.mubr.bf16.gmra.mxu1 %v2103_v62 }
  0xa5   :  { %870 = vmatpush2.bf16.msra.mxu1 %v1834_v4  ;;  %1331 = vmatpush2.bf16.msra.mxu0 %v1837_v7 }
  0xa6   :  { %871 = vmatprep.subr.bf16.mxu1 %v1842_v8  ;;  %1332 = vmatprep.subr.bf16.mxu0 %v1845_v9 }
  0xa7   :  { %486 = vmatprep.mubr.bf16.mxu0 %v2105_v10  ;;  %566 = vmatprep.mubr.bf16.mxu1 %v2107_v11 }
  0xa9   :  { %872 = vmatpush2.bf16.msra.mxu1 %v1840_v14  ;;  %1333 = vmatpush2.bf16.msra.mxu0 %v1843_v16 }
  0xaa   :  { %873 = vmatprep.subr.bf16.mxu1 %v1848_v26  ;;  %1334 = vmatprep.subr.bf16.mxu0 %v1851_v27 }
  0xac   :  { %487 = vmatmul.mubr.bf16.gmra.mxu0 %v162_v28  ;;  %567 = vmatmul.mubr.bf16.gmra.mxu1 %v2113_v29 }
  0xad   :  { %874 = vmatpush2.bf16.msra.mxu1 %v1846_v30  ;;  %1335 = vmatpush2.bf16.msra.mxu0 %v1849_v33 }
  0xae   :  { %875 = vmatprep.subr.bf16.mxu1 %v1854_v36  ;;  %1336 = vmatprep.subr.bf16.mxu0 %v1857_v37 }
  0xaf   :  { %877 = vmatprep.mubr.bf16.mxu1 %v2023_v15  ;;  %1338 = vmatprep.mubr.bf16.mxu0 %v2023_v15  ;;  %v214_v15 = vlaneseq }
  0xb1   :  { %876 = vmatpush2.bf16.msra.mxu1 %v1852_v38  ;;  %1337 = vmatpush2.bf16.msra.mxu0 %v1855_v39 }
  0xb4   :  { %878 = vmatmul.mubr.bf16.vlgmr.msra.gmra.mxu1 %v2029_v45  ;;  %1339 = vmatmul.mubr.bf16.vlgmr.msra.gmra.mxu0 %v2029_v45 }
  0xb5   :  { %887 = vmatprep.mubr.bf16.mxu1 %v2033_v56  ;;  %1348 = vmatprep.mubr.bf16.mxu0 %v2033_v56 }
  0xbc   :  { %888 = vmatmul.mubr.bf16.gmra.mxu1 %v2041_v1  ;;  %1349 = vmatmul.mubr.bf16.gmra.mxu0 %v2041_v1 }
  0xbd   :  { %897 = vmatprep.mubr.bf16.mxu1 %v2045_v12  ;;  %1358 = vmatprep.mubr.bf16.mxu0 %v2045_v12 }
  0xc4   :  { %898 = vmatmul.mubr.bf16.gmra.mxu1 %v2053_v23  ;;  %1359 = vmatmul.mubr.bf16.gmra.mxu0 %v2053_v23 }
  0xc5   :  { %907 = vmatprep.mubr.bf16.mxu1 %v2057_v34  ;;  %1368 = vmatprep.mubr.bf16.mxu0 %v2057_v34 }
  0xcc   :  { %908 = vmatmul.mubr.bf16.gmra.mxu1 %v2065_v43  ;;  %1369 = vmatmul.mubr.bf16.gmra.mxu0 %v2065_v43 }
  0xcd   :  { %917 = vmatprep.mubr.bf16.mxu1 %v2069_v54  ;;  %1378 = vmatprep.mubr.bf16.mxu0 %v2069_v54 }
  0xd4   :  { %918 = vmatmul.mubr.bf16.gmra.mxu1 %v2077_v5  ;;  %1379 = vmatmul.mubr.bf16.gmra.mxu0 %v2077_v5 }
  0xd5   :  { %927 = vmatprep.mubr.bf16.mxu1 %v2081_v17  ;;  %1388 = vmatprep.mubr.bf16.mxu0 %v2081_v17 }
  0xdc   :  { %928 = vmatmul.mubr.bf16.gmra.mxu1 %v2089_v31  ;;  %1389 = vmatmul.mubr.bf16.gmra.mxu0 %v2089_v31 }
  0xdd   :  { %937 = vmatprep.mubr.bf16.mxu1 %v2093_v42  ;;  %1398 = vmatprep.mubr.bf16.mxu0 %v2093_v42 }
  0xe4   :  { %938 = vmatmul.mubr.bf16.gmra.mxu1 %v2101_v61  ;;  %1399 = vmatmul.mubr.bf16.gmra.mxu0 %v2101_v61 }
  0xe5   :  { %947 = vmatprep.mubr.bf16.mxu1 %v2105_v10  ;;  %1408 = vmatprep.mubr.bf16.mxu0 %v2105_v10 }
  0xec   :  { %948 = vmatmul.mubr.bf16.gmra.mxu1 %v162_v28  ;;  %1409 = vmatmul.mubr.bf16.gmra.mxu0 %v162_v28 }
  0xed   :  { %957 = vmatprep.mubr.bf16.mxu1 %v2025_v19  ;;  %1418 = vmatprep.mubr.bf16.mxu0 %v2025_v19  ;;  %v215_v19 = vshrl.u32 %v214_v15, 7 }
  0xef   :  { %v2178_v45 = vsub.s32 0, %v215_v19  ;;  %v2183_v56 = vsub.s32 1, %v215_v19 }
  0xf4   :  { %958 = vmatmul.mubr.bf16.gmra.mxu1 %v2031_v46  ;;  %1419 = vmatmul.mubr.bf16.gmra.mxu0 %v2031_v46  ;;  %v212_v46 = vld [vmem:[%s2979_s2] sm:$0x3] }
  0xf5   :  { %967 = vmatprep.mubr.bf16.mxu1 %v2035_v57  ;;  %1428 = vmatprep.mubr.bf16.mxu0 %v2035_v57  ;;  %v2186_v57 = vrot.slane %v212_v46, %v2178_v45  ;;  %v2189_v1 = vrot.slane %v212_v46, %v2183_v56 }
  0xfc   :  { %968 = vmatmul.mubr.bf16.gmra.mxu1 %v2043_v2  ;;  %1429 = vmatmul.mubr.bf16.gmra.mxu0 %v2043_v2 }
  0xfd   :  { %977 = vmatprep.mubr.bf16.mxu1 %v2047_v13  ;;  %1438 = vmatprep.mubr.bf16.mxu0 %v2047_v13 }
 0x104   :  { %978 = vmatmul.mubr.bf16.gmra.mxu1 %v2055_v24  ;;  %1439 = vmatmul.mubr.bf16.gmra.mxu0 %v2055_v24 }
 0x105   :  { %987 = vmatprep.mubr.bf16.mxu1 %v2059_v35  ;;  %1448 = vmatprep.mubr.bf16.mxu0 %v2059_v35 }
 0x10c   :  { %988 = vmatmul.mubr.bf16.gmra.mxu1 %v2067_v44  ;;  %1449 = vmatmul.mubr.bf16.gmra.mxu0 %v2067_v44 }
 0x10d   :  { %997 = vmatprep.mubr.bf16.mxu1 %v2071_v55  ;;  %1458 = vmatprep.mubr.bf16.mxu0 %v2071_v55 }
 0x114   :  { %998 = vmatmul.mubr.bf16.gmra.mxu1 %v2079_v6  ;;  %1459 = vmatmul.mubr.bf16.gmra.mxu0 %v2079_v6 }
 0x115   :  { %1007 = vmatprep.mubr.bf16.mxu1 %v2083_v18  ;;  %1468 = vmatprep.mubr.bf16.mxu0 %v2083_v18 }
 0x11c   :  { %1008 = vmatmul.mubr.bf16.gmra.mxu1 %v2091_v32  ;;  %1469 = vmatmul.mubr.bf16.gmra.mxu0 %v2091_v32 }
 0x11d   :  { %1017 = vmatprep.mubr.bf16.mxu1 %v2095_v47  ;;  %1478 = vmatprep.mubr.bf16.mxu0 %v2095_v47 }
 0x124   :  { %1018 = vmatmul.mubr.bf16.gmra.mxu1 %v2103_v62  ;;  %1479 = vmatmul.mubr.bf16.gmra.mxu0 %v2103_v62 }
 0x125   :  { %1027 = vmatprep.mubr.bf16.mxu1 %v2107_v11  ;;  %1488 = vmatprep.mubr.bf16.mxu0 %v2107_v11 }
 0x12c   :  { %1028 = vmatmul.mubr.bf16.gmra.mxu1 %v2113_v29  ;;  %1489 = vmatmul.mubr.bf16.gmra.mxu0 %v2113_v29 }
 0x134   :  { %v418_v2 = vpop.f32.mrf.mxu0  ;;  %v498_v12 = vpop.f32.mrf.mxu1 }
 0x135   :  { %v419_v13 = vadd.f32 %v418_v2, %v2186_v57  ;;  %v499_v23 = vadd.f32 %v498_v12, %v2186_v57 }
 0x136   :  { %v420_v24 = vpop.f32.mrf.mxu0  ;;  %v500_v34 = vpop.f32.mrf.mxu1 }
 0x137   :  { %577 = vst [vmem:[%s2984_s7] sm:$0xff] %v419_v13  ;;  %609 = vst [vmem:[%s2984_s7 + $0x100] sm:$0xff] %v499_v23  ;;  %v421_v35 = vadd.f32 %v420_v24, %v2189_v1  ;;  %v501_v43 = vadd.f32 %v500_v34, %v2189_v1 }
 0x138   :  { %v422_v44 = vpop.f32.mrf.mxu0  ;;  %v502_v54 = vpop.f32.mrf.mxu1 }
 0x139   :  { %578 = vst [vmem:[%s2984_s7 + $0x8] sm:$0xff] %v421_v35  ;;  %610 = vst [vmem:[%s2984_s7 + $0x108] sm:$0xff] %v501_v43  ;;  %v423_v55 = vadd.f32 %v422_v44, %v2186_v57  ;;  %v503_v5 = vadd.f32 %v502_v54, %v2186_v57 }
 0x13a   :  { %v424_v6 = vpop.f32.mrf.mxu0  ;;  %v504_v17 = vpop.f32.mrf.mxu1 }
 0x13b   :  { %579 = vst [vmem:[%s2984_s7 + $0x10] sm:$0xff] %v423_v55  ;;  %611 = vst [vmem:[%s2984_s7 + $0x110] sm:$0xff] %v503_v5  ;;  %v425_v18 = vadd.f32 %v424_v6, %v2189_v1  ;;  %v505_v31 = vadd.f32 %v504_v17, %v2189_v1 }
 0x13c   :  { %v428_v32 = vpop.f32.mrf.mxu0  ;;  %v508_v40 = vpop.f32.mrf.mxu1 }
 0x13d   :  { %580 = vst [vmem:[%s2984_s7 + $0x18] sm:$0xff] %v425_v18  ;;  %612 = vst [vmem:[%s2984_s7 + $0x118] sm:$0xff] %v505_v31  ;;  %v429_v41 = vadd.f32 %v428_v32, %v2186_v57  ;;  %v509_v42 = vadd.f32 %v508_v40, %v2186_v57 }
 0x13e   :  { %v430_v47 = vpop.f32.mrf.mxu0  ;;  %v510_v48 = vpop.f32.mrf.mxu1 }
 0x13f   :  { %581 = vst [vmem:[%s2984_s7 + $0x20] sm:$0xff] %v429_v41  ;;  %613 = vst [vmem:[%s2984_s7 + $0x120] sm:$0xff] %v509_v42  ;;  %v431_v49 = vadd.f32 %v430_v47, %v2189_v1  ;;  %v511_v50 = vadd.f32 %v510_v48, %v2189_v1 }
 0x140   :  { %v432_v51 = vpop.f32.mrf.mxu0  ;;  %v512_v52 = vpop.f32.mrf.mxu1 }
 0x141   :  { %582 = vst [vmem:[%s2984_s7 + $0x28] sm:$0xff] %v431_v49  ;;  %614 = vst [vmem:[%s2984_s7 + $0x128] sm:$0xff] %v511_v50  ;;  %v433_v53 = vadd.f32 %v432_v51, %v2186_v57  ;;  %v513_v58 = vadd.f32 %v512_v52, %v2186_v57 }
 0x142   :  { %v434_v59 = vpop.f32.mrf.mxu0  ;;  %v514_v60 = vpop.f32.mrf.mxu1 }
 0x143   :  { %583 = vst [vmem:[%s2984_s7 + $0x30] sm:$0xff] %v433_v53  ;;  %615 = vst [vmem:[%s2984_s7 + $0x130] sm:$0xff] %v513_v58  ;;  %v435_v61 = vadd.f32 %v434_v59, %v2189_v1  ;;  %v515_v62 = vadd.f32 %v514_v60, %v2189_v1 }
 0x144   :  { %v438_v63 = vpop.f32.mrf.mxu0  ;;  %v518_v0 = vpop.f32.mrf.mxu1 }
 0x145   :  { %584 = vst [vmem:[%s2984_s7 + $0x38] sm:$0xff] %v435_v61  ;;  %616 = vst [vmem:[%s2984_s7 + $0x138] sm:$0xff] %v515_v62  ;;  %v439_v3 = vadd.f32 %v438_v63, %v2186_v57  ;;  %v519_v4 = vadd.f32 %v518_v0, %v2186_v57 }
 0x146   :  { %v440_v7 = vpop.f32.mrf.mxu0  ;;  %v520_v8 = vpop.f32.mrf.mxu1 }
 0x147   :  { %585 = vst [vmem:[%s2984_s7 + $0x40] sm:$0xff] %v439_v3  ;;  %617 = vst [vmem:[%s2984_s7 + $0x140] sm:$0xff] %v519_v4  ;;  %v441_v9 = vadd.f32 %v440_v7, %v2189_v1  ;;  %v521_v10 = vadd.f32 %v520_v8, %v2189_v1 }
 0x148   :  { %v442_v11 = vpop.f32.mrf.mxu0  ;;  %v522_v14 = vpop.f32.mrf.mxu1 }
 0x149   :  { %586 = vst [vmem:[%s2984_s7 + $0x48] sm:$0xff] %v441_v9  ;;  %618 = vst [vmem:[%s2984_s7 + $0x148] sm:$0xff] %v521_v10  ;;  %v443_v16 = vadd.f32 %v442_v11, %v2186_v57  ;;  %v523_v20 = vadd.f32 %v522_v14, %v2186_v57 }
 0x14a   :  { %v444_v21 = vpop.f32.mrf.mxu0  ;;  %v524_v22 = vpop.f32.mrf.mxu1 }
 0x14b   :  { %587 = vst [vmem:[%s2984_s7 + $0x50] sm:$0xff] %v443_v16  ;;  %619 = vst [vmem:[%s2984_s7 + $0x150] sm:$0xff] %v523_v20  ;;  %v445_v25 = vadd.f32 %v444_v21, %v2189_v1  ;;  %v525_v26 = vadd.f32 %v524_v22, %v2189_v1 }
 0x14c   :  { %v448_v27 = vpop.f32.mrf.mxu0  ;;  %v528_v28 = vpop.f32.mrf.mxu1 }
 0x14d   :  { %588 = vst [vmem:[%s2984_s7 + $0x58] sm:$0xff] %v445_v25  ;;  %620 = vst [vmem:[%s2984_s7 + $0x158] sm:$0xff] %v525_v26  ;;  %v449_v29 = vadd.f32 %v448_v27, %v2186_v57  ;;  %v529_v30 = vadd.f32 %v528_v28, %v2186_v57 }
 0x14e   :  { %v450_v33 = vpop.f32.mrf.mxu0  ;;  %v530_v36 = vpop.f32.mrf.mxu1 }
 0x14f   :  { %589 = vst [vmem:[%s2984_s7 + $0x60] sm:$0xff] %v449_v29  ;;  %621 = vst [vmem:[%s2984_s7 + $0x160] sm:$0xff] %v529_v30  ;;  %v451_v37 = vadd.f32 %v450_v33, %v2189_v1  ;;  %v531_v38 = vadd.f32 %v530_v36, %v2189_v1 }
 0x150   :  { %v452_v39 = vpop.f32.mrf.mxu0  ;;  %v532_v15 = vpop.f32.mrf.mxu1 }
 0x151   :  { %590 = vst [vmem:[%s2984_s7 + $0x68] sm:$0xff] %v451_v37  ;;  %622 = vst [vmem:[%s2984_s7 + $0x168] sm:$0xff] %v531_v38  ;;  %v453_v19 = vadd.f32 %v452_v39, %v2186_v57  ;;  %v533_v46 = vadd.f32 %v532_v15, %v2186_v57 }
 0x152   :  { %v454_v2 = vpop.f32.mrf.mxu0  ;;  %v534_v12 = vpop.f32.mrf.mxu1 }
 0x153   :  { %591 = vst [vmem:[%s2984_s7 + $0x70] sm:$0xff] %v453_v19  ;;  %623 = vst [vmem:[%s2984_s7 + $0x170] sm:$0xff] %v533_v46  ;;  %v455_v13 = vadd.f32 %v454_v2, %v2189_v1  ;;  %v535_v23 = vadd.f32 %v534_v12, %v2189_v1  ;;  %v673_v19 = vld [vmem:[%s2981_s4] sm:$0x3] }
 0x154   :  { %v458_v24 = vpop.f32.mrf.mxu0  ;;  %v538_v34 = vpop.f32.mrf.mxu1  ;;  %v1134_v46 = vld [vmem:[%s2983_s6] sm:$0x3] }
 0x155   :  { %592 = vst [vmem:[%s2984_s7 + $0x78] sm:$0xff] %v455_v13  ;;  %624 = vst [vmem:[%s2984_s7 + $0x178] sm:$0xff] %v535_v23  ;;  %v459_v35 = vadd.f32 %v458_v24, %v2186_v57  ;;  %v539_v43 = vadd.f32 %v538_v34, %v2186_v57 }
 0x156   :  { %v460_v44 = vpop.f32.mrf.mxu0  ;;  %v540_v54 = vpop.f32.mrf.mxu1 }
 0x157   :  { %593 = vst [vmem:[%s2984_s7 + $0x80] sm:$0xff] %v459_v35  ;;  %625 = vst [vmem:[%s2984_s7 + $0x180] sm:$0xff] %v539_v43  ;;  %v461_v55 = vadd.f32 %v460_v44, %v2189_v1  ;;  %v541_v5 = vadd.f32 %v540_v54, %v2189_v1  ;;  %v2440_v35 = vrot.slane %v673_v19, %v2178_v45 }
 0x158   :  { %v462_v6 = vpop.f32.mrf.mxu0  ;;  %v542_v17 = vpop.f32.mrf.mxu1  ;;  %v2443_v43 = vrot.slane %v1134_v46, %v2178_v45  ;;  %v2457_v45 = vrot.slane %v1134_v46, %v2183_v56 }
 0x159   :  { %594 = vst [vmem:[%s2984_s7 + $0x88] sm:$0xff] %v461_v55  ;;  %626 = vst [vmem:[%s2984_s7 + $0x188] sm:$0xff] %v541_v5  ;;  %v463_v18 = vadd.f32 %v462_v6, %v2186_v57  ;;  %v543_v31 = vadd.f32 %v542_v17, %v2186_v57  ;;  %v2454_v5 = vrot.slane %v673_v19, %v2183_v56 }
 0x15a   :  { %v464_v32 = vpop.f32.mrf.mxu0  ;;  %v544_v40 = vpop.f32.mrf.mxu1 }
 0x15b   :  { %595 = vst [vmem:[%s2984_s7 + $0x90] sm:$0xff] %v463_v18  ;;  %627 = vst [vmem:[%s2984_s7 + $0x190] sm:$0xff] %v543_v31  ;;  %v465_v41 = vadd.f32 %v464_v32, %v2189_v1  ;;  %v545_v42 = vadd.f32 %v544_v40, %v2189_v1 }
 0x15c   :  { %v468_v47 = vpop.f32.mrf.mxu0  ;;  %v548_v48 = vpop.f32.mrf.mxu1 }
 0x15d   :  { %596 = vst [vmem:[%s2984_s7 + $0x98] sm:$0xff] %v465_v41  ;;  %628 = vst [vmem:[%s2984_s7 + $0x198] sm:$0xff] %v545_v42  ;;  %v469_v49 = vadd.f32 %v468_v47, %v2186_v57  ;;  %v549_v50 = vadd.f32 %v548_v48, %v2186_v57 }
 0x15e   :  { %v470_v51 = vpop.f32.mrf.mxu0  ;;  %v550_v52 = vpop.f32.mrf.mxu1 }
 0x15f   :  { %597 = vst [vmem:[%s2984_s7 + $0xa0] sm:$0xff] %v469_v49  ;;  %629 = vst [vmem:[%s2984_s7 + $0x1a0] sm:$0xff] %v549_v50  ;;  %v471_v53 = vadd.f32 %v470_v51, %v2189_v1  ;;  %v551_v58 = vadd.f32 %v550_v52, %v2189_v1 }
 0x160   :  { %v472_v59 = vpop.f32.mrf.mxu0  ;;  %v552_v60 = vpop.f32.mrf.mxu1 }
 0x161   :  { %598 = vst [vmem:[%s2984_s7 + $0xa8] sm:$0xff] %v471_v53  ;;  %630 = vst [vmem:[%s2984_s7 + $0x1a8] sm:$0xff] %v551_v58  ;;  %v473_v61 = vadd.f32 %v472_v59, %v2186_v57  ;;  %v553_v62 = vadd.f32 %v552_v60, %v2186_v57 }
 0x162   :  { %v474_v63 = vpop.f32.mrf.mxu0  ;;  %v554_v0 = vpop.f32.mrf.mxu1 }
 0x163   :  { %599 = vst [vmem:[%s2984_s7 + $0xb0] sm:$0xff] %v473_v61  ;;  %631 = vst [vmem:[%s2984_s7 + $0x1b0] sm:$0xff] %v553_v62  ;;  %v475_v3 = vadd.f32 %v474_v63, %v2189_v1  ;;  %v555_v4 = vadd.f32 %v554_v0, %v2189_v1 }
 0x164   :  { %v478_v7 = vpop.f32.mrf.mxu0  ;;  %v558_v8 = vpop.f32.mrf.mxu1 }
 0x165   :  { %600 = vst [vmem:[%s2984_s7 + $0xb8] sm:$0xff] %v475_v3  ;;  %632 = vst [vmem:[%s2984_s7 + $0x1b8] sm:$0xff] %v555_v4  ;;  %v479_v9 = vadd.f32 %v478_v7, %v2186_v57  ;;  %v559_v10 = vadd.f32 %v558_v8, %v2186_v57 }
 0x166   :  { %v480_v11 = vpop.f32.mrf.mxu0  ;;  %v560_v14 = vpop.f32.mrf.mxu1 }
 0x167   :  { %601 = vst [vmem:[%s2984_s7 + $0xc0] sm:$0xff] %v479_v9  ;;  %633 = vst [vmem:[%s2984_s7 + $0x1c0] sm:$0xff] %v559_v10  ;;  %v481_v16 = vadd.f32 %v480_v11, %v2189_v1  ;;  %v561_v20 = vadd.f32 %v560_v14, %v2189_v1 }
 0x168   :  { %v482_v21 = vpop.f32.mrf.mxu0  ;;  %v562_v22 = vpop.f32.mrf.mxu1 }
 0x169   :  { %602 = vst [vmem:[%s2984_s7 + $0xc8] sm:$0xff] %v481_v16  ;;  %634 = vst [vmem:[%s2984_s7 + $0x1c8] sm:$0xff] %v561_v20  ;;  %v483_v25 = vadd.f32 %v482_v21, %v2186_v57  ;;  %v563_v26 = vadd.f32 %v562_v22, %v2186_v57 }
 0x16a   :  { %v484_v27 = vpop.f32.mrf.mxu0  ;;  %v564_v28 = vpop.f32.mrf.mxu1 }
 0x16b   :  { %603 = vst [vmem:[%s2984_s7 + $0xd0] sm:$0xff] %v483_v25  ;;  %635 = vst [vmem:[%s2984_s7 + $0x1d0] sm:$0xff] %v563_v26  ;;  %v485_v29 = vadd.f32 %v484_v27, %v2189_v1  ;;  %v565_v30 = vadd.f32 %v564_v28, %v2189_v1 }
 0x16c   :  { %v488_v33 = vpop.f32.mrf.mxu0  ;;  %v568_v36 = vpop.f32.mrf.mxu1 }
 0x16d   :  { %604 = vst [vmem:[%s2984_s7 + $0xd8] sm:$0xff] %v485_v29  ;;  %636 = vst [vmem:[%s2984_s7 + $0x1d8] sm:$0xff] %v565_v30  ;;  %v489_v37 = vadd.f32 %v488_v33, %v2186_v57  ;;  %v569_v38 = vadd.f32 %v568_v36, %v2186_v57 }
 0x16e   :  { %v490_v39 = vpop.f32.mrf.mxu0  ;;  %v570_v15 = vpop.f32.mrf.mxu1 }
 0x16f   :  { %605 = vst [vmem:[%s2984_s7 + $0xe0] sm:$0xff] %v489_v37  ;;  %637 = vst [vmem:[%s2984_s7 + $0x1e0] sm:$0xff] %v569_v38  ;;  %v491_v2 = vadd.f32 %v490_v39, %v2189_v1  ;;  %v571_v12 = vadd.f32 %v570_v15, %v2189_v1 }
 0x170   :  { %v492_v13 = vpop.f32.mrf.mxu0  ;;  %v572_v23 = vpop.f32.mrf.mxu1 }
 0x171   :  { %606 = vst [vmem:[%s2984_s7 + $0xe8] sm:$0xff] %v491_v2  ;;  %638 = vst [vmem:[%s2984_s7 + $0x1e8] sm:$0xff] %v571_v12  ;;  %v493_v24 = vadd.f32 %v492_v13, %v2186_v57  ;;  %v573_v34 = vadd.f32 %v572_v23, %v2186_v57 }
 0x172   :  { %v494_v44 = vpop.f32.mrf.mxu0  ;;  %v574_v54 = vpop.f32.mrf.mxu1 }
 0x173   :  { %607 = vst [vmem:[%s2984_s7 + $0xf0] sm:$0xff] %v493_v24  ;;  %639 = vst [vmem:[%s2984_s7 + $0x1f0] sm:$0xff] %v573_v34  ;;  %v495_v55 = vadd.f32 %v494_v44, %v2189_v1  ;;  %v575_v57 = vadd.f32 %v574_v54, %v2189_v1 }
 0x174   :  { %v879_v6 = vpop.f32.mrf.mxu1  ;;  %v1340_v17 = vpop.f32.mrf.mxu0 }
 0x175   :  { %608 = vst [vmem:[%s2984_s7 + $0xf8] sm:$0xff] %v495_v55  ;;  %640 = vst [vmem:[%s2984_s7 + $0x1f8] sm:$0xff] %v575_v57  ;;  %v880_v18 = vadd.f32 %v879_v6, %v2440_v35  ;;  %v1341_v1 = vadd.f32 %v1340_v17, %v2443_v43 }
 0x176   :  { %v881_v31 = vpop.f32.mrf.mxu1  ;;  %v1342_v32 = vpop.f32.mrf.mxu0 }
 0x177   :  { %1038 = vst [vmem:[%s2985_s8] sm:$0xff] %v880_v18  ;;  %1499 = vst [vmem:[%s2986_s9] sm:$0xff] %v1341_v1  ;;  %v882_v56 = vadd.f32 %v881_v31, %v2454_v5  ;;  %v1343_v40 = vadd.f32 %v1342_v32, %v2457_v45 }
 0x178   :  { %v883_v41 = vpop.f32.mrf.mxu1  ;;  %v1344_v42 = vpop.f32.mrf.mxu0 }
 0x179   :  { %1039 = vst [vmem:[%s2985_s8 + $0x8] sm:$0xff] %v882_v56  ;;  %1500 = vst [vmem:[%s2986_s9 + $0x8] sm:$0xff] %v1343_v40  ;;  %v884_v47 = vadd.f32 %v883_v41, %v2440_v35  ;;  %v1345_v48 = vadd.f32 %v1344_v42, %v2443_v43 }
 0x17a   :  { %v885_v49 = vpop.f32.mrf.mxu1  ;;  %v1346_v50 = vpop.f32.mrf.mxu0 }
 0x17b   :  { %1040 = vst [vmem:[%s2985_s8 + $0x10] sm:$0xff] %v884_v47  ;;  %1501 = vst [vmem:[%s2986_s9 + $0x10] sm:$0xff] %v1345_v48  ;;  %v886_v51 = vadd.f32 %v885_v49, %v2454_v5  ;;  %v1347_v52 = vadd.f32 %v1346_v50, %v2457_v45 }
 0x17c   :  { %v889_v53 = vpop.f32.mrf.mxu1  ;;  %v1350_v58 = vpop.f32.mrf.mxu0 }
 0x17d   :  { %1041 = vst [vmem:[%s2985_s8 + $0x18] sm:$0xff] %v886_v51  ;;  %1502 = vst [vmem:[%s2986_s9 + $0x18] sm:$0xff] %v1347_v52  ;;  %v890_v59 = vadd.f32 %v889_v53, %v2440_v35  ;;  %v1351_v60 = vadd.f32 %v1350_v58, %v2443_v43 }
 0x17e   :  { %v891_v61 = vpop.f32.mrf.mxu1  ;;  %v1352_v62 = vpop.f32.mrf.mxu0 }
 0x17f   :  { %1042 = vst [vmem:[%s2985_s8 + $0x20] sm:$0xff] %v890_v59  ;;  %1503 = vst [vmem:[%s2986_s9 + $0x20] sm:$0xff] %v1351_v60  ;;  %v892_v63 = vadd.f32 %v891_v61, %v2454_v5  ;;  %v1353_v0 = vadd.f32 %v1352_v62, %v2457_v45 }
 0x180   :  { %v893_v3 = vpop.f32.mrf.mxu1  ;;  %v1354_v4 = vpop.f32.mrf.mxu0 }
 0x181   :  { %1043 = vst [vmem:[%s2985_s8 + $0x28] sm:$0xff] %v892_v63  ;;  %1504 = vst [vmem:[%s2986_s9 + $0x28] sm:$0xff] %v1353_v0  ;;  %v894_v7 = vadd.f32 %v893_v3, %v2440_v35  ;;  %v1355_v8 = vadd.f32 %v1354_v4, %v2443_v43 }
 0x182   :  { %v895_v9 = vpop.f32.mrf.mxu1  ;;  %v1356_v10 = vpop.f32.mrf.mxu0 }
 0x183   :  { %1044 = vst [vmem:[%s2985_s8 + $0x30] sm:$0xff] %v894_v7  ;;  %1505 = vst [vmem:[%s2986_s9 + $0x30] sm:$0xff] %v1355_v8  ;;  %v896_v11 = vadd.f32 %v895_v9, %v2454_v5  ;;  %v1357_v14 = vadd.f32 %v1356_v10, %v2457_v45 }
 0x184   :  { %v899_v16 = vpop.f32.mrf.mxu1  ;;  %v1360_v20 = vpop.f32.mrf.mxu0 }
 0x185   :  { %1045 = vst [vmem:[%s2985_s8 + $0x38] sm:$0xff] %v896_v11  ;;  %1506 = vst [vmem:[%s2986_s9 + $0x38] sm:$0xff] %v1357_v14  ;;  %v900_v21 = vadd.f32 %v899_v16, %v2440_v35  ;;  %v1361_v22 = vadd.f32 %v1360_v20, %v2443_v43 }
 0x186   :  { %v901_v25 = vpop.f32.mrf.mxu1  ;;  %v1362_v26 = vpop.f32.mrf.mxu0 }
 0x187   :  { %1046 = vst [vmem:[%s2985_s8 + $0x40] sm:$0xff] %v900_v21  ;;  %1507 = vst [vmem:[%s2986_s9 + $0x40] sm:$0xff] %v1361_v22  ;;  %v902_v27 = vadd.f32 %v901_v25, %v2454_v5  ;;  %v1363_v28 = vadd.f32 %v1362_v26, %v2457_v45 }
 0x188   :  { %v903_v29 = vpop.f32.mrf.mxu1  ;;  %v1364_v30 = vpop.f32.mrf.mxu0 }
 0x189   :  { %1047 = vst [vmem:[%s2985_s8 + $0x48] sm:$0xff] %v902_v27  ;;  %1508 = vst [vmem:[%s2986_s9 + $0x48] sm:$0xff] %v1363_v28  ;;  %v904_v33 = vadd.f32 %v903_v29, %v2440_v35  ;;  %v1365_v36 = vadd.f32 %v1364_v30, %v2443_v43 }
 0x18a   :  { %v905_v37 = vpop.f32.mrf.mxu1  ;;  %v1366_v38 = vpop.f32.mrf.mxu0 }
 0x18b   :  { %1048 = vst [vmem:[%s2985_s8 + $0x50] sm:$0xff] %v904_v33  ;;  %1509 = vst [vmem:[%s2986_s9 + $0x50] sm:$0xff] %v1365_v36  ;;  %v906_v39 = vadd.f32 %v905_v37, %v2454_v5  ;;  %v1367_v15 = vadd.f32 %v1366_v38, %v2457_v45 }
 0x18c   :  { %v909_v19 = vpop.f32.mrf.mxu1  ;;  %v1370_v46 = vpop.f32.mrf.mxu0 }
 0x18d   :  { %1049 = vst [vmem:[%s2985_s8 + $0x58] sm:$0xff] %v906_v39  ;;  %1510 = vst [vmem:[%s2986_s9 + $0x58] sm:$0xff] %v1367_v15  ;;  %v910_v2 = vadd.f32 %v909_v19, %v2440_v35  ;;  %v1371_v12 = vadd.f32 %v1370_v46, %v2443_v43 }
 0x18e   :  { %v911_v13 = vpop.f32.mrf.mxu1  ;;  %v1372_v23 = vpop.f32.mrf.mxu0 }
 0x18f   :  { %1050 = vst [vmem:[%s2985_s8 + $0x60] sm:$0xff] %v910_v2  ;;  %1511 = vst [vmem:[%s2986_s9 + $0x60] sm:$0xff] %v1371_v12  ;;  %v912_v24 = vadd.f32 %v911_v13, %v2454_v5  ;;  %v1373_v34 = vadd.f32 %v1372_v23, %v2457_v45 }
 0x190   :  { %v913_v44 = vpop.f32.mrf.mxu1  ;;  %v1374_v54 = vpop.f32.mrf.mxu0 }
 0x191   :  { %1051 = vst [vmem:[%s2985_s8 + $0x68] sm:$0xff] %v912_v24  ;;  %1512 = vst [vmem:[%s2986_s9 + $0x68] sm:$0xff] %v1373_v34  ;;  %v914_v55 = vadd.f32 %v913_v44, %v2440_v35  ;;  %v1375_v57 = vadd.f32 %v1374_v54, %v2443_v43 }
 0x192   :  { %v915_v6 = vpop.f32.mrf.mxu1  ;;  %v1376_v17 = vpop.f32.mrf.mxu0 }
 0x193   :  { %1052 = vst [vmem:[%s2985_s8 + $0x70] sm:$0xff] %v914_v55  ;;  %1513 = vst [vmem:[%s2986_s9 + $0x70] sm:$0xff] %v1375_v57  ;;  %v916_v18 = vadd.f32 %v915_v6, %v2454_v5  ;;  %v1377_v1 = vadd.f32 %v1376_v17, %v2457_v45 }
 0x194   :  { %v919_v31 = vpop.f32.mrf.mxu1  ;;  %v1380_v32 = vpop.f32.mrf.mxu0 }
 0x195   :  { %1053 = vst [vmem:[%s2985_s8 + $0x78] sm:$0xff] %v916_v18  ;;  %1514 = vst [vmem:[%s2986_s9 + $0x78] sm:$0xff] %v1377_v1  ;;  %v920_v56 = vadd.f32 %v919_v31, %v2440_v35  ;;  %v1381_v40 = vadd.f32 %v1380_v32, %v2443_v43 }
 0x196   :  { %v921_v41 = vpop.f32.mrf.mxu1  ;;  %v1382_v42 = vpop.f32.mrf.mxu0 }
 0x197   :  { %1054 = vst [vmem:[%s2985_s8 + $0x80] sm:$0xff] %v920_v56  ;;  %1515 = vst [vmem:[%s2986_s9 + $0x80] sm:$0xff] %v1381_v40  ;;  %v922_v47 = vadd.f32 %v921_v41, %v2454_v5  ;;  %v1383_v48 = vadd.f32 %v1382_v42, %v2457_v45 }
 0x198   :  { %v923_v49 = vpop.f32.mrf.mxu1  ;;  %v1384_v50 = vpop.f32.mrf.mxu0 }
 0x199   :  { %1055 = vst [vmem:[%s2985_s8 + $0x88] sm:$0xff] %v922_v47  ;;  %1516 = vst [vmem:[%s2986_s9 + $0x88] sm:$0xff] %v1383_v48  ;;  %v924_v51 = vadd.f32 %v923_v49, %v2440_v35  ;;  %v1385_v52 = vadd.f32 %v1384_v50, %v2443_v43 }
 0x19a   :  { %v925_v53 = vpop.f32.mrf.mxu1  ;;  %v1386_v58 = vpop.f32.mrf.mxu0 }
 0x19b   :  { %1056 = vst [vmem:[%s2985_s8 + $0x90] sm:$0xff] %v924_v51  ;;  %1517 = vst [vmem:[%s2986_s9 + $0x90] sm:$0xff] %v1385_v52  ;;  %v926_v59 = vadd.f32 %v925_v53, %v2454_v5  ;;  %v1387_v60 = vadd.f32 %v1386_v58, %v2457_v45 }
 0x19c   :  { %v929_v61 = vpop.f32.mrf.mxu1  ;;  %v1390_v62 = vpop.f32.mrf.mxu0 }
 0x19d   :  { %1057 = vst [vmem:[%s2985_s8 + $0x98] sm:$0xff] %v926_v59  ;;  %1518 = vst [vmem:[%s2986_s9 + $0x98] sm:$0xff] %v1387_v60  ;;  %v930_v63 = vadd.f32 %v929_v61, %v2440_v35  ;;  %v1391_v0 = vadd.f32 %v1390_v62, %v2443_v43 }
 0x19e   :  { %v931_v3 = vpop.f32.mrf.mxu1  ;;  %v1392_v4 = vpop.f32.mrf.mxu0 }
 0x19f   :  { %1058 = vst [vmem:[%s2985_s8 + $0xa0] sm:$0xff] %v930_v63  ;;  %1519 = vst [vmem:[%s2986_s9 + $0xa0] sm:$0xff] %v1391_v0  ;;  %v932_v7 = vadd.f32 %v931_v3, %v2454_v5  ;;  %v1393_v8 = vadd.f32 %v1392_v4, %v2457_v45 }
 0x1a0   :  { %v933_v9 = vpop.f32.mrf.mxu1  ;;  %v1394_v10 = vpop.f32.mrf.mxu0 }
 0x1a1   :  { %1059 = vst [vmem:[%s2985_s8 + $0xa8] sm:$0xff] %v932_v7  ;;  %1520 = vst [vmem:[%s2986_s9 + $0xa8] sm:$0xff] %v1393_v8  ;;  %v934_v11 = vadd.f32 %v933_v9, %v2440_v35  ;;  %v1395_v14 = vadd.f32 %v1394_v10, %v2443_v43 }
 0x1a2   :  { %v935_v16 = vpop.f32.mrf.mxu1  ;;  %v1396_v20 = vpop.f32.mrf.mxu0 }
 0x1a3   :  { %1060 = vst [vmem:[%s2985_s8 + $0xb0] sm:$0xff] %v934_v11  ;;  %1521 = vst [vmem:[%s2986_s9 + $0xb0] sm:$0xff] %v1395_v14  ;;  %v936_v21 = vadd.f32 %v935_v16, %v2454_v5  ;;  %v1397_v22 = vadd.f32 %v1396_v20, %v2457_v45 }
 0x1a4   :  { %v939_v25 = vpop.f32.mrf.mxu1  ;;  %v1400_v26 = vpop.f32.mrf.mxu0 }
 0x1a5   :  { %1061 = vst [vmem:[%s2985_s8 + $0xb8] sm:$0xff] %v936_v21  ;;  %1522 = vst [vmem:[%s2986_s9 + $0xb8] sm:$0xff] %v1397_v22  ;;  %v940_v27 = vadd.f32 %v939_v25, %v2440_v35  ;;  %v1401_v28 = vadd.f32 %v1400_v26, %v2443_v43 }
 0x1a6   :  { %v941_v29 = vpop.f32.mrf.mxu1  ;;  %v1402_v30 = vpop.f32.mrf.mxu0 }
 0x1a7   :  { %1062 = vst [vmem:[%s2985_s8 + $0xc0] sm:$0xff] %v940_v27  ;;  %1523 = vst [vmem:[%s2986_s9 + $0xc0] sm:$0xff] %v1401_v28  ;;  %v942_v33 = vadd.f32 %v941_v29, %v2454_v5  ;;  %v1403_v36 = vadd.f32 %v1402_v30, %v2457_v45 }
 0x1a8   :  { %v943_v37 = vpop.f32.mrf.mxu1  ;;  %v1404_v38 = vpop.f32.mrf.mxu0 }
 0x1a9   :  { %1063 = vst [vmem:[%s2985_s8 + $0xc8] sm:$0xff] %v942_v33  ;;  %1524 = vst [vmem:[%s2986_s9 + $0xc8] sm:$0xff] %v1403_v36  ;;  %v944_v39 = vadd.f32 %v943_v37, %v2440_v35  ;;  %v1405_v15 = vadd.f32 %v1404_v38, %v2443_v43 }
 0x1aa   :  { %v945_v19 = vpop.f32.mrf.mxu1  ;;  %v1406_v46 = vpop.f32.mrf.mxu0 }
 0x1ab   :  { %1064 = vst [vmem:[%s2985_s8 + $0xd0] sm:$0xff] %v944_v39  ;;  %1525 = vst [vmem:[%s2986_s9 + $0xd0] sm:$0xff] %v1405_v15  ;;  %v946_v2 = vadd.f32 %v945_v19, %v2454_v5  ;;  %v1407_v12 = vadd.f32 %v1406_v46, %v2457_v45 }
 0x1ac   :  { %v949_v13 = vpop.f32.mrf.mxu1  ;;  %v1410_v23 = vpop.f32.mrf.mxu0 }
 0x1ad   :  { %1065 = vst [vmem:[%s2985_s8 + $0xd8] sm:$0xff] %v946_v2  ;;  %1526 = vst [vmem:[%s2986_s9 + $0xd8] sm:$0xff] %v1407_v12  ;;  %v950_v24 = vadd.f32 %v949_v13, %v2440_v35  ;;  %v1411_v34 = vadd.f32 %v1410_v23, %v2443_v43 }
 0x1ae   :  { %v951_v44 = vpop.f32.mrf.mxu1  ;;  %v1412_v54 = vpop.f32.mrf.mxu0 }
 0x1af   :  { %1066 = vst [vmem:[%s2985_s8 + $0xe0] sm:$0xff] %v950_v24  ;;  %1527 = vst [vmem:[%s2986_s9 + $0xe0] sm:$0xff] %v1411_v34  ;;  %v952_v55 = vadd.f32 %v951_v44, %v2454_v5  ;;  %v1413_v57 = vadd.f32 %v1412_v54, %v2457_v45 }
 0x1b0   :  { %v953_v6 = vpop.f32.mrf.mxu1  ;;  %v1414_v17 = vpop.f32.mrf.mxu0 }
 0x1b1   :  { %1067 = vst [vmem:[%s2985_s8 + $0xe8] sm:$0xff] %v952_v55  ;;  %1528 = vst [vmem:[%s2986_s9 + $0xe8] sm:$0xff] %v1413_v57  ;;  %v954_v18 = vadd.f32 %v953_v6, %v2440_v35  ;;  %v1415_v1 = vadd.f32 %v1414_v17, %v2443_v43 }
 0x1b2   :  { %v955_v31 = vpop.f32.mrf.mxu1  ;;  %v1416_v32 = vpop.f32.mrf.mxu0 }
 0x1b3   :  { %1068 = vst [vmem:[%s2985_s8 + $0xf0] sm:$0xff] %v954_v18  ;;  %1529 = vst [vmem:[%s2986_s9 + $0xf0] sm:$0xff] %v1415_v1  ;;  %v956_v56 = vadd.f32 %v955_v31, %v2454_v5  ;;  %v1417_v40 = vadd.f32 %v1416_v32, %v2457_v45 }
 0x1b4   :  { %v959_v41 = vpop.f32.mrf.mxu1  ;;  %v1420_v42 = vpop.f32.mrf.mxu0 }
 0x1b5   :  { %1069 = vst [vmem:[%s2985_s8 + $0xf8] sm:$0xff] %v956_v56  ;;  %1530 = vst [vmem:[%s2986_s9 + $0xf8] sm:$0xff] %v1417_v40  ;;  %v960_v47 = vadd.f32 %v959_v41, %v2440_v35  ;;  %v1421_v48 = vadd.f32 %v1420_v42, %v2443_v43 }
 0x1b6   :  { %v961_v49 = vpop.f32.mrf.mxu1  ;;  %v1422_v50 = vpop.f32.mrf.mxu0 }
 0x1b7   :  { %1070 = vst [vmem:[%s2985_s8 + $0x100] sm:$0xff] %v960_v47  ;;  %1531 = vst [vmem:[%s2986_s9 + $0x100] sm:$0xff] %v1421_v48  ;;  %v962_v51 = vadd.f32 %v961_v49, %v2454_v5  ;;  %v1423_v52 = vadd.f32 %v1422_v50, %v2457_v45 }
 0x1b8   :  { %v963_v53 = vpop.f32.mrf.mxu1  ;;  %v1424_v58 = vpop.f32.mrf.mxu0 }
 0x1b9   :  { %1071 = vst [vmem:[%s2985_s8 + $0x108] sm:$0xff] %v962_v51  ;;  %1532 = vst [vmem:[%s2986_s9 + $0x108] sm:$0xff] %v1423_v52  ;;  %v964_v59 = vadd.f32 %v963_v53, %v2440_v35  ;;  %v1425_v60 = vadd.f32 %v1424_v58, %v2443_v43 }
 0x1ba   :  { %v965_v61 = vpop.f32.mrf.mxu1  ;;  %v1426_v62 = vpop.f32.mrf.mxu0 }
 0x1bb   :  { %1072 = vst [vmem:[%s2985_s8 + $0x110] sm:$0xff] %v964_v59  ;;  %1533 = vst [vmem:[%s2986_s9 + $0x110] sm:$0xff] %v1425_v60  ;;  %v966_v63 = vadd.f32 %v965_v61, %v2454_v5  ;;  %v1427_v0 = vadd.f32 %v1426_v62, %v2457_v45 }
 0x1bc   :  { %v969_v3 = vpop.f32.mrf.mxu1  ;;  %v1430_v4 = vpop.f32.mrf.mxu0 }
 0x1bd   :  { %1073 = vst [vmem:[%s2985_s8 + $0x118] sm:$0xff] %v966_v63  ;;  %1534 = vst [vmem:[%s2986_s9 + $0x118] sm:$0xff] %v1427_v0  ;;  %v970_v7 = vadd.f32 %v969_v3, %v2440_v35  ;;  %v1431_v8 = vadd.f32 %v1430_v4, %v2443_v43 }
 0x1be   :  { %v971_v9 = vpop.f32.mrf.mxu1  ;;  %v1432_v10 = vpop.f32.mrf.mxu0 }
 0x1bf   :  { %1074 = vst [vmem:[%s2985_s8 + $0x120] sm:$0xff] %v970_v7  ;;  %1535 = vst [vmem:[%s2986_s9 + $0x120] sm:$0xff] %v1431_v8  ;;  %v972_v11 = vadd.f32 %v971_v9, %v2454_v5  ;;  %v1433_v14 = vadd.f32 %v1432_v10, %v2457_v45 }
 0x1c0   :  { %v973_v16 = vpop.f32.mrf.mxu1  ;;  %v1434_v20 = vpop.f32.mrf.mxu0 }
 0x1c1   :  { %1075 = vst [vmem:[%s2985_s8 + $0x128] sm:$0xff] %v972_v11  ;;  %1536 = vst [vmem:[%s2986_s9 + $0x128] sm:$0xff] %v1433_v14  ;;  %v974_v21 = vadd.f32 %v973_v16, %v2440_v35  ;;  %v1435_v22 = vadd.f32 %v1434_v20, %v2443_v43 }
 0x1c2   :  { %v975_v25 = vpop.f32.mrf.mxu1  ;;  %v1436_v26 = vpop.f32.mrf.mxu0 }
 0x1c3   :  { %1076 = vst [vmem:[%s2985_s8 + $0x130] sm:$0xff] %v974_v21  ;;  %1537 = vst [vmem:[%s2986_s9 + $0x130] sm:$0xff] %v1435_v22  ;;  %v976_v27 = vadd.f32 %v975_v25, %v2454_v5  ;;  %v1437_v28 = vadd.f32 %v1436_v26, %v2457_v45 }
 0x1c4   :  { %v979_v29 = vpop.f32.mrf.mxu1  ;;  %v1440_v30 = vpop.f32.mrf.mxu0 }
 0x1c5   :  { %1077 = vst [vmem:[%s2985_s8 + $0x138] sm:$0xff] %v976_v27  ;;  %1538 = vst [vmem:[%s2986_s9 + $0x138] sm:$0xff] %v1437_v28  ;;  %v980_v33 = vadd.f32 %v979_v29, %v2440_v35  ;;  %v1441_v36 = vadd.f32 %v1440_v30, %v2443_v43 }
 0x1c6   :  { %v981_v37 = vpop.f32.mrf.mxu1  ;;  %v1442_v38 = vpop.f32.mrf.mxu0 }
 0x1c7   :  { %1078 = vst [vmem:[%s2985_s8 + $0x140] sm:$0xff] %v980_v33  ;;  %1539 = vst [vmem:[%s2986_s9 + $0x140] sm:$0xff] %v1441_v36  ;;  %v982_v39 = vadd.f32 %v981_v37, %v2454_v5  ;;  %v1443_v15 = vadd.f32 %v1442_v38, %v2457_v45 }
 0x1c8   :  { %v983_v19 = vpop.f32.mrf.mxu1  ;;  %v1444_v46 = vpop.f32.mrf.mxu0 }
 0x1c9   :  { %1079 = vst [vmem:[%s2985_s8 + $0x148] sm:$0xff] %v982_v39  ;;  %1540 = vst [vmem:[%s2986_s9 + $0x148] sm:$0xff] %v1443_v15  ;;  %v984_v2 = vadd.f32 %v983_v19, %v2440_v35  ;;  %v1445_v12 = vadd.f32 %v1444_v46, %v2443_v43 }
 0x1ca   :  { %v985_v13 = vpop.f32.mrf.mxu1  ;;  %v1446_v23 = vpop.f32.mrf.mxu0 }
 0x1cb   :  { %1080 = vst [vmem:[%s2985_s8 + $0x150] sm:$0xff] %v984_v2  ;;  %1541 = vst [vmem:[%s2986_s9 + $0x150] sm:$0xff] %v1445_v12  ;;  %v986_v24 = vadd.f32 %v985_v13, %v2454_v5  ;;  %v1447_v34 = vadd.f32 %v1446_v23, %v2457_v45 }
 0x1cc   :  { %v989_v44 = vpop.f32.mrf.mxu1  ;;  %v1450_v54 = vpop.f32.mrf.mxu0 }
 0x1cd   :  { %1081 = vst [vmem:[%s2985_s8 + $0x158] sm:$0xff] %v986_v24  ;;  %1542 = vst [vmem:[%s2986_s9 + $0x158] sm:$0xff] %v1447_v34  ;;  %v990_v55 = vadd.f32 %v989_v44, %v2440_v35  ;;  %v1451_v57 = vadd.f32 %v1450_v54, %v2443_v43 }
 0x1ce   :  { %v991_v6 = vpop.f32.mrf.mxu1  ;;  %v1452_v17 = vpop.f32.mrf.mxu0 }
 0x1cf   :  { %1082 = vst [vmem:[%s2985_s8 + $0x160] sm:$0xff] %v990_v55  ;;  %1543 = vst [vmem:[%s2986_s9 + $0x160] sm:$0xff] %v1451_v57  ;;  %v992_v18 = vadd.f32 %v991_v6, %v2454_v5  ;;  %v1453_v1 = vadd.f32 %v1452_v17, %v2457_v45 }
 0x1d0   :  { %v993_v31 = vpop.f32.mrf.mxu1  ;;  %v1454_v32 = vpop.f32.mrf.mxu0 }
 0x1d1   :  { %1083 = vst [vmem:[%s2985_s8 + $0x168] sm:$0xff] %v992_v18  ;;  %1544 = vst [vmem:[%s2986_s9 + $0x168] sm:$0xff] %v1453_v1  ;;  %v994_v56 = vadd.f32 %v993_v31, %v2440_v35  ;;  %v1455_v40 = vadd.f32 %v1454_v32, %v2443_v43 }
 0x1d2   :  { %v995_v41 = vpop.f32.mrf.mxu1  ;;  %v1456_v42 = vpop.f32.mrf.mxu0 }
 0x1d3   :  { %1084 = vst [vmem:[%s2985_s8 + $0x170] sm:$0xff] %v994_v56  ;;  %1545 = vst [vmem:[%s2986_s9 + $0x170] sm:$0xff] %v1455_v40  ;;  %v996_v47 = vadd.f32 %v995_v41, %v2454_v5  ;;  %v1457_v48 = vadd.f32 %v1456_v42, %v2457_v45 }
 0x1d4   :  { %v999_v49 = vpop.f32.mrf.mxu1  ;;  %v1460_v50 = vpop.f32.mrf.mxu0 }
 0x1d5   :  { %1085 = vst [vmem:[%s2985_s8 + $0x178] sm:$0xff] %v996_v47  ;;  %1546 = vst [vmem:[%s2986_s9 + $0x178] sm:$0xff] %v1457_v48  ;;  %v1000_v51 = vadd.f32 %v999_v49, %v2440_v35  ;;  %v1461_v52 = vadd.f32 %v1460_v50, %v2443_v43 }
 0x1d6   :  { %v1001_v53 = vpop.f32.mrf.mxu1  ;;  %v1462_v58 = vpop.f32.mrf.mxu0 }
 0x1d7   :  { %1086 = vst [vmem:[%s2985_s8 + $0x180] sm:$0xff] %v1000_v51  ;;  %1547 = vst [vmem:[%s2986_s9 + $0x180] sm:$0xff] %v1461_v52  ;;  %v1002_v59 = vadd.f32 %v1001_v53, %v2454_v5  ;;  %v1463_v60 = vadd.f32 %v1462_v58, %v2457_v45 }
 0x1d8   :  { %v1003_v61 = vpop.f32.mrf.mxu1  ;;  %v1464_v62 = vpop.f32.mrf.mxu0 }
 0x1d9   :  { %1087 = vst [vmem:[%s2985_s8 + $0x188] sm:$0xff] %v1002_v59  ;;  %1548 = vst [vmem:[%s2986_s9 + $0x188] sm:$0xff] %v1463_v60  ;;  %v1004_v63 = vadd.f32 %v1003_v61, %v2440_v35  ;;  %v1465_v0 = vadd.f32 %v1464_v62, %v2443_v43 }
 0x1da   :  { %v1005_v3 = vpop.f32.mrf.mxu1  ;;  %v1466_v4 = vpop.f32.mrf.mxu0 }
 0x1db   :  { %1088 = vst [vmem:[%s2985_s8 + $0x190] sm:$0xff] %v1004_v63  ;;  %1549 = vst [vmem:[%s2986_s9 + $0x190] sm:$0xff] %v1465_v0  ;;  %v1006_v7 = vadd.f32 %v1005_v3, %v2454_v5  ;;  %v1467_v8 = vadd.f32 %v1466_v4, %v2457_v45 }
 0x1dc   :  { %v1009_v9 = vpop.f32.mrf.mxu1  ;;  %v1470_v10 = vpop.f32.mrf.mxu0 }
 0x1dd   :  { %1089 = vst [vmem:[%s2985_s8 + $0x198] sm:$0xff] %v1006_v7  ;;  %1550 = vst [vmem:[%s2986_s9 + $0x198] sm:$0xff] %v1467_v8  ;;  %v1010_v11 = vadd.f32 %v1009_v9, %v2440_v35  ;;  %v1471_v14 = vadd.f32 %v1470_v10, %v2443_v43 }
 0x1de   :  { %v1011_v16 = vpop.f32.mrf.mxu1  ;;  %v1472_v20 = vpop.f32.mrf.mxu0 }
 0x1df   :  { %1090 = vst [vmem:[%s2985_s8 + $0x1a0] sm:$0xff] %v1010_v11  ;;  %1551 = vst [vmem:[%s2986_s9 + $0x1a0] sm:$0xff] %v1471_v14  ;;  %v1012_v21 = vadd.f32 %v1011_v16, %v2454_v5  ;;  %v1473_v22 = vadd.f32 %v1472_v20, %v2457_v45 }
 0x1e0   :  { %v1013_v25 = vpop.f32.mrf.mxu1  ;;  %v1474_v26 = vpop.f32.mrf.mxu0 }
 0x1e1   :  { %1091 = vst [vmem:[%s2985_s8 + $0x1a8] sm:$0xff] %v1012_v21  ;;  %1552 = vst [vmem:[%s2986_s9 + $0x1a8] sm:$0xff] %v1473_v22  ;;  %v1014_v27 = vadd.f32 %v1013_v25, %v2440_v35  ;;  %v1475_v28 = vadd.f32 %v1474_v26, %v2443_v43 }
 0x1e2   :  { %v1015_v29 = vpop.f32.mrf.mxu1  ;;  %v1476_v30 = vpop.f32.mrf.mxu0 }
 0x1e3   :  { %1092 = vst [vmem:[%s2985_s8 + $0x1b0] sm:$0xff] %v1014_v27  ;;  %1553 = vst [vmem:[%s2986_s9 + $0x1b0] sm:$0xff] %v1475_v28  ;;  %v1016_v33 = vadd.f32 %v1015_v29, %v2454_v5  ;;  %v1477_v36 = vadd.f32 %v1476_v30, %v2457_v45 }
 0x1e4   :  { %v1019_v37 = vpop.f32.mrf.mxu1  ;;  %v1480_v38 = vpop.f32.mrf.mxu0 }
 0x1e5   :  { %1093 = vst [vmem:[%s2985_s8 + $0x1b8] sm:$0xff] %v1016_v33  ;;  %1554 = vst [vmem:[%s2986_s9 + $0x1b8] sm:$0xff] %v1477_v36  ;;  %v1020_v39 = vadd.f32 %v1019_v37, %v2440_v35  ;;  %v1481_v15 = vadd.f32 %v1480_v38, %v2443_v43 }
 0x1e6   :  { %v1021_v19 = vpop.f32.mrf.mxu1  ;;  %v1482_v46 = vpop.f32.mrf.mxu0 }
 0x1e7   :  { %1094 = vst [vmem:[%s2985_s8 + $0x1c0] sm:$0xff] %v1020_v39  ;;  %1555 = vst [vmem:[%s2986_s9 + $0x1c0] sm:$0xff] %v1481_v15  ;;  %v1022_v2 = vadd.f32 %v1021_v19, %v2454_v5  ;;  %v1483_v12 = vadd.f32 %v1482_v46, %v2457_v45 }
 0x1e8   :  { %v1023_v13 = vpop.f32.mrf.mxu1  ;;  %v1484_v23 = vpop.f32.mrf.mxu0 }
 0x1e9   :  { %1095 = vst [vmem:[%s2985_s8 + $0x1c8] sm:$0xff] %v1022_v2  ;;  %1556 = vst [vmem:[%s2986_s9 + $0x1c8] sm:$0xff] %v1483_v12  ;;  %v1024_v24 = vadd.f32 %v1023_v13, %v2440_v35  ;;  %v1485_v34 = vadd.f32 %v1484_v23, %v2443_v43 }
 0x1ea   :  { %v1025_v44 = vpop.f32.mrf.mxu1  ;;  %v1486_v54 = vpop.f32.mrf.mxu0 }
 0x1eb   :  { %1096 = vst [vmem:[%s2985_s8 + $0x1d0] sm:$0xff] %v1024_v24  ;;  %1557 = vst [vmem:[%s2986_s9 + $0x1d0] sm:$0xff] %v1485_v34  ;;  %v1026_v55 = vadd.f32 %v1025_v44, %v2454_v5  ;;  %v1487_v57 = vadd.f32 %v1486_v54, %v2457_v45 }
 0x1ec   :  { %v1029_v6 = vpop.f32.mrf.mxu1  ;;  %v1490_v17 = vpop.f32.mrf.mxu0 }
 0x1ed   :  { %1097 = vst [vmem:[%s2985_s8 + $0x1d8] sm:$0xff] %v1026_v55  ;;  %1558 = vst [vmem:[%s2986_s9 + $0x1d8] sm:$0xff] %v1487_v57  ;;  %v1030_v18 = vadd.f32 %v1029_v6, %v2440_v35  ;;  %v1491_v1 = vadd.f32 %v1490_v17, %v2443_v43 }
 0x1ee   :  { %v1031_v31 = vpop.f32.mrf.mxu1  ;;  %v1492_v32 = vpop.f32.mrf.mxu0 }
 0x1ef   :  { %1098 = vst [vmem:[%s2985_s8 + $0x1e0] sm:$0xff] %v1030_v18  ;;  %1559 = vst [vmem:[%s2986_s9 + $0x1e0] sm:$0xff] %v1491_v1  ;;  %v1032_v56 = vadd.f32 %v1031_v31, %v2454_v5  ;;  %v1493_v40 = vadd.f32 %v1492_v32, %v2457_v45 }
 0x1f0   :  { %v1033_v41 = vpop.f32.mrf.mxu1  ;;  %v1494_v42 = vpop.f32.mrf.mxu0 }
 0x1f1   :  { %1099 = vst [vmem:[%s2985_s8 + $0x1e8] sm:$0xff] %v1032_v56  ;;  %1560 = vst [vmem:[%s2986_s9 + $0x1e8] sm:$0xff] %v1493_v40  ;;  %v1034_v47 = vadd.f32 %v1033_v41, %v2440_v35  ;;  %v1495_v48 = vadd.f32 %v1494_v42, %v2443_v43 }
 0x1f2   :  { %v1035_v49 = vpop.f32.mrf.mxu1  ;;  %v1496_v50 = vpop.f32.mrf.mxu0 }
 0x1f3   :  { %1100 = vst [vmem:[%s2985_s8 + $0x1f0] sm:$0xff] %v1034_v47  ;;  %1561 = vst [vmem:[%s2986_s9 + $0x1f0] sm:$0xff] %v1495_v48  ;;  %v1036_v51 = vadd.f32 %v1035_v49, %v2454_v5  ;;  %v1497_v52 = vadd.f32 %v1496_v50, %v2457_v45 }
 0x1f5   :  { %1101 = vst [vmem:[%s2985_s8 + $0x1f8] sm:$0xff] %v1036_v51  ;;  %1562 = vst [vmem:[%s2986_s9 + $0x1f8] sm:$0xff] %v1497_v52 }
 0x1f6   :  { %1575 = vsyncpa [#allocation3], 1 }
 0x1f7   :  { %1576 = vsyncpa [#allocation5], 1 }
 0x1f8   :  { %1577 = vsyncpa [#allocation8], 1 }

// kernel: _forward_core.12
= control target key start
LH: loop header
LB: loop body
LE: loop exit
PB: predicated region body
PF: predicated region fallthrough
CT: control target
= control target key end

     0   :  { %s1864_s1 = inlined_call_operand.vmem [shape: bf16[768,256], index: 1, kind: input, shape index: {}]   ;;  %s1865_s0 = inlined_call_operand.vmem [shape: f32[8,768], index: 0, kind: input, shape index: {}]   ;;  %s1866_s3 = inlined_call_operand.vmem [shape: bf16[256,256], index: 3, kind: input, shape index: {}]   ;;  %s1867_s2 = inlined_call_operand.vmem [shape: f32[1,256], index: 2, kind: input, shape index: {}]   ;;  %s1868_s8 = inlined_call_operand.vmem [shape: f32[1,256], index: 8, kind: input, shape index: {}]   ;;  %s1869_s4 = inlined_call_operand.vmem [shape: f32[1,256], index: 4, kind: input, shape index: {}]   ;;  %s1870_s7 = inlined_call_operand.vmem [shape: f32[1,256], index: 7, kind: input, shape index: {}]   ;;  %s1871_s5 = inlined_call_operand.vmem [shape: f32[1,256], index: 5, kind: input, shape index: {}]   ;;  %s1872_s6 = inlined_call_operand.vmem [shape: f32[1,256], index: 6, kind: input, shape index: {}]   ;;  %s1873_s9 = inlined_call_operand.vmem [shape: f32[8,256], index: 9, kind: output, shape index: {}]  }
   0x1   :  { %v1194_v0 = vld [vmem:[%s1864_s1 + $0x74] ss:$8 sps:$4 sm:$0xff]   ;;  %v1196_v1 = vld [vmem:[%s1864_s1 + $0x70] ss:$8 sps:$4 sm:$0xff]   ;;  %v1200_v4 = vld [vmem:[%s1864_s1 + $0x64] ss:$8 sps:$4 sm:$0xff]  }
   0x2   :  { %632 = vmatprep.subr.bf16.mxu0 %v1194_v0  ;;  %v1197_v2 = vld [vmem:[%s1864_s1 + $0x174] ss:$8 sps:$4 sm:$0xff]   ;;  %v1199_v3 = vld [vmem:[%s1864_s1 + $0x170] ss:$8 sps:$4 sm:$0xff]   ;;  %v1202_v5 = vld [vmem:[%s1864_s1 + $0x60] ss:$8 sps:$4 sm:$0xff]  }
   0x3   :  { %633 = vmatpush1.bf16.msra.mxu0 %v1196_v1  ;;  %673 = vmatprep.subr.bf16.mxu1 %v1197_v2  ;;  %v1203_v6 = vld [vmem:[%s1864_s1 + $0x164] ss:$8 sps:$4 sm:$0xff]   ;;  %v1205_v7 = vld [vmem:[%s1864_s1 + $0x160] ss:$8 sps:$4 sm:$0xff]   ;;  %v1206_v8 = vld [vmem:[%s1864_s1 + $0x54] ss:$8 sps:$4 sm:$0xff]  }
   0x4   :  { %674 = vmatpush1.bf16.msra.mxu1 %v1199_v3  ;;  %634 = vmatprep.subr.bf16.mxu0 %v1200_v4  ;;  %v1208_v9 = vld [vmem:[%s1864_s1 + $0x50] ss:$8 sps:$4 sm:$0xff]   ;;  %v1209_v10 = vld [vmem:[%s1864_s1 + $0x154] ss:$8 sps:$4 sm:$0xff]   ;;  %v1212_v11 = vld [vmem:[%s1864_s1 + $0x44] ss:$8 sps:$4 sm:$0xff]  }
   0x5   :  { %675 = vmatprep.subr.bf16.mxu1 %v1203_v6  ;;  %v1211_v12 = vld [vmem:[%s1864_s1 + $0x150] ss:$8 sps:$4 sm:$0xff]   ;;  %v1215_v13 = vld [vmem:[%s1864_s1 + $0x144] ss:$8 sps:$4 sm:$0xff]   ;;  %v1214_v14 = vld [vmem:[%s1864_s1 + $0x40] ss:$8 sps:$4 sm:$0xff]  }
   0x6   :  { %v1218_v15 = vld [vmem:[%s1864_s1 + $0x34] ss:$8 sps:$4 sm:$0xff]   ;;  %v1217_v16 = vld [vmem:[%s1864_s1 + $0x140] ss:$8 sps:$4 sm:$0xff]   ;;  %v1220_v18 = vld [vmem:[%s1864_s1 + $0x30] ss:$8 sps:$4 sm:$0xff]  }
   0x7   :  { %635 = vmatpush1.bf16.msra.mxu0 %v1202_v5  ;;  %v1221_v17 = vld [vmem:[%s1864_s1 + $0x134] ss:$8 sps:$4 sm:$0xff]   ;;  %v1224_v19 = vld [vmem:[%s1864_s1 + $0x24] ss:$8 sps:$4 sm:$0xff]   ;;  %v1223_v20 = vld [vmem:[%s1864_s1 + $0x130] ss:$8 sps:$4 sm:$0xff]  }
   0x8   :  { %636 = vmatprep.subr.bf16.mxu0 %v1206_v8  ;;  %676 = vmatpush1.bf16.msra.mxu1 %v1205_v7  ;;  %v1227_v21 = vld [vmem:[%s1864_s1 + $0x124] ss:$8 sps:$4 sm:$0xff]   ;;  %v1226_v22 = vld [vmem:[%s1864_s1 + $0x20] ss:$8 sps:$4 sm:$0xff]   ;;  %v1230_v23 = vld [vmem:[%s1864_s1 + $0x14] ss:$8 sps:$4 sm:$0xff]  }
   0x9   :  { %677 = vmatprep.subr.bf16.mxu1 %v1209_v10  ;;  %v1229_v24 = vld [vmem:[%s1864_s1 + $0x120] ss:$8 sps:$4 sm:$0xff]   ;;  %v1233_v25 = vld [vmem:[%s1864_s1 + $0x114] ss:$8 sps:$4 sm:$0xff]   ;;  %v1232_v26 = vld [vmem:[%s1864_s1 + $0x10] ss:$8 sps:$4 sm:$0xff]  }
   0xa   :  { %v1236_v27 = vld [vmem:[%s1864_s1 + $0x4] ss:$8 sps:$4 sm:$0xff]   ;;  %v1235_v28 = vld [vmem:[%s1864_s1 + $0x110] ss:$8 sps:$4 sm:$0xff]   ;;  %v1238_v30 = vld [vmem:[%s1864_s1] ss:$8 sps:$4 sm:$0xff]  }
   0xb   :  { %637 = vmatpush1.bf16.msra.mxu0 %v1208_v9  ;;  %v1239_v29 = vld [vmem:[%s1864_s1 + $0x104] ss:$8 sps:$4 sm:$0xff]   ;;  %v1242_v31 = vld [vmem:[%s1864_s1 + $0xf4] ss:$8 sps:$4 sm:$0xff]   ;;  %v1241_v32 = vld [vmem:[%s1864_s1 + $0x100] ss:$8 sps:$4 sm:$0xff]  }
   0xc   :  { %638 = vmatprep.subr.bf16.mxu0 %v1212_v11  ;;  %678 = vmatpush1.bf16.msra.mxu1 %v1211_v12  ;;  %v1245_v33 = vld [vmem:[%s1864_s1 + $0x1f4] ss:$8 sps:$4 sm:$0xff]   ;;  %v1244_v34 = vld [vmem:[%s1864_s1 + $0xf0] ss:$8 sps:$4 sm:$0xff]   ;;  %v1248_v35 = vld [vmem:[%s1864_s1 + $0xe4] ss:$8 sps:$4 sm:$0xff]  }
   0xd   :  { %679 = vmatprep.subr.bf16.mxu1 %v1215_v13  ;;  %v1247_v36 = vld [vmem:[%s1864_s1 + $0x1f0] ss:$8 sps:$4 sm:$0xff]   ;;  %v1251_v37 = vld [vmem:[%s1864_s1 + $0x1e4] ss:$8 sps:$4 sm:$0xff]   ;;  %v1250_v38 = vld [vmem:[%s1864_s1 + $0xe0] ss:$8 sps:$4 sm:$0xff]  }
   0xe   :  { %v1254_v39 = vld [vmem:[%s1864_s1 + $0xd4] ss:$8 sps:$4 sm:$0xff]   ;;  %v1253_v40 = vld [vmem:[%s1864_s1 + $0x1e0] ss:$8 sps:$4 sm:$0xff]   ;;  %v1256_v42 = vld [vmem:[%s1864_s1 + $0xd0] ss:$8 sps:$4 sm:$0xff]  }
   0xf   :  { %639 = vmatpush1.bf16.msra.mxu0 %v1214_v14  ;;  %v1257_v41 = vld [vmem:[%s1864_s1 + $0x1d4] ss:$8 sps:$4 sm:$0xff]   ;;  %v1260_v43 = vld [vmem:[%s1864_s1 + $0xc4] ss:$8 sps:$4 sm:$0xff]   ;;  %v1259_v44 = vld [vmem:[%s1864_s1 + $0x1d0] ss:$8 sps:$4 sm:$0xff]  }
  0x10   :  { %640 = vmatprep.subr.bf16.mxu0 %v1218_v15  ;;  %680 = vmatpush1.bf16.msra.mxu1 %v1217_v16  ;;  %v1263_v45 = vld [vmem:[%s1864_s1 + $0x1c4] ss:$8 sps:$4 sm:$0xff]   ;;  %v1262_v47 = vld [vmem:[%s1864_s1 + $0xc0] ss:$8 sps:$4 sm:$0xff]   ;;  %v1266_v49 = vld [vmem:[%s1864_s1 + $0xb4] ss:$8 sps:$4 sm:$0xff]  }
  0x11   :  { %681 = vmatprep.subr.bf16.mxu1 %v1221_v17  ;;  %v33_v46 = vld [vmem:[%s1865_s0 + $0x8] sm:$0xff]  ;;  %v35_v50 = vld [vmem:[%s1865_s0 + $0x18] sm:$0xff]  ;;  %v32_v4 = vld [vmem:[%s1865_s0] sm:$0xff] }
  0x12   :  { %v135_v48 = vpack.c.bf16 %v33_v46, %v33_v46  ;;  %v1265_v51 = vld [vmem:[%s1864_s1 + $0x1c0] ss:$8 sps:$4 sm:$0xff]   ;;  %v137_v52 = vpack.c.bf16 %v35_v50, %v35_v50  ;;  %v1269_v53 = vld [vmem:[%s1864_s1 + $0x1b4] ss:$8 sps:$4 sm:$0xff]   ;;  %v1268_v54 = vld [vmem:[%s1864_s1 + $0xb0] ss:$8 sps:$4 sm:$0xff]   ;;  %v134_v7 = vpack.c.bf16 %v32_v4, %v32_v4 }
  0x13   :  { %641 = vmatpush1.bf16.msra.mxu0 %v1220_v18  ;;  %v1272_v55 = vld [vmem:[%s1864_s1 + $0xa4] ss:$8 sps:$4 sm:$0xff]   ;;  %v1271_v56 = vld [vmem:[%s1864_s1 + $0x1b0] ss:$8 sps:$4 sm:$0xff]   ;;  %v1274_v58 = vld [vmem:[%s1864_s1 + $0xa0] ss:$8 sps:$4 sm:$0xff]  }
  0x14   :  { %642 = vmatprep.subr.bf16.mxu0 %v1224_v19  ;;  %682 = vmatpush1.bf16.msra.mxu1 %v1223_v20  ;;  %v1275_v57 = vld [vmem:[%s1864_s1 + $0x1a4] ss:$8 sps:$4 sm:$0xff]   ;;  %v1278_v59 = vld [vmem:[%s1864_s1 + $0x94] ss:$8 sps:$4 sm:$0xff]   ;;  %v1277_v60 = vld [vmem:[%s1864_s1 + $0x1a0] ss:$8 sps:$4 sm:$0xff]  }
  0x15   :  { %683 = vmatprep.subr.bf16.mxu1 %v1227_v21  ;;  %664 = vmatprep.mubr.bf16.mxu0 %v135_v48  ;;  %v1281_v61 = vld [vmem:[%s1864_s1 + $0x194] ss:$8 sps:$4 sm:$0xff]   ;;  %v1280_v62 = vld [vmem:[%s1864_s1 + $0x90] ss:$8 sps:$4 sm:$0xff]   ;;  %v1284_v63 = vld [vmem:[%s1864_s1 + $0x84] ss:$8 sps:$4 sm:$0xff]  }
  0x16   :  { %705 = vmatprep.mubr.bf16.mxu1 %v137_v52  ;;  %v1283_v0 = vld [vmem:[%s1864_s1 + $0x190] ss:$8 sps:$4 sm:$0xff]   ;;  %v1286_v1 = vld [vmem:[%s1864_s1 + $0x80] ss:$8 sps:$4 sm:$0xff]   ;;  %v1287_v2 = vld [vmem:[%s1864_s1 + $0x184] ss:$8 sps:$4 sm:$0xff]  }
  0x17   :  { %643 = vmatpush1.bf16.msra.mxu0 %v1226_v22  ;;  %v1289_v3 = vld [vmem:[%s1864_s1 + $0x180] ss:$8 sps:$4 sm:$0xff]   ;;  %v1292_v5 = vld [vmem:[%s1864_s1 + $0x274] ss:$8 sps:$4 sm:$0xff]   ;;  %v1290_v8 = vld [vmem:[%s1864_s1 + $0x270] ss:$8 sps:$4 sm:$0xff]  }
  0x18   :  { %644 = vmatprep.subr.bf16.mxu0 %v1230_v23  ;;  %684 = vmatpush1.bf16.msra.mxu1 %v1229_v24  ;;  %v34_v6 = vld [vmem:[%s1865_s0 + $0x10] sm:$0xff]  ;;  %v1295_v10 = vld [vmem:[%s1864_s1 + $0x264] ss:$8 sps:$4 sm:$0xff]   ;;  %v1293_v13 = vld [vmem:[%s1864_s1 + $0x260] ss:$8 sps:$4 sm:$0xff]  }
  0x19   :  { %685 = vmatprep.subr.bf16.mxu1 %v1233_v25  ;;  %v136_v9 = vpack.c.bf16 %v34_v6, %v34_v6  ;;  %v37_v11 = vld [vmem:[%s1865_s0 + $0x28] sm:$0xff]  ;;  %v1298_v14 = vld [vmem:[%s1864_s1 + $0x254] ss:$8 sps:$4 sm:$0xff]   ;;  %v1296_v15 = vld [vmem:[%s1864_s1 + $0x250] ss:$8 sps:$4 sm:$0xff]  }
  0x1a   :  { %v139_v12 = vpack.c.bf16 %v37_v11, %v37_v11  ;;  %v1301_v16 = vld [vmem:[%s1864_s1 + $0x244] ss:$8 sps:$4 sm:$0xff]   ;;  %v1299_v17 = vld [vmem:[%s1864_s1 + $0x240] ss:$8 sps:$4 sm:$0xff]   ;;  %v1304_v18 = vld [vmem:[%s1864_s1 + $0x234] ss:$8 sps:$4 sm:$0xff]  }
  0x1b   :  { %645 = vmatpush1.bf16.msra.mxu0 %v1232_v26  ;;  %v1302_v19 = vld [vmem:[%s1864_s1 + $0x230] ss:$8 sps:$4 sm:$0xff]   ;;  %v1307_v20 = vld [vmem:[%s1864_s1 + $0x224] ss:$8 sps:$4 sm:$0xff]   ;;  %v1305_v21 = vld [vmem:[%s1864_s1 + $0x220] ss:$8 sps:$4 sm:$0xff]  }
  0x1c   :  { %646 = vmatprep.subr.bf16.mxu0 %v1236_v27  ;;  %686 = vmatpush1.bf16.msra.mxu1 %v1235_v28  ;;  %v1310_v22 = vld [vmem:[%s1864_s1 + $0x214] ss:$8 sps:$4 sm:$0xff]   ;;  %v1308_v23 = vld [vmem:[%s1864_s1 + $0x210] ss:$8 sps:$4 sm:$0xff]   ;;  %v1313_v24 = vld [vmem:[%s1864_s1 + $0x204] ss:$8 sps:$4 sm:$0xff]  }
  0x1d   :  { %687 = vmatprep.subr.bf16.mxu1 %v1239_v29  ;;  %v1311_v25 = vld [vmem:[%s1864_s1 + $0x200] ss:$8 sps:$4 sm:$0xff]   ;;  %v1316_v26 = vld [vmem:[%s1864_s1 + $0x2f4] ss:$8 sps:$4 sm:$0xff]   ;;  %v1314_v27 = vld [vmem:[%s1864_s1 + $0x2f0] ss:$8 sps:$4 sm:$0xff]  }
  0x1e   :  { %v1319_v28 = vld [vmem:[%s1864_s1 + $0x2e4] ss:$8 sps:$4 sm:$0xff]   ;;  %v1317_v29 = vld [vmem:[%s1864_s1 + $0x2e0] ss:$8 sps:$4 sm:$0xff]   ;;  %v1346_v48 = vld [vmem:[%s1866_s3 + $0x54] ss:$8 sps:$4 sm:$0xff]  }
  0x1f   :  { %647 = vmatpush1.bf16.msra.mxu0 %v1238_v30  ;;  %v1322_v30 = vld [vmem:[%s1864_s1 + $0x2d4] ss:$8 sps:$4 sm:$0xff]   ;;  %v1343_v46 = vld [vmem:[%s1866_s3 + $0x64] ss:$8 sps:$4 sm:$0xff]   ;;  %v1383_v11 = vld [vmem:[%s1866_s3 + $0x80] ss:$8 sps:$4 sm:$0xff]  }
  0x20   :  { %648 = vmatprep.subr.bf16.mxu0 %v1242_v31  ;;  %688 = vmatpush1.bf16.msra.mxu1 %v1241_v32  ;;  %v1320_v31 = vld [vmem:[%s1864_s1 + $0x2d0] ss:$8 sps:$4 sm:$0xff]   ;;  %v1325_v32 = vld [vmem:[%s1864_s1 + $0x2c4] ss:$8 sps:$4 sm:$0xff]   ;;  %v1352_v52 = vld [vmem:[%s1866_s3 + $0x34] ss:$8 sps:$4 sm:$0xff]  }
  0x21   :  { %689 = vmatprep.subr.bf16.mxu1 %v1245_v33  ;;  %v1323_v33 = vld [vmem:[%s1864_s1 + $0x2c0] ss:$8 sps:$4 sm:$0xff]   ;;  %v1349_v50 = vld [vmem:[%s1866_s3 + $0x44] ss:$8 sps:$4 sm:$0xff]   ;;  %v1376_v4 = vld [vmem:[%s1866_s3 + $0xb4] ss:$8 sps:$4 sm:$0xff]  }
  0x22   :  { %v1379_v6 = vld [vmem:[%s1866_s3 + $0xa4] ss:$8 sps:$4 sm:$0xff]  }
  0x23   :  { %649 = vmatpush2.bf16.msra.mxu0 %v1244_v34  ;;  %v1328_v34 = vld [vmem:[%s1864_s1 + $0x2b4] ss:$8 sps:$4 sm:$0xff]  }
  0x24   :  { %650 = vmatprep.subr.bf16.mxu0 %v1248_v35  ;;  %690 = vmatpush2.bf16.msra.mxu1 %v1247_v36  ;;  %v1326_v35 = vld [vmem:[%s1864_s1 + $0x2b0] ss:$8 sps:$4 sm:$0xff]   ;;  %v1331_v36 = vld [vmem:[%s1864_s1 + $0x2a4] ss:$8 sps:$4 sm:$0xff]  }
  0x25   :  { %691 = vmatprep.subr.bf16.mxu1 %v1251_v37  ;;  %v1329_v37 = vld [vmem:[%s1864_s1 + $0x2a0] ss:$8 sps:$4 sm:$0xff]  }
  0x27   :  { %651 = vmatpush2.bf16.msra.mxu0 %v1250_v38  ;;  %v1334_v38 = vld [vmem:[%s1864_s1 + $0x294] ss:$8 sps:$4 sm:$0xff]  }
  0x28   :  { %652 = vmatprep.subr.bf16.mxu0 %v1254_v39  ;;  %692 = vmatpush2.bf16.msra.mxu1 %v1253_v40  ;;  %v1332_v39 = vld [vmem:[%s1864_s1 + $0x290] ss:$8 sps:$4 sm:$0xff]   ;;  %v1337_v40 = vld [vmem:[%s1864_s1 + $0x284] ss:$8 sps:$4 sm:$0xff]  }
  0x29   :  { %693 = vmatprep.subr.bf16.mxu1 %v1257_v41  ;;  %v1335_v41 = vld [vmem:[%s1864_s1 + $0x280] ss:$8 sps:$4 sm:$0xff]  }
  0x2b   :  { %653 = vmatpush2.bf16.msra.mxu0 %v1256_v42  ;;  %v36_v42 = vld [vmem:[%s1865_s0 + $0x20] sm:$0xff] }
  0x2c   :  { %654 = vmatprep.subr.bf16.mxu0 %v1260_v43  ;;  %694 = vmatpush2.bf16.msra.mxu1 %v1259_v44  ;;  %v138_v43 = vpack.c.bf16 %v36_v42, %v36_v42  ;;  %v1338_v44 = vld [vmem:[%s1866_s3 + $0x70] ss:$8 sps:$4 sm:$0xff]   ;;  %v1004_v42 = vld [vmem:[%s1870_s7] sm:$0x3] }
  0x2d   :  { %695 = vmatprep.subr.bf16.mxu1 %v1263_v45  ;;  %v1340_v45 = vld [vmem:[%s1866_s3 + $0x74] ss:$8 sps:$4 sm:$0xff]  }
  0x2f   :  { %655 = vmatpush2.bf16.msra.mxu0 %v1262_v47  ;;  %v1341_v47 = vld [vmem:[%s1866_s3 + $0x60] ss:$8 sps:$4 sm:$0xff]  }
  0x30   :  { %656 = vmatprep.subr.bf16.mxu0 %v1266_v49  ;;  %696 = vmatpush2.bf16.msra.mxu1 %v1265_v51  ;;  %v1344_v49 = vld [vmem:[%s1866_s3 + $0x50] ss:$8 sps:$4 sm:$0xff]   ;;  %v1347_v51 = vld [vmem:[%s1866_s3 + $0x40] ss:$8 sps:$4 sm:$0xff]  }
  0x31   :  { %697 = vmatprep.subr.bf16.mxu1 %v1269_v53  ;;  %v1350_v53 = vld [vmem:[%s1866_s3 + $0x30] ss:$8 sps:$4 sm:$0xff]  }
  0x33   :  { %657 = vmatpush2.bf16.msra.mxu0 %v1268_v54  ;;  %v1355_v54 = vld [vmem:[%s1866_s3 + $0x24] ss:$8 sps:$4 sm:$0xff]  }
  0x34   :  { %658 = vmatprep.subr.bf16.mxu0 %v1272_v55  ;;  %698 = vmatpush2.bf16.msra.mxu1 %v1271_v56  ;;  %v1353_v55 = vld [vmem:[%s1866_s3 + $0x20] ss:$8 sps:$4 sm:$0xff]   ;;  %v1358_v56 = vld [vmem:[%s1866_s3 + $0x14] ss:$8 sps:$4 sm:$0xff]  }
  0x35   :  { %699 = vmatprep.subr.bf16.mxu1 %v1275_v57  ;;  %v1356_v57 = vld [vmem:[%s1866_s3 + $0x10] ss:$8 sps:$4 sm:$0xff]  }
  0x37   :  { %659 = vmatpush2.bf16.msra.mxu0 %v1274_v58  ;;  %v1361_v58 = vld [vmem:[%s1866_s3 + $0x4] ss:$8 sps:$4 sm:$0xff]  }
  0x38   :  { %660 = vmatprep.subr.bf16.mxu0 %v1278_v59  ;;  %700 = vmatpush2.bf16.msra.mxu1 %v1277_v60  ;;  %v1359_v59 = vld [vmem:[%s1866_s3] ss:$8 sps:$4 sm:$0xff]   ;;  %v1364_v60 = vld [vmem:[%s1866_s3 + $0xf4] ss:$8 sps:$4 sm:$0xff]  }
  0x39   :  { %701 = vmatprep.subr.bf16.mxu1 %v1281_v61  ;;  %v1362_v61 = vld [vmem:[%s1866_s3 + $0xf0] ss:$8 sps:$4 sm:$0xff]  }
  0x3b   :  { %661 = vmatpush2.bf16.msra.mxu0 %v1280_v62  ;;  %v1367_v62 = vld [vmem:[%s1866_s3 + $0xe4] ss:$8 sps:$4 sm:$0xff]  }
  0x3c   :  { %662 = vmatprep.subr.bf16.mxu0 %v1284_v63  ;;  %702 = vmatpush2.bf16.msra.mxu1 %v1283_v0  ;;  %v1365_v63 = vld [vmem:[%s1866_s3 + $0xe0] ss:$8 sps:$4 sm:$0xff]   ;;  %v1370_v0 = vld [vmem:[%s1866_s3 + $0xd4] ss:$8 sps:$4 sm:$0xff]  }
  0x3d   :  { %703 = vmatprep.subr.bf16.mxu1 %v1287_v2  ;;  %v1373_v2 = vld [vmem:[%s1866_s3 + $0xc4] ss:$8 sps:$4 sm:$0xff]  }
  0x3f   :  { %663 = vmatpush2.bf16.msra.mxu0 %v1286_v1  ;;  %v1368_v1 = vld [vmem:[%s1866_s3 + $0xd0] ss:$8 sps:$4 sm:$0xff]  }
  0x40   :  { %714 = vmatprep.subr.bf16.mxu0 %v1292_v5  ;;  %704 = vmatpush2.bf16.msra.mxu1 %v1289_v3  ;;  %v1371_v3 = vld [vmem:[%s1866_s3 + $0xc0] ss:$8 sps:$4 sm:$0xff]   ;;  %v1374_v5 = vld [vmem:[%s1866_s3 + $0xb0] ss:$8 sps:$4 sm:$0xff]  }
  0x41   :  { %961 = vmatprep.subr.bf16.mxu1 %v1340_v45 }
  0x42   :  { %665 = vmatmul.mubr.bf16.vlgmr.msra.gmra.mxu0 %v134_v7  ;;  %v1377_v7 = vld [vmem:[%s1866_s3 + $0xa0] ss:$8 sps:$4 sm:$0xff]  }
  0x43   :  { %715 = vmatpush1.bf16.msra.mxu0 %v1290_v8  ;;  %706 = vmatmul.mubr.bf16.vlgmr.msra.gmra.mxu1 %v136_v9  ;;  %v1382_v8 = vld [vmem:[%s1866_s3 + $0x94] ss:$8 sps:$4 sm:$0xff]   ;;  %v1380_v9 = vld [vmem:[%s1866_s3 + $0x90] ss:$8 sps:$4 sm:$0xff]  }
  0x44   :  { %716 = vmatprep.subr.bf16.mxu0 %v1295_v10  ;;  %746 = vmatprep.mubr.bf16.mxu0 %v139_v12  ;;  %v1385_v10 = vld [vmem:[%s1866_s3 + $0x84] ss:$8 sps:$4 sm:$0xff]  }
  0x45   :  { %962 = vmatpush1.bf16.msra.mxu1 %v1338_v44 }
  0x46   :  { %963 = vmatprep.subr.bf16.mxu1 %v1343_v46 }
  0x47   :  { %717 = vmatpush1.bf16.msra.mxu0 %v1293_v13 }
  0x48   :  { %718 = vmatprep.subr.bf16.mxu0 %v1298_v14 }
  0x49   :  { %964 = vmatpush1.bf16.msra.mxu1 %v1341_v47 }
  0x4a   :  { %965 = vmatprep.subr.bf16.mxu1 %v1346_v48  ;;  %v1002_v48 = vld [vmem:[%s1871_s5] sm:$0x3] }
  0x4b   :  { %719 = vmatpush1.bf16.msra.mxu0 %v1296_v15 }
  0x4c   :  { %720 = vmatprep.subr.bf16.mxu0 %v1301_v16 }
  0x4d   :  { %966 = vmatpush1.bf16.msra.mxu1 %v1344_v49 }
  0x4e   :  { %967 = vmatprep.subr.bf16.mxu1 %v1349_v50 }
  0x4f   :  { %721 = vmatpush1.bf16.msra.mxu0 %v1299_v17 }
  0x50   :  { %722 = vmatprep.subr.bf16.mxu0 %v1304_v18 }
  0x51   :  { %968 = vmatpush1.bf16.msra.mxu1 %v1347_v51 }
  0x52   :  { %969 = vmatprep.subr.bf16.mxu1 %v1352_v52  ;;  %v1003_v52 = vld [vmem:[%s1872_s6] sm:$0x3] }
  0x53   :  { %723 = vmatpush1.bf16.msra.mxu0 %v1302_v19 }
  0x54   :  { %724 = vmatprep.subr.bf16.mxu0 %v1307_v20  ;;  %v142_v20 = vlaneseq }
  0x55   :  { %970 = vmatpush1.bf16.msra.mxu1 %v1350_v53 }
  0x56   :  { %971 = vmatprep.subr.bf16.mxu1 %v1355_v54 }
  0x57   :  { %725 = vmatpush1.bf16.msra.mxu0 %v1305_v21  ;;  %v143_v21 = vshrl.u32 %v142_v20, 7 }
  0x58   :  { %726 = vmatprep.subr.bf16.mxu0 %v1310_v22 }
  0x59   :  { %972 = vmatpush1.bf16.msra.mxu1 %v1353_v55  ;;  %v144_v22 = vsub.s32 0, %v143_v21 }
  0x5a   :  { %973 = vmatprep.subr.bf16.mxu1 %v1358_v56 }
  0x5b   :  { %727 = vmatpush1.bf16.msra.mxu0 %v1308_v23  ;;  %v140_v23 = vld [vmem:[%s1867_s2] sm:$0x3]  ;;  %v1010_v45 = vrot.slane %v1004_v42, %v144_v22  ;;  %v1038_v55 = vrot.slane %v1002_v48, %v144_v22 }
  0x5c   :  { %728 = vmatprep.subr.bf16.mxu0 %v1313_v24  ;;  %v148_v24 = vsub.s32 1, %v143_v21 }
  0x5d   :  { %974 = vmatpush1.bf16.msra.mxu1 %v1356_v57 }
  0x5e   :  { %975 = vmatprep.subr.bf16.mxu1 %v1361_v58  ;;  %v1014_v51 = vrot.slane %v1004_v42, %v148_v24 }
  0x5f   :  { %729 = vmatpush1.bf16.msra.mxu0 %v1311_v25  ;;  %v145_v25 = vrot.slane %v140_v23, %v144_v22 }
  0x60   :  { %730 = vmatprep.subr.bf16.mxu0 %v1316_v26  ;;  %v149_v26 = vrot.slane %v140_v23, %v148_v24 }
  0x61   :  { %976 = vmatpush1.bf16.msra.mxu1 %v1359_v59 }
  0x62   :  { %977 = vmatprep.subr.bf16.mxu1 %v1364_v60  ;;  %v1051_v60 = vrot.slane %v1003_v52, %v144_v22 }
  0x63   :  { %731 = vmatpush2.bf16.msra.mxu0 %v1314_v27 }
  0x64   :  { %732 = vmatprep.subr.bf16.mxu0 %v1319_v28 }
  0x65   :  { %978 = vmatpush2.bf16.msra.mxu1 %v1362_v61 }
  0x66   :  { %979 = vmatprep.subr.bf16.mxu1 %v1367_v62  ;;  %v1042_v62 = vrot.slane %v1002_v48, %v148_v24 }
  0x67   :  { %733 = vmatpush2.bf16.msra.mxu0 %v1317_v29 }
  0x68   :  { %734 = vmatprep.subr.bf16.mxu0 %v1322_v30 }
  0x69   :  { %980 = vmatpush2.bf16.msra.mxu1 %v1365_v63 }
  0x6a   :  { %981 = vmatprep.subr.bf16.mxu1 %v1370_v0 }
  0x6b   :  { %735 = vmatpush2.bf16.msra.mxu0 %v1320_v31 }
  0x6c   :  { %736 = vmatprep.subr.bf16.mxu0 %v1325_v32 }
  0x6d   :  { %982 = vmatpush2.bf16.msra.mxu1 %v1368_v1 }
  0x6e   :  { %983 = vmatprep.subr.bf16.mxu1 %v1373_v2  ;;  %v1055_v2 = vrot.slane %v1003_v52, %v148_v24 }
  0x6f   :  { %737 = vmatpush2.bf16.msra.mxu0 %v1323_v33 }
  0x70   :  { %738 = vmatprep.subr.bf16.mxu0 %v1328_v34 }
  0x71   :  { %984 = vmatpush2.bf16.msra.mxu1 %v1371_v3 }
  0x72   :  { %985 = vmatprep.subr.bf16.mxu1 %v1376_v4 }
  0x73   :  { %739 = vmatpush2.bf16.msra.mxu0 %v1326_v35 }
  0x74   :  { %740 = vmatprep.subr.bf16.mxu0 %v1331_v36 }
  0x75   :  { %986 = vmatpush2.bf16.msra.mxu1 %v1374_v5 }
  0x76   :  { %987 = vmatprep.subr.bf16.mxu1 %v1379_v6 }
  0x77   :  { %741 = vmatpush2.bf16.msra.mxu0 %v1329_v37 }
  0x78   :  { %742 = vmatprep.subr.bf16.mxu0 %v1334_v38 }
  0x79   :  { %988 = vmatpush2.bf16.msra.mxu1 %v1377_v7 }
  0x7a   :  { %989 = vmatprep.subr.bf16.mxu1 %v1382_v8 }
  0x7b   :  { %743 = vmatpush2.bf16.msra.mxu0 %v1332_v39  ;;  %v1005_v39 = vld [vmem:[%s1868_s8] sm:$0x3] }
  0x7c   :  { %744 = vmatprep.subr.bf16.mxu0 %v1337_v40  ;;  %v1019_v40 = vadd.f32 1e-05, %v1005_v39 }
  0x7d   :  { %990 = vmatpush2.bf16.msra.mxu1 %v1380_v9 }
  0x7e   :  { %991 = vmatprep.subr.bf16.mxu1 %v1385_v10  ;;  %1386 = vrsqrt.f32 %v1019_v40 }
  0x7f   :  { %745 = vmatpush2.bf16.msra.mxu0 %v1335_v41  ;;  %v789_v41 = vld [vmem:[%s1869_s4] sm:$0x3] }
  0x80   :  { %v798_v46 = vrot.slane %v789_v41, %v148_v24 }
  0x81   :  { %992 = vmatpush2.bf16.msra.mxu1 %v1383_v11 }
  0x82   :  { %747 = vmatmul.mubr.bf16.vlgmr.msra.gmra.mxu0 %v138_v43  ;;  %v794_v43 = vrot.slane %v789_v41, %v144_v22 }
  0x8b   :  { %v1387_v44 = vpop.eup %1386 }
  0x8c   :  { %v1025_v50 = vrot.slane %v1387_v44, %v144_v22  ;;  %v1029_v57 = vrot.slane %v1387_v44, %v148_v24 }
 0x102   :  { %v666_v12 = vpop.f32.mrf.mxu0 }
 0x103   :  { %v707_v14 = vpop.f32.mrf.mxu1  ;;  %v667_v27 = vadd.f32 %v666_v12, %v145_v25 }
 0x104   :  { %v668_v13 = vpop.f32.mrf.mxu0 }
 0x105   :  { %v709_v16 = vpop.f32.mrf.mxu1  ;;  %v669_v28 = vadd.f32 %v668_v13, %v149_v26  ;;  %v708_v29 = vadd.f32 %v707_v14, %v667_v27 }
 0x106   :  { %v670_v15 = vpop.f32.mrf.mxu0 }
 0x107   :  { %v711_v18 = vpop.f32.mrf.mxu1  ;;  %v710_v31 = vadd.f32 %v709_v16, %v669_v28 }
 0x108   :  { %v671_v17 = vpop.f32.mrf.mxu0 }
 0x109   :  { %v712_v19 = vpop.f32.mrf.mxu1 }
 0x142   :  { %v748_v30 = vpop.f32.mrf.mxu0 }
 0x143   :  { %v749_v32 = vadd.f32 %v748_v30, %v708_v29 }
 0x144   :  { %v750_v33 = vpop.f32.mrf.mxu0 }
 0x145   :  { %v751_v34 = vadd.f32 %v750_v33, %v710_v31  ;;  %v787_v37 = vpack.c.bf16 %v749_v32, %v749_v32 }
 0x146   :  { %v752_v35 = vpop.f32.mrf.mxu0 }
 0x147   :  { %v788_v36 = vpack.c.bf16 %v751_v34, %v751_v34 }
 0x148   :  { %v753_v38 = vpop.f32.mrf.mxu0 }
 0x149   :  { %993 = vmatprep.mubr.bf16.mxu1 %v788_v36 }
 0x14a   :  { %994 = vmatmul.mubr.bf16.vlgmr.msra.gmra.mxu1 %v787_v37 }
 0x20a   :  { %v995_v47 = vpop.f32.mrf.mxu1 }
 0x20b   :  { %v996_v49 = vadd.f32 %v995_v47, %v794_v43 }
 0x20c   :  { %v997_v53 = vpop.f32.mrf.mxu1 }
 0x20d   :  { %v1017_v54 = vsub.f32 %v996_v49, %v1010_v45  ;;  %v998_v56 = vadd.f32 %v997_v53, %v798_v46 }
 0x20e   :  { %v999_v58 = vpop.f32.mrf.mxu1 }
 0x20f   :  { %v1032_v59 = vmul.f32 %v1025_v50, %v1017_v54  ;;  %v1018_v61 = vsub.f32 %v998_v56, %v1014_v51 }
 0x210   :  { %v1000_v63 = vpop.f32.mrf.mxu1 }
 0x211   :  { %v1045_v0 = vmul.f32 %v1038_v55, %v1032_v59  ;;  %v1033_v1 = vmul.f32 %v1029_v57, %v1018_v61 }
 0x213   :  { %v1058_v3 = vadd.f32 %v1051_v60, %v1045_v0  ;;  %v1046_v4 = vmul.f32 %v1042_v62, %v1033_v1 }
 0x215   :  { %1060 = vst [vmem:[%s1873_s9] sm:$0xff] %v1058_v3  ;;  %v1059_v5 = vadd.f32 %v1055_v2, %v1046_v4 }
 0x217   :  { %1061 = vst [vmem:[%s1873_s9 + $0x8] sm:$0xff] %v1059_v5 }

// kernel: _forward_core.13
= control target key start
LH: loop header
LB: loop body
LE: loop exit
PB: predicated region body
PF: predicated region fallthrough
CT: control target
= control target key end

     0   :  { %s2350_s0 = inlined_call_operand.vmem [shape: f32[2,256], index: 0, kind: input, shape index: {}]   ;;  %s2351_s1 = inlined_call_operand.vmem [shape: bf16[256,256], index: 1, kind: input, shape index: {}]   ;;  %s2352_s2 = inlined_call_operand.vmem [shape: f32[1,256], index: 2, kind: input, shape index: {}]   ;;  %s2353_s3 = inlined_call_operand.vmem [shape: f32[1,256], index: 3, kind: input, shape index: {}]   ;;  %s2354_s4 = inlined_call_operand.vmem [shape: f32[1,256], index: 4, kind: input, shape index: {}]   ;;  %s2355_s5 = inlined_call_operand.vmem [shape: f32[1,256], index: 5, kind: input, shape index: {}]   ;;  %s2356_s6 = inlined_call_operand.vmem [shape: f32[1,256], index: 6, kind: input, shape index: {}]   ;;  %s2357_s7 = inlined_call_operand.vmem [shape: f32[2,256], index: 7, kind: input, shape index: {}]   ;;  %s2358_s8 = inlined_call_operand.vmem [shape: f32[2,256], index: 8, kind: input, shape index: {}]   ;;  %s2359_s9 = inlined_call_operand.vmem [shape: bf16[256,256], index: 9, kind: input, shape index: {}]   ;;  %s2360_s10 = inlined_call_operand.vmem [shape: bf16[256,256], index: 10, kind: input, shape index: {}]   ;;  %s2361_s11 = inlined_call_operand.vmem [shape: bf16[256,256], index: 11, kind: input, shape index: {}]   ;;  %s2362_s12 = inlined_call_operand.vmem [shape: f32[1,256], index: 12, kind: input, shape index: {}]   ;;  %s2363_s13 = inlined_call_operand.vmem [shape: f32[2,4,256], index: 13, kind: input, shape index: {}]   ;;  %s2364_s14 = inlined_call_operand.vmem [shape: f32[2,4,256], index: 14, kind: input, shape index: {}]   ;;  %s2365_s15 = inlined_call_operand.vmem [shape: f32[2,4,256], index: 15, kind: input, shape index: {}]   ;;  %s2366_s16 = inlined_call_operand.vmem [shape: s32[2,1], index: 16, kind: input, shape index: {}]   ;;  %s2367_s17 = inlined_call_operand.hbm [shape: f32[2,4], index: 17, kind: output, shape index: {0}]   ;;  %s2368_s18 = inlined_call_operand.hbm [shape: f32[1,1], index: 18, kind: output, shape index: {1}]  }
   0x1   :  { %2370 = sst [smem:[#allocation8_spill]] %s2350_s0 }
   0x2   :  { %2371 = sst [smem:[#allocation9_spill]] %s2351_s1 }
   0x3   :  { %2372 = sst [smem:[#allocation10_spill]] %s2352_s2 }
   0x4   :  { %24 = vsyncpa [#allocation3], 0  ;;  %s2373_s29 = sld [smem:[#allocation9_spill]]  ;;  %v1568_v16 = vld [vmem:[%s2360_s10 + $0x74] ss:$8 sps:$4 sm:$0xff]  }
   0x5   :  { %s2374_s30 = sld [smem:[#allocation8_spill]]  ;;  %v1570_v17 = vld [vmem:[%s2360_s10 + $0x70] ss:$8 sps:$4 sm:$0xff]   ;;  %617 = vmatprep.subr.bf16.mxu1 %v1568_v16  ;;  %v1574_v20 = vld [vmem:[%s2360_s10 + $0x64] ss:$8 sps:$4 sm:$0xff]  }
   0x6   :  { %618 = vmatpush1.bf16.msra.mxu1 %v1570_v17  ;;  %v1576_v21 = vld [vmem:[%s2360_s10 + $0x60] ss:$8 sps:$4 sm:$0xff]   ;;  %v1580_v24 = vld [vmem:[%s2360_s10 + $0x54] ss:$8 sps:$4 sm:$0xff]   ;;  %v1582_v25 = vld [vmem:[%s2360_s10 + $0x50] ss:$8 sps:$4 sm:$0xff]  }
   0x7   :  { %619 = vmatprep.subr.bf16.mxu1 %v1574_v20  ;;  %v1586_v26 = vld [vmem:[%s2360_s10 + $0x44] ss:$8 sps:$4 sm:$0xff]   ;;  %v1588_v29 = vld [vmem:[%s2360_s10 + $0x40] ss:$8 sps:$4 sm:$0xff]   ;;  %v1592_v30 = vld [vmem:[%s2360_s10 + $0x34] ss:$8 sps:$4 sm:$0xff]  }
   0x8   :  { %v1594_v33 = vld [vmem:[%s2360_s10 + $0x30] ss:$8 sps:$4 sm:$0xff]   ;;  %v1598_v34 = vld [vmem:[%s2360_s10 + $0x24] ss:$8 sps:$4 sm:$0xff]   ;;  %v1600_v37 = vld [vmem:[%s2360_s10 + $0x20] ss:$8 sps:$4 sm:$0xff]  }
   0x9   :  { %v1604_v38 = vld [vmem:[%s2360_s10 + $0x14] ss:$8 sps:$4 sm:$0xff]   ;;  %v1606_v41 = vld [vmem:[%s2360_s10 + $0x10] ss:$8 sps:$4 sm:$0xff]   ;;  %v1610_v42 = vld [vmem:[%s2360_s10 + $0x4] ss:$8 sps:$4 sm:$0xff]  }
   0xa   :  { %v1520_v0 = vld [vmem:[%s2373_s29 + $0x74] ss:$8 sps:$4 sm:$0xff]   ;;  %v1522_v1 = vld [vmem:[%s2373_s29 + $0x70] ss:$8 sps:$4 sm:$0xff]   ;;  %v1523_v2 = vld [vmem:[%s2373_s29 + $0x64] ss:$8 sps:$4 sm:$0xff]   ;;  %620 = vmatpush1.bf16.msra.mxu1 %v1576_v21 }
   0xb   :  { %278 = vmatprep.subr.bf16.mxu0 %v1520_v0  ;;  %v1525_v3 = vld [vmem:[%s2373_s29 + $0x60] ss:$8 sps:$4 sm:$0xff]   ;;  %v1526_v4 = vld [vmem:[%s2373_s29 + $0x54] ss:$8 sps:$4 sm:$0xff]   ;;  %v1528_v5 = vld [vmem:[%s2373_s29 + $0x50] ss:$8 sps:$4 sm:$0xff]   ;;  %621 = vmatprep.subr.bf16.mxu1 %v1580_v24 }
   0xc   :  { %279 = vmatpush1.bf16.msra.mxu0 %v1522_v1  ;;  %v1529_v6 = vld [vmem:[%s2373_s29 + $0x44] ss:$8 sps:$4 sm:$0xff]   ;;  %v1531_v7 = vld [vmem:[%s2373_s29 + $0x40] ss:$8 sps:$4 sm:$0xff]   ;;  %v1532_v8 = vld [vmem:[%s2373_s29 + $0x34] ss:$8 sps:$4 sm:$0xff]  }
   0xd   :  { %280 = vmatprep.subr.bf16.mxu0 %v1523_v2  ;;  %v1534_v9 = vld [vmem:[%s2373_s29 + $0x30] ss:$8 sps:$4 sm:$0xff]   ;;  %v1535_v10 = vld [vmem:[%s2373_s29 + $0x24] ss:$8 sps:$4 sm:$0xff]   ;;  %v1537_v11 = vld [vmem:[%s2373_s29 + $0x20] ss:$8 sps:$4 sm:$0xff]  }
   0xe   :  { %v1538_v12 = vld [vmem:[%s2373_s29 + $0x14] ss:$8 sps:$4 sm:$0xff]   ;;  %v1540_v13 = vld [vmem:[%s2373_s29 + $0x10] ss:$8 sps:$4 sm:$0xff]   ;;  %v1541_v18 = vld [vmem:[%s2373_s29 + $0x4] ss:$8 sps:$4 sm:$0xff]   ;;  %622 = vmatpush1.bf16.msra.mxu1 %v1582_v25 }
   0xf   :  { %v1909_v14 = vld.sshfl [vmem:[%s2374_s30] sm:$0x33 pattern:$0x76325410]  ;;  %v1544_v23 = vld [vmem:[%s2373_s29 + $0xf4] ss:$8 sps:$4 sm:$0xff]   ;;  %623 = vmatprep.subr.bf16.mxu1 %v1586_v26 }
  0x10   :  { %281 = vmatpush1.bf16.msra.mxu0 %v1525_v3  ;;  %v101_v15 = vcombine.high %v1909_v14, %v1909_v14  ;;  %v1543_v22 = vld [vmem:[%s2373_s29] ss:$8 sps:$4 sm:$0xff]   ;;  %v1546_v27 = vld [vmem:[%s2373_s29 + $0xf0] ss:$8 sps:$4 sm:$0xff]   ;;  %v1547_v28 = vld [vmem:[%s2373_s29 + $0xe4] ss:$8 sps:$4 sm:$0xff]   ;;  %v104_v60 = vpack.c.bf16 %v1909_v14, %v1909_v14 }
  0x11   :  { %282 = vmatprep.subr.bf16.mxu0 %v1526_v4  ;;  %v1549_v31 = vld [vmem:[%s2373_s29 + $0xe0] ss:$8 sps:$4 sm:$0xff]   ;;  %v1550_v32 = vld [vmem:[%s2373_s29 + $0xd4] ss:$8 sps:$4 sm:$0xff]   ;;  %v1552_v35 = vld [vmem:[%s2373_s29 + $0xd0] ss:$8 sps:$4 sm:$0xff]  }
  0x12   :  { %v105_v19 = vpack.c.bf16 %v101_v15, %v101_v15  ;;  %624 = vmatpush1.bf16.msra.mxu1 %v1588_v29  ;;  %v1553_v36 = vld [vmem:[%s2373_s29 + $0xc4] ss:$8 sps:$4 sm:$0xff]   ;;  %v1555_v39 = vld [vmem:[%s2373_s29 + $0xc0] ss:$8 sps:$4 sm:$0xff]   ;;  %v1556_v40 = vld [vmem:[%s2373_s29 + $0xb4] ss:$8 sps:$4 sm:$0xff]  }
  0x13   :  { %625 = vmatprep.subr.bf16.mxu1 %v1592_v30  ;;  %v1558_v43 = vld [vmem:[%s2373_s29 + $0xb0] ss:$8 sps:$4 sm:$0xff]   ;;  %v1559_v44 = vld [vmem:[%s2373_s29 + $0xa4] ss:$8 sps:$4 sm:$0xff]   ;;  %v1612_v45 = vld [vmem:[%s2360_s10] ss:$8 sps:$4 sm:$0xff]  }
  0x14   :  { %283 = vmatpush1.bf16.msra.mxu0 %v1528_v5  ;;  %310 = vmatprep.mubr.bf16.mxu0 %v105_v19  ;;  %v1616_v46 = vld [vmem:[%s2360_s10 + $0xf4] ss:$8 sps:$4 sm:$0xff]   ;;  %v1561_v47 = vld [vmem:[%s2373_s29 + $0xa0] ss:$8 sps:$4 sm:$0xff]   ;;  %v1564_v49 = vld [vmem:[%s2373_s29 + $0x90] ss:$8 sps:$4 sm:$0xff]  }
  0x15   :  { %284 = vmatprep.subr.bf16.mxu0 %v1529_v6  ;;  %v1562_v48 = vld [vmem:[%s2373_s29 + $0x94] ss:$8 sps:$4 sm:$0xff]   ;;  %v1618_v50 = vld [vmem:[%s2360_s10 + $0xf0] ss:$8 sps:$4 sm:$0xff]   ;;  %v1565_v51 = vld [vmem:[%s2373_s29 + $0x84] ss:$8 sps:$4 sm:$0xff]  }
  0x16   :  { %626 = vmatpush1.bf16.msra.mxu1 %v1594_v33  ;;  %v1622_v52 = vld [vmem:[%s2360_s10 + $0xe4] ss:$8 sps:$4 sm:$0xff]   ;;  %v1624_v53 = vld [vmem:[%s2360_s10 + $0xe0] ss:$8 sps:$4 sm:$0xff]   ;;  %v1628_v54 = vld [vmem:[%s2360_s10 + $0xd4] ss:$8 sps:$4 sm:$0xff]  }
  0x17   :  { %627 = vmatprep.subr.bf16.mxu1 %v1598_v34  ;;  %v1567_v55 = vld [vmem:[%s2373_s29 + $0x80] ss:$8 sps:$4 sm:$0xff]   ;;  %v1573_v56 = vld [vmem:[%s2359_s9 + $0x74] ss:$8 sps:$4 sm:$0xff]   ;;  %v1630_v57 = vld [vmem:[%s2360_s10 + $0xd0] ss:$8 sps:$4 sm:$0xff]  }
  0x18   :  { %285 = vmatpush1.bf16.msra.mxu0 %v1531_v7  ;;  %v1634_v58 = vld [vmem:[%s2360_s10 + $0xc4] ss:$8 sps:$4 sm:$0xff]   ;;  %v1571_v59 = vld [vmem:[%s2359_s9 + $0x70] ss:$8 sps:$4 sm:$0xff]   ;;  %v1636_v62 = vld [vmem:[%s2360_s10 + $0xc0] ss:$8 sps:$4 sm:$0xff]  }
  0x19   :  { %286 = vmatprep.subr.bf16.mxu0 %v1532_v8  ;;  %v1579_v61 = vld [vmem:[%s2359_s9 + $0x64] ss:$8 sps:$4 sm:$0xff]   ;;  %v1640_v63 = vld [vmem:[%s2360_s10 + $0xb4] ss:$8 sps:$4 sm:$0xff]   ;;  %v1577_v0 = vld [vmem:[%s2359_s9 + $0x60] ss:$8 sps:$4 sm:$0xff]  }
  0x1a   :  { %628 = vmatpush1.bf16.msra.mxu1 %v1600_v37  ;;  %v1585_v1 = vld [vmem:[%s2359_s9 + $0x54] ss:$8 sps:$4 sm:$0xff]  }
  0x1b   :  { %629 = vmatprep.subr.bf16.mxu1 %v1604_v38 }
  0x1c   :  { %287 = vmatpush1.bf16.msra.mxu0 %v1534_v9 }
  0x1d   :  { %288 = vmatprep.subr.bf16.mxu0 %v1535_v10 }
  0x1e   :  { %630 = vmatpush1.bf16.msra.mxu1 %v1606_v41 }
  0x1f   :  { %631 = vmatprep.subr.bf16.mxu1 %v1610_v42 }
  0x20   :  { %289 = vmatpush1.bf16.msra.mxu0 %v1537_v11 }
  0x21   :  { %290 = vmatprep.subr.bf16.mxu0 %v1538_v12 }
  0x22   :  { %632 = vmatpush1.bf16.msra.mxu1 %v1612_v45 }
  0x23   :  { %633 = vmatprep.subr.bf16.mxu1 %v1616_v46 }
  0x24   :  { %291 = vmatpush1.bf16.msra.mxu0 %v1540_v13 }
  0x25   :  { %292 = vmatprep.subr.bf16.mxu0 %v1541_v18 }
  0x26   :  { %634 = vmatpush2.bf16.msra.mxu1 %v1618_v50 }
  0x27   :  { %635 = vmatprep.subr.bf16.mxu1 %v1622_v52 }
  0x28   :  { %293 = vmatpush1.bf16.msra.mxu0 %v1543_v22 }
  0x29   :  { %294 = vmatprep.subr.bf16.mxu0 %v1544_v23 }
  0x2a   :  { %636 = vmatpush2.bf16.msra.mxu1 %v1624_v53 }
  0x2b   :  { %637 = vmatprep.subr.bf16.mxu1 %v1628_v54 }
  0x2c   :  { %295 = vmatpush2.bf16.msra.mxu0 %v1546_v27 }
  0x2d   :  { %296 = vmatprep.subr.bf16.mxu0 %v1547_v28 }
  0x2e   :  { %638 = vmatpush2.bf16.msra.mxu1 %v1630_v57 }
  0x2f   :  { %639 = vmatprep.subr.bf16.mxu1 %v1634_v58 }
  0x30   :  { %297 = vmatpush2.bf16.msra.mxu0 %v1549_v31 }
  0x31   :  { %298 = vmatprep.subr.bf16.mxu0 %v1550_v32 }
  0x32   :  { %640 = vmatpush2.bf16.msra.mxu1 %v1636_v62 }
  0x33   :  { %641 = vmatprep.subr.bf16.mxu1 %v1640_v63 }
  0x34   :  { %299 = vmatpush2.bf16.msra.mxu0 %v1552_v35 }
  0x35   :  { %300 = vmatprep.subr.bf16.mxu0 %v1553_v36 }
  0x38   :  { %301 = vmatpush2.bf16.msra.mxu0 %v1555_v39 }
  0x39   :  { %302 = vmatprep.subr.bf16.mxu0 %v1556_v40 }
  0x3c   :  { %303 = vmatpush2.bf16.msra.mxu0 %v1558_v43 }
  0x3d   :  { %304 = vmatprep.subr.bf16.mxu0 %v1559_v44 }
  0x40   :  { %305 = vmatpush2.bf16.msra.mxu0 %v1561_v47 }
  0x41   :  { %306 = vmatprep.subr.bf16.mxu0 %v1562_v48 }
  0x44   :  { %307 = vmatpush2.bf16.msra.mxu0 %v1564_v49 }
  0x45   :  { %308 = vmatprep.subr.bf16.mxu0 %v1565_v51 }
  0x48   :  { %309 = vmatpush2.bf16.msra.mxu0 %v1567_v55 }
  0x49   :  { %818 = vmatprep.subr.bf16.mxu0 %v1573_v56 }
  0x4b   :  { %311 = vmatmul.mubr.bf16.vlgmr.msra.gmra.mxu0 %v104_v60 }
  0x4c   :  { %819 = vmatpush1.bf16.msra.mxu0 %v1571_v59 }
  0x4d   :  { %820 = vmatprep.subr.bf16.mxu0 %v1579_v61 }
  0x4e   :  { %25 = vsyncpa [#allocation5], 0  ;;  %v1583_v2 = vld [vmem:[%s2359_s9 + $0x50] ss:$8 sps:$4 sm:$0xff]   ;;  %v1591_v3 = vld [vmem:[%s2359_s9 + $0x44] ss:$8 sps:$4 sm:$0xff]   ;;  %v108_v43 = vlaneseq }
  0x4f   :  { %v1589_v4 = vld [vmem:[%s2359_s9 + $0x40] ss:$8 sps:$4 sm:$0xff]   ;;  %v1597_v5 = vld [vmem:[%s2359_s9 + $0x34] ss:$8 sps:$4 sm:$0xff]   ;;  %v1595_v6 = vld [vmem:[%s2359_s9 + $0x30] ss:$8 sps:$4 sm:$0xff]  }
  0x50   :  { %821 = vmatpush1.bf16.msra.mxu0 %v1577_v0  ;;  %v1603_v7 = vld [vmem:[%s2359_s9 + $0x24] ss:$8 sps:$4 sm:$0xff]   ;;  %v1601_v8 = vld [vmem:[%s2359_s9 + $0x20] ss:$8 sps:$4 sm:$0xff]   ;;  %v1609_v9 = vld [vmem:[%s2359_s9 + $0x14] ss:$8 sps:$4 sm:$0xff]  }
  0x51   :  { %822 = vmatprep.subr.bf16.mxu0 %v1585_v1  ;;  %v1607_v10 = vld [vmem:[%s2359_s9 + $0x10] ss:$8 sps:$4 sm:$0xff]   ;;  %v1615_v11 = vld [vmem:[%s2359_s9 + $0x4] ss:$8 sps:$4 sm:$0xff]   ;;  %v1613_v12 = vld [vmem:[%s2359_s9] ss:$8 sps:$4 sm:$0xff]  }
  0x52   :  { %v1621_v13 = vld [vmem:[%s2359_s9 + $0xf4] ss:$8 sps:$4 sm:$0xff]   ;;  %v1619_v14 = vld [vmem:[%s2359_s9 + $0xf0] ss:$8 sps:$4 sm:$0xff]   ;;  %v1627_v15 = vld [vmem:[%s2359_s9 + $0xe4] ss:$8 sps:$4 sm:$0xff]  }
  0x53   :  { %v1625_v16 = vld [vmem:[%s2359_s9 + $0xe0] ss:$8 sps:$4 sm:$0xff]   ;;  %v1633_v17 = vld [vmem:[%s2359_s9 + $0xd4] ss:$8 sps:$4 sm:$0xff]   ;;  %v1631_v18 = vld [vmem:[%s2359_s9 + $0xd0] ss:$8 sps:$4 sm:$0xff]  }
  0x54   :  { %823 = vmatpush1.bf16.msra.mxu0 %v1583_v2  ;;  %v1639_v19 = vld [vmem:[%s2359_s9 + $0xc4] ss:$8 sps:$4 sm:$0xff]   ;;  %v1637_v20 = vld [vmem:[%s2359_s9 + $0xc0] ss:$8 sps:$4 sm:$0xff]   ;;  %v1642_v21 = vld [vmem:[%s2360_s10 + $0xb0] ss:$8 sps:$4 sm:$0xff]  }
  0x55   :  { %824 = vmatprep.subr.bf16.mxu0 %v1591_v3  ;;  %v1645_v22 = vld [vmem:[%s2359_s9 + $0xb4] ss:$8 sps:$4 sm:$0xff]   ;;  %v1643_v23 = vld [vmem:[%s2359_s9 + $0xb0] ss:$8 sps:$4 sm:$0xff]   ;;  %642 = vmatpush2.bf16.msra.mxu1 %v1642_v21  ;;  %v1646_v24 = vld [vmem:[%s2360_s10 + $0xa4] ss:$8 sps:$4 sm:$0xff]  }
  0x56   :  { %v1648_v25 = vld [vmem:[%s2360_s10 + $0xa0] ss:$8 sps:$4 sm:$0xff]   ;;  %v1651_v26 = vld [vmem:[%s2359_s9 + $0xa4] ss:$8 sps:$4 sm:$0xff]   ;;  %643 = vmatprep.subr.bf16.mxu1 %v1646_v24  ;;  %v1652_v28 = vld [vmem:[%s2360_s10 + $0x94] ss:$8 sps:$4 sm:$0xff]  }
  0x57   :  { %v1649_v27 = vld [vmem:[%s2359_s9 + $0xa0] ss:$8 sps:$4 sm:$0xff]   ;;  %v1654_v29 = vld [vmem:[%s2360_s10 + $0x90] ss:$8 sps:$4 sm:$0xff]   ;;  %v1657_v31 = vld [vmem:[%s2359_s9 + $0x94] ss:$8 sps:$4 sm:$0xff]  }
  0x58   :  { %825 = vmatpush1.bf16.msra.mxu0 %v1589_v4  ;;  %v1655_v30 = vld [vmem:[%s2359_s9 + $0x90] ss:$8 sps:$4 sm:$0xff]   ;;  %v1658_v32 = vld [vmem:[%s2360_s10 + $0x84] ss:$8 sps:$4 sm:$0xff]   ;;  %v1660_v33 = vld [vmem:[%s2360_s10 + $0x80] ss:$8 sps:$4 sm:$0xff]  }
  0x59   :  { %826 = vmatprep.subr.bf16.mxu0 %v1597_v5  ;;  %644 = vmatpush2.bf16.msra.mxu1 %v1648_v25  ;;  %v1663_v34 = vld [vmem:[%s2359_s9 + $0x84] ss:$8 sps:$4 sm:$0xff]   ;;  %v1661_v35 = vld [vmem:[%s2359_s9 + $0x80] ss:$8 sps:$4 sm:$0xff]   ;;  %v1666_v39 = vld [vmem:[%s2361_s11 + $0x74] ss:$8 sps:$4 sm:$0xff]  }
  0x5a   :  { %645 = vmatprep.subr.bf16.mxu1 %v1652_v28  ;;  %v1412_v36 = vld.sshfl [vmem:[%s2357_s7] sm:$0x33 pattern:$0x76325410]  ;;  %v2171_v44 = vshrl.u32 %v108_v43, 7  ;;  %s2375_s25 = sld [smem:[#allocation10_spill]] }
  0x5b   :  { %v418_v37 = vcombine.high %v1412_v36, %v1412_v36  ;;  %v421_v40 = vpack.c.bf16 %v1412_v36, %v1412_v36  ;;  %v322_v41 = vld [vmem:[%s2356_s6] sm:$0x3]  ;;  %v1670_v21 = vld [vmem:[%s2361_s11 + $0x50] ss:$8 sps:$4 sm:$0xff]   ;;  %v1678_v24 = vld [vmem:[%s2361_s11 + $0x34] ss:$8 sps:$4 sm:$0xff]  }
  0x5c   :  { %827 = vmatpush1.bf16.msra.mxu0 %v1595_v6  ;;  %v336_v42 = vadd.f32 1e-05, %v322_v41  ;;  %v2174_v45 = vsub.s32 0, %v2171_v44  ;;  %v2180_v47 = vsub.s32 1, %v2171_v44  ;;  %v321_v48 = vld [vmem:[%s2355_s5] sm:$0x3] }
  0x5d   :  { %828 = vmatprep.subr.bf16.mxu0 %v1603_v7  ;;  %646 = vmatpush2.bf16.msra.mxu1 %v1654_v29  ;;  %v422_v38 = vpack.c.bf16 %v418_v37, %v418_v37  ;;  %v319_v54 = vld [vmem:[%s2353_s3] sm:$0x3]  ;;  %v1676_v25 = vld [vmem:[%s2361_s11 + $0x30] ss:$8 sps:$4 sm:$0xff]   ;;  %v1684_v28 = vld [vmem:[%s2361_s11 + $0x14] ss:$8 sps:$4 sm:$0xff]  }
  0x5e   :  { %647 = vmatprep.subr.bf16.mxu1 %v1658_v32  ;;  %1712 = vrsqrt.f32 %v336_v42  ;;  %v327_v51 = vrot.slane %v321_v48, %v2174_v45  ;;  %v331_v57 = vrot.slane %v321_v48, %v2180_v47  ;;  %v320_v61 = vld [vmem:[%s2354_s4] sm:$0x3]  ;;  %v355_v63 = vrot.slane %v319_v54, %v2174_v45  ;;  %v1682_v29 = vld [vmem:[%s2361_s11 + $0x10] ss:$8 sps:$4 sm:$0xff]   ;;  %v1690_v32 = vld [vmem:[%s2361_s11 + $0xf4] ss:$8 sps:$4 sm:$0xff]  }
  0x5f   :  { %850 = vmatprep.mubr.bf16.mxu0 %v422_v38  ;;  %v359_v3 = vrot.slane %v319_v54, %v2180_v47  ;;  %v368_v5 = vrot.slane %v320_v61, %v2174_v45  ;;  %v2203_v6 = vld.sshfl [vmem:[%s2358_s8] sm:$0x33 pattern:$0x76325410]  ;;  %v1696_v36 = vld [vmem:[%s2361_s11 + $0xd4] ss:$8 sps:$4 sm:$0xff]  }
  0x60   :  { %829 = vmatpush1.bf16.msra.mxu0 %v1601_v8  ;;  %v106_v46 = vld [vmem:[%s2375_s25] sm:$0x3]  ;;  %v372_v8 = vrot.slane %v320_v61, %v2180_v47  ;;  %v1694_v37 = vld [vmem:[%s2361_s11 + $0xd0] ss:$8 sps:$4 sm:$0xff]   ;;  %v1699_v38 = vld [vmem:[%s2361_s11 + $0xc4] ss:$8 sps:$4 sm:$0xff]  }
  0x61   :  { %830 = vmatprep.subr.bf16.mxu0 %v1609_v9  ;;  %648 = vmatpush2.bf16.msra.mxu1 %v1660_v33  ;;  %v111_v49 = vrot.slane %v106_v46, %v2174_v45  ;;  %v115_v52 = vrot.slane %v106_v46, %v2180_v47  ;;  %v1688_v33 = vld [vmem:[%s2361_s11 + $0xf0] ss:$8 sps:$4 sm:$0xff]   ;;  %v1705_v42 = vld [vmem:[%s2361_s11 + $0xa4] ss:$8 sps:$4 sm:$0xff]   ;;  %v1703_v46 = vld [vmem:[%s2361_s11 + $0xa0] ss:$8 sps:$4 sm:$0xff]  }
  0x62   :  { %1065 = vmatprep.subr.bf16.mxu1 %v1666_v39  ;;  %v1697_v39 = vld [vmem:[%s2361_s11 + $0xc0] ss:$8 sps:$4 sm:$0xff]   ;;  %v1700_v41 = vld [vmem:[%s2361_s11 + $0xb0] ss:$8 sps:$4 sm:$0xff]   ;;  %v1708_v48 = vld [vmem:[%s2361_s11 + $0x94] ss:$8 sps:$4 sm:$0xff]  }
  0x63   :  { %v1122_v61 = vld [vmem:[%s2363_s13] sm:$0xff]  ;;  %vm1254_vm0 = vcmask 1043456   ;;  %vm1273_vm1 = vcmask 1041409   ;;  %vm1276_vm2 = vcmask 25600   ;;  %vm1334_vm4 = vcmask 1024  }
  0x64   :  { %831 = vmatpush1.bf16.msra.mxu0 %v1607_v10 }
  0x65   :  { %832 = vmatprep.subr.bf16.mxu0 %v1615_v11  ;;  %v900_v11 = vcombine.high %v2203_v6, %v2203_v6 }
  0x68   :  { %833 = vmatpush1.bf16.msra.mxu0 %v1613_v12 }
  0x69   :  { %834 = vmatprep.subr.bf16.mxu0 %v1621_v13 }
  0x6b   :  { %v1713_v50 = vpop.eup %1712 }
  0x6c   :  { %835 = vmatpush2.bf16.msra.mxu0 %v1619_v14  ;;  %v342_v56 = vrot.slane %v1713_v50, %v2174_v45  ;;  %v346_v62 = vrot.slane %v1713_v50, %v2180_v47  ;;  %v1711_v50 = vld [vmem:[%s2361_s11 + $0x84] ss:$8 sps:$4 sm:$0xff]  }
  0x6d   :  { %836 = vmatprep.subr.bf16.mxu0 %v1627_v15  ;;  %v1664_v15 = vld [vmem:[%s2361_s11 + $0x70] ss:$8 sps:$4 sm:$0xff]  }
  0x70   :  { %837 = vmatpush2.bf16.msra.mxu0 %v1625_v16  ;;  %v904_v16 = vpack.c.bf16 %v900_v11, %v900_v11 }
  0x71   :  { %838 = vmatprep.subr.bf16.mxu0 %v1633_v17 }
  0x74   :  { %839 = vmatpush2.bf16.msra.mxu0 %v1631_v18  ;;  %v1669_v18 = vld [vmem:[%s2361_s11 + $0x64] ss:$8 sps:$4 sm:$0xff]  }
  0x75   :  { %840 = vmatprep.subr.bf16.mxu0 %v1639_v19  ;;  %v1667_v19 = vld [vmem:[%s2361_s11 + $0x60] ss:$8 sps:$4 sm:$0xff]  }
  0x78   :  { %841 = vmatpush2.bf16.msra.mxu0 %v1637_v20  ;;  %v1672_v20 = vld [vmem:[%s2361_s11 + $0x54] ss:$8 sps:$4 sm:$0xff]  }
  0x79   :  { %842 = vmatprep.subr.bf16.mxu0 %v1645_v22  ;;  %v1675_v22 = vld [vmem:[%s2361_s11 + $0x44] ss:$8 sps:$4 sm:$0xff]  }
  0x7c   :  { %843 = vmatpush2.bf16.msra.mxu0 %v1643_v23  ;;  %v1673_v23 = vld [vmem:[%s2361_s11 + $0x40] ss:$8 sps:$4 sm:$0xff]  }
  0x7d   :  { %844 = vmatprep.subr.bf16.mxu0 %v1651_v26  ;;  %v1681_v26 = vld [vmem:[%s2361_s11 + $0x24] ss:$8 sps:$4 sm:$0xff]  }
  0x80   :  { %845 = vmatpush2.bf16.msra.mxu0 %v1649_v27  ;;  %v1679_v27 = vld [vmem:[%s2361_s11 + $0x20] ss:$8 sps:$4 sm:$0xff]  }
  0x81   :  { %846 = vmatprep.subr.bf16.mxu0 %v1657_v31  ;;  %v1685_v31 = vld [vmem:[%s2361_s11] ss:$8 sps:$4 sm:$0xff]  }
  0x84   :  { %847 = vmatpush2.bf16.msra.mxu0 %v1655_v30  ;;  %v1687_v30 = vld [vmem:[%s2361_s11 + $0x4] ss:$8 sps:$4 sm:$0xff]  }
  0x85   :  { %848 = vmatprep.subr.bf16.mxu0 %v1663_v34  ;;  %v1693_v34 = vld [vmem:[%s2361_s11 + $0xe4] ss:$8 sps:$4 sm:$0xff]  }
  0x88   :  { %849 = vmatpush2.bf16.msra.mxu0 %v1661_v35  ;;  %v1691_v35 = vld [vmem:[%s2361_s11 + $0xe0] ss:$8 sps:$4 sm:$0xff]  }
  0x8b   :  { %851 = vmatmul.mubr.bf16.vlgmr.msra.gmra.mxu0 %v421_v40  ;;  %v1702_v40 = vld [vmem:[%s2361_s11 + $0xb4] ss:$8 sps:$4 sm:$0xff]  }
 0x10b   :  { %v312_v53 = vpop.f32.mrf.mxu0 }
 0x10c   :  { %v313_v55 = vadd.f32 %v312_v53, %v111_v49  ;;  %v1706_v49 = vld [vmem:[%s2361_s11 + $0x90] ss:$8 sps:$4 sm:$0xff]  }
 0x10d   :  { %v314_v58 = vpop.f32.mrf.mxu0 }
 0x10e   :  { %v334_v59 = vsub.f32 %v313_v55, %v327_v51  ;;  %v315_v60 = vadd.f32 %v314_v58, %v115_v52  ;;  %v1709_v51 = vld [vmem:[%s2361_s11 + $0x80] ss:$8 sps:$4 sm:$0xff]   ;;  %v903_v52 = vpack.c.bf16 %v2203_v6, %v2203_v6 }
 0x10f   :  { %v316_v0 = vpop.f32.mrf.mxu0  ;;  %v1126_v6 = vld [vmem:[%s2365_s15] sm:$0xff] }
 0x110   :  { %v349_v1 = vmul.f32 %v342_v56, %v334_v59  ;;  %v335_v2 = vsub.f32 %v315_v60, %v331_v57  ;;  %v1125_v0 = vld [vmem:[%s2364_s14 + $0x8] sm:$0xff] }
 0x111   :  { %v317_v4 = vpop.f32.mrf.mxu0 }
 0x112   :  { %v350_v7 = vmul.f32 %v346_v62, %v335_v2  ;;  %v362_v9 = vmul.f32 %v355_v63, %v349_v1  ;;  %v1124_v62 = vld [vmem:[%s2364_s14] sm:$0xff]  ;;  %v1123_v63 = vld [vmem:[%s2363_s13 + $0x8] sm:$0xff]  ;;  %v1134_v1 = vrot.slane %v1122_v61, 4  ;;  %v1141_v4 = vrot.slane %v1125_v0, 4 }
 0x113   :  { %v1140_v2 = vrot.slane %v1124_v62, 4 }
 0x114   :  { %v363_v10 = vmul.f32 %v359_v3, %v350_v7  ;;  %v375_v12 = vadd.f32 %v368_v5, %v362_v9  ;;  %v1135_v3 = vrot.slane %v1123_v63, 4  ;;  %v1128_v5 = vmul.f32 %v1124_v62, %v1122_v61 }
 0x115   :  { %v1144_v7 = vmul.f32 %v1140_v2, %v1134_v1  ;;  %v1162_v9 = vmul.f32 %v1140_v2, %v1122_v61 }
 0x116   :  { %v376_v13 = vadd.f32 %v372_v8, %v363_v10  ;;  %v455_v17 = vpack.c.bf16 %v375_v12, %v375_v12  ;;  %v1150_v8 = vmul.f32 %v1134_v1, %v1124_v62  ;;  %v1764_v10 = vmov 1966171168  }
 0x117   :  { %v1184_v11 = vunpack.c.l.s4 %v1764_v10  ;;  %v1129_v12 = vmul.f32 %v1125_v0, %v1123_v63 }
 0x118   :  { %v456_v14 = vpack.c.bf16 %v376_v13, %v376_v13  ;;  %v1145_v13 = vmul.f32 %v1141_v4, %v1135_v3 }
 0x11a   :  { %649 = vmatprep.mubr.bf16.mxu1 %v456_v14  ;;  %v1130_v14 = vmul.f32 %v1128_v5, %v1126_v6 }
 0x11b   :  { %650 = vmatmul.mubr.bf16.vlgmr.msra.gmra.mxu1 %v455_v17  ;;  %v1163_v17 = vmul.f32 %v1141_v4, %v1123_v63 }
 0x11c   :  { %1066 = vmatpush1.bf16.msra.mxu1 %v1664_v15  ;;  %1097 = vmatprep.mubr.bf16.mxu1 %v904_v16  ;;  %v1127_v15 = vld [vmem:[%s2365_s15 + $0x8] sm:$0xff]  ;;  %v1151_v16 = vmul.f32 %v1135_v3, %v1125_v0 }
 0x11d   :  { %1067 = vmatprep.subr.bf16.mxu1 %v1669_v18  ;;  %v1108_v18 = vld [vmem:[%s2362_s12] sm:$0x3] }
 0x120   :  { %1068 = vmatpush1.bf16.msra.mxu1 %v1667_v19  ;;  %v1146_v19 = vmul.f32 %v1144_v7, %v1126_v6 }
 0x121   :  { %1069 = vmatprep.subr.bf16.mxu1 %v1672_v20  ;;  %v1154_v20 = vrot.slane %v1126_v6, 4 }
 0x124   :  { %1070 = vmatpush1.bf16.msra.mxu1 %v1670_v21  ;;  %v1168_v21 = vmul.f32 %v1150_v8, %v1126_v6 }
 0x125   :  { %1071 = vmatprep.subr.bf16.mxu1 %v1675_v22  ;;  %v1170_v22 = vmul.f32 %v1162_v9, %v1126_v6 }
 0x128   :  { %1072 = vmatpush1.bf16.msra.mxu1 %v1673_v23  ;;  %v1185_v23 = vunpack.c.0.s8 %v1184_v11 }
 0x129   :  { %1073 = vmatprep.subr.bf16.mxu1 %v1678_v24  ;;  %v1131_v24 = vmul.f32 %v1129_v12, %v1127_v15 }
 0x12c   :  { %1074 = vmatpush1.bf16.msra.mxu1 %v1676_v25  ;;  %v1147_v25 = vmul.f32 %v1145_v13, %v1127_v15 }
 0x12d   :  { %1075 = vmatprep.subr.bf16.mxu1 %v1681_v26  ;;  %v1155_v26 = vrot.slane %v1127_v15, 4 }
 0x12f   :  { %v1179_v61 = vmul.f32 %v1155_v26, %v1145_v13 }
 0x130   :  { %1076 = vmatpush1.bf16.msra.mxu1 %v1679_v27 }
 0x131   :  { %1077 = vmatprep.subr.bf16.mxu1 %v1684_v28  ;;  %v1113_v28 = vrot.slane %v1108_v18, %v2174_v45 }
 0x134   :  { %1078 = vmatpush1.bf16.msra.mxu1 %v1682_v29  ;;  %v1169_v29 = vmul.f32 %v1151_v16, %v1127_v15 }
 0x135   :  { %1079 = vmatprep.subr.bf16.mxu1 %v1687_v30  ;;  %v1171_v30 = vmul.f32 %v1163_v17, %v1127_v15 }
 0x138   :  { %1080 = vmatpush1.bf16.msra.mxu1 %v1685_v31 }
 0x139   :  { %1081 = vmatprep.subr.bf16.mxu1 %v1690_v32  ;;  %v1148_v32 = vsub.f32 %v1130_v14, %v1146_v19 }
 0x13c   :  { %1082 = vmatpush2.bf16.msra.mxu1 %v1688_v33  ;;  %v1158_v33 = vmul.f32 %v1154_v20, %v1150_v8 }
 0x13d   :  { %1083 = vmatprep.subr.bf16.mxu1 %v1693_v34  ;;  %v1172_v34 = vsub.f32 %v1168_v21, %v1170_v22  ;;  %v1264_v22 = vand.u32 127, %v108_v43 }
 0x140   :  { %1084 = vmatpush2.bf16.msra.mxu1 %v1691_v35  ;;  %v1174_v35 = vmul.f32 %v1154_v20, %v1128_v5 }
 0x141   :  { %1085 = vmatprep.subr.bf16.mxu1 %v1696_v36 }
 0x144   :  { %1086 = vmatpush2.bf16.msra.mxu1 %v1694_v37 }
 0x145   :  { %1087 = vmatprep.subr.bf16.mxu1 %v1699_v38  ;;  %v1188_v38 = vsub.s32 %v1185_v23, %v2171_v44 }
 0x148   :  { %1088 = vmatpush2.bf16.msra.mxu1 %v1697_v39  ;;  %v1117_v39 = vrot.slane %v1108_v18, %v2180_v47 }
 0x149   :  { %1089 = vmatprep.subr.bf16.mxu1 %v1702_v40 }
 0x14b   :  { %v852_v53 = vpop.f32.mrf.mxu0 }
 0x14c   :  { %1090 = vmatpush2.bf16.msra.mxu1 %v1700_v41  ;;  %v1149_v41 = vsub.f32 %v1131_v24, %v1147_v25  ;;  %v1267_v24 = vsub.s32 %v1264_v22, %v2171_v44 }
 0x14d   :  { %1091 = vmatprep.subr.bf16.mxu1 %v1705_v42  ;;  %v854_v54 = vpop.f32.mrf.mxu0  ;;  %v1159_v42 = vmul.f32 %v1155_v26, %v1151_v16 }
 0x14f   :  { %v856_v55 = vpop.f32.mrf.mxu0 }
 0x150   :  { %1092 = vmatpush2.bf16.msra.mxu1 %v1703_v46  ;;  %v1176_v55 = vadd.f32 %v1174_v35, %v1172_v34 }
 0x151   :  { %1093 = vmatprep.subr.bf16.mxu1 %v1708_v48  ;;  %v857_v56 = vpop.f32.mrf.mxu0 }
 0x152   :  { %v1178_v56 = vmul.f32 %v1154_v20, %v1144_v7 }
 0x154   :  { %1094 = vmatpush2.bf16.msra.mxu1 %v1706_v49  ;;  %v1173_v49 = vsub.f32 %v1169_v29, %v1171_v30  ;;  %v1180_v3 = vsub.f32 %v1176_v55, %v1178_v56  ;;  %v1765_v30 = vmov 0  }
 0x155   :  { %1095 = vmatprep.subr.bf16.mxu1 %v1711_v50  ;;  %v1175_v50 = vmul.f32 %v1155_v26, %v1129_v12  ;;  %1519 = vset.pattern.permute.xlu0 %v1765_v30 }
 0x156   :  { %1518 = vset.pattern.permute.xlu1 %v1765_v30 }
 0x157   :  { %v1177_v1 = vadd.f32 %v1175_v50, %v1173_v49 }
 0x158   :  { %1096 = vmatpush2.bf16.msra.mxu1 %v1709_v51 }
 0x159   :  { %v1181_v10 = vsub.f32 %v1177_v1, %v1179_v61 }
 0x15b   :  { %1098 = vmatmul.mubr.bf16.vlgmr.msra.gmra.mxu1 %v903_v52  ;;  %v1160_v52 = vsub.f32 %v1148_v32, %v1158_v33 }
 0x1db   :  { %v651_v57 = vpop.f32.mrf.mxu1 }
 0x1dc   :  { %v853_v27 = vadd.f32 %v852_v53, %v651_v57  ;;  %v1164_v53 = vmul.f32 %v1162_v9, %v1154_v20 }
 0x1dd   :  { %v653_v58 = vpop.f32.mrf.mxu1 }
 0x1de   :  { %v855_v36 = vadd.f32 %v854_v54, %v653_v58  ;;  %v1161_v58 = vsub.f32 %v1149_v41, %v1159_v42  ;;  %v1166_v2 = vadd.f32 %v1164_v53, %v1160_v52 }
 0x1df   :  { %v655_v59 = vpop.f32.mrf.mxu1 }
 0x1e1   :  { %v656_v60 = vpop.f32.mrf.mxu1 }
 0x1e2   :  { %v1165_v60 = vmul.f32 %v1163_v17, %v1155_v26 }
 0x1e4   :  { %v1167_v9 = vadd.f32 %v1165_v60, %v1161_v58 }
 0x21b   :  { %v1099_v31 = vpop.f32.mrf.mxu1 }
 0x21c   :  { %v1106_v37 = vadd.f32 %v1099_v31, %v853_v27 }
 0x21d   :  { %v1101_v40 = vpop.f32.mrf.mxu1 }
 0x21e   :  { %v1120_v46 = vadd.f32 %v1113_v28, %v1106_v37  ;;  %v1107_v48 = vadd.f32 %v1101_v40, %v855_v36 }
 0x21f   :  { %v1103_v51 = vpop.f32.mrf.mxu1 }
 0x220   :  { %v1189_v57 = vrot.slane %v1120_v46, %v1188_v38  ;;  %v1121_v59 = vadd.f32 %v1117_v39, %v1107_v48  ;;  %v1766_v48 = vmov 0.0  }
 0x221   :  { %v1104_v54 = vpop.f32.mrf.mxu1 }
 0x222   :  { %v1190_v62 = vcombine.high %v1189_v57, %v1189_v57  ;;  %v1197_v63 = vrot.slane %v1189_v57, %v1188_v38  ;;  %v1224_v0 = vrot.slane %v1121_v59, %v1188_v38 }
 0x224   :  { %v1225_v4 = vcombine.high %v1224_v0, %v1224_v0  ;;  %v1232_v5 = vrot.slane %v1224_v0, %v1188_v38  ;;  %v1208_v6 = vrot.slane %v1197_v63, %v2174_v45  ;;  %v1204_v8 = vrot.slane %v1190_v62, %v1188_v38 }
 0x226   :  { %v1243_v7 = vrot.slane %v1232_v5, %v2174_v45  ;;  %v1212_v11 = vrot.slane %v1204_v8, %v2174_v45  ;;  %v1239_v12 = vrot.slane %v1225_v4, %v1188_v38  ;;  %v1215_v14 = vmul.f32 %v1208_v6, %v1166_v2  ;;  %v1278_v38 = vld [vmem:[%s2366_s16] sm:$0x3]  ;;  %s1767_s16 = smov [#allocation2]  }
 0x227   :  { %s1357_s1 = sshll.u32 %s1767_s16, 4  ;;  %s1358_s1 = int_to_ptr.vmem [resolvable:$true] %s1357_s1 }
 0x228   :  { %v1250_v13 = vmul.f32 %v1243_v7, %v1180_v3  ;;  %v1247_v15 = vrot.slane %v1239_v12, %v2174_v45  ;;  %v1216_v17 = vmul.f32 %v1212_v11, %v1167_v9  ;;  %s1720_s20 = scalar_lea.vmem %s1358_s1, 32  ;;  %p1725_p1 = scmp.lt.s32.totalorder %s1358_s1, %s1358_s1 }
 0x229   :  { %p1721_p0 = scmp.ne.s32.totalorder %s1358_s1, %s1720_s20  ;;  %p1726_p2 = scmp.lt.s32.totalorder %s1720_s20, %s1720_s20 }
 0x22a   :  { %v1252_v16 = vadd.f32 %v1250_v13, %v1215_v14  ;;  %v1251_v18 = vmul.f32 %v1247_v15, %v1181_v10 }
 0x22b   :  { %p1727_p3 = por %p1726_p2, %p1725_p1 }
 0x22c   :  { %v1255_v19 = vsel %vm1254_vm0, %v1252_v16, 0.0  ;;  %v1253_v20 = vadd.f32 %v1251_v18, %v1216_v17 }
 0x22d   :  { %1256 = vadd.xlane.f32.xlu0 %v1255_v19  ;;  %p1728_p4 = pnand %p1727_p3, %p1721_p0 }
 0x22e   :  { %v1258_v21 = vsel %vm1254_vm0, %v1253_v20, 0.0 }
 0x231   :  { %1259 = vadd.xlane.f32.xlu0 %v1258_v21 }
 0x2b6   :  { %v1257_v23 = vpop.xlane.xlu0 %1256 }
 0x2b7   :  { %v1268_v26 = vrot.slane %v1257_v23, %v1267_v24 }
 0x2ba   :  { %v1260_v25 = vpop.xlane.xlu0 %1259 }
 0x2bb   :  { %v1272_v27 = vrot.slane %v1260_v25, %v1267_v24 }
 0x2bd   :  { %v1274_v28 = vsel %vm1273_vm1, %v1272_v27, %v1268_v26 }
 0x2be   :  { %v1279_v29 = vsel %vm1276_vm2, %v1274_v28, -inf  ;;  %1277 = vst.msk [vmem:[#allocation2] sm:$0x3] %vm1276_vm2, %v1274_v28 }
 0x2bf   :  { %1280 = vmax.xlane.f32.xlu1 %v1279_v29 }
 0x348   :  { %v1281_v31 = vpop.xlane.xlu1 %1280 }
 0x349   :  { %v1286_v43 = vrot.slane %v1281_v31, %v2174_v45  ;;  %v1290_v44 = vrot.slane %v1281_v31, %v2180_v47 }
 0x34b   :  { %v1293_v32 = vsub.f32 %v1257_v23, %v1286_v43  ;;  %v1294_v33 = vsub.f32 %v1260_v25, %v1290_v44 }
 0x34d   :  { %v1295_v34 = vmul.f32 1.442695, %v1293_v32  ;;  %v1297_v35 = vmul.f32 1.442695, %v1294_v33 }
 0x34f   :  { %1714 = vpow2.f32 %v1295_v34 }
 0x350   :  { %1716 = vpow2.f32 %v1297_v35 }
 0x35c   :  { %v1715_v36 = vpop.eup %1714 }
 0x35d   :  { %v1717_v37 = vpop.eup %1716  ;;  %1302 = vperm.xlu1 %1518, %v1715_v36  }
 0x35e   :  { %1305 = vperm.xlu0 %1519, %v1717_v37  }
 0x361   :  { %1324 = vperm.xlu1 %1518, %v1278_v38  }
 0x3d8   :  { %v1303_v39 = vpop.permute.xlu1 %1302 }
 0x3d9   :  { %v1306_v40 = vpop.permute.xlu0 %1305  ;;  %v1310_v45 = vrot.slane %v1303_v39, %v1267_v24 }
 0x3da   :  { %v1314_v41 = vrot.slane %v1306_v40, %v1267_v24 }
 0x3dc   :  { %v1325_v47 = vpop.permute.xlu1 %1324  ;;  %v1315_v42 = vsel %vm1273_vm1, %v1314_v41, %v1310_v45 }
 0x3dd   :  { %vm1326_vm3 = vcmp.eq.s32.totalorder %v1264_v22, %v1325_v47  ;;  %v1317_v46 = vsel %vm1276_vm2, %v1315_v42, 0.0 }
 0x3de   :  { %v1510_v49 = vsel %vm1326_vm3, 1.0, %v1766_v48  ;;  %1318 = vadd.xlane.f32.xlu1 %v1317_v46 }
 0x3df   :  { %v1329_v50 = vmul.f32 %v1510_v49, %v1274_v28 }
 0x3e1   :  { %v1330_v51 = vsel %vm1276_vm2, %v1329_v50, 0.0 }
 0x3e2   :  { %1331 = vadd.xlane.f32.xlu0 %v1330_v51 }
 0x467   :  { %v1319_v52 = vpop.xlane.xlu1 %1318 }
 0x468   :  { %1718 = vlog2.f32 %v1319_v52 }
 0x46b   :  { %v1332_v57 = vpop.xlane.xlu0 %1331 }
 0x475   :  { %v1719_v53 = vpop.eup %1718 }
 0x476   :  { %v1321_v55 = vmul.f32 0.6931472, %v1719_v53 }
 0x478   :  { %v1322_v56 = vadd.f32 %v1321_v55, %v1281_v31 }
 0x47a   :  { %v1333_v59 = vsub.f32 %v1322_v56, %v1332_v57 }
 0x47c   :  { %v1335_v54 = vsel %vm1334_vm4, %v1333_v59, 0.0 }
 0x47d   :  { %1336 = vadd.xlane.f32.xlu1 %v1335_v54 }
 0x47e   :  { %1731 = shalt.err (!%p1728_p4)
}
 0x47f   :  { %1360 = dma.vmem_to_hbm [thread:$0]  %s1358_s1, 32, %s2367_s17, [#allocation3]   ;;  %vm1349_vm5 = vcmask 0  }
 0x480   :  { %s1768_s10 = smov [#allocation4]  }
 0x481   :  { %s1367_s2 = sshll.u32 %s1768_s10, 4  ;;  %s1368_s2 = int_to_ptr.vmem [resolvable:$true] %s1367_s2 }
 0x482   :  { %s1740_s7 = scalar_lea.vmem %s1368_s2, 16  ;;  %s1744_s9 = scalar_lea.vmem %s1368_s2, 32 }
 0x483   :  { %p1741_p5 = scmp.ne.s32.totalorder %s1368_s2, %s1740_s7  ;;  %p1745_p6 = scmp.lt.s32.totalorder %s1368_s2, %s1368_s2 }
 0x484   :  { %p1746_p7 = scmp.lt.s32.totalorder %s1744_s9, %s1740_s7 }
 0x486   :  { %p1747_p8 = por %p1746_p7, %p1745_p6 }
 0x488   :  { %p1748_p9 = pnand %p1747_p8, %p1741_p5 }
 0x506   :  { %v1337_v58 = vpop.xlane.xlu1 %1336 }
 0x507   :  { %v1338_v60 = vrot.slane %v1337_v58, 4 }
 0x509   :  { %v1339_v61 = vadd.f32 %v1338_v60, %v1337_v58 }
 0x50b   :  { %v1340_v62 = vrot.slane %v1339_v61, 2 }
 0x50d   :  { %v1341_v63 = vadd.f32 %v1340_v62, %v1339_v61 }
 0x50f   :  { %v1342_v0 = vrot.slane %v1341_v63, 1 }
 0x511   :  { %v1343_v1 = vadd.f32 %v1342_v0, %v1341_v63 }
 0x513   :  { %1511 = vpush %v1343_v1 }
 0x544   :  { %s1512_s23 = spop %1511 }
 0x545   :  { %s1347_s24 = smul.f32 0.5, %s1512_s23 }
 0x547   :  { %v1348_v2 = vstv %s1347_s24 }
 0x548   :  { %1350 = vst.msk [vmem:[#allocation4] sm:$0x1] %vm1349_vm5, %v1348_v2 }
 0x549   :  { %1751 = shalt.err (!%p1748_p9)
}
 0x54a   :  { %1370 = dma.vmem_to_hbm [thread:$0]  %s1368_s2, 16, %s2368_s18, [#allocation5]  }
 0x54b   :  { %1760 = dma.done.wait [#allocation3], 32  }
 0x54c   :  { %1761 = vsyncadd [#allocation3], 4294967264 }
 0x54d   :  { %1762 = dma.done.wait [#allocation5], 16  }
 0x54e   :  { %1763 = vsyncadd [#allocation5], 4294967280 }
 0x54f   :  { %1377 = vsyncpa [#allocation3], 1 }
 0x550   :  { %1378 = vsyncpa [#allocation5], 1 }

// kernel: _forward_core.10
= control target key start
LH: loop header
LB: loop body
LE: loop exit
PB: predicated region body
PF: predicated region fallthrough
CT: control target
= control target key end

     0   :  { %s1870_s1 = inlined_call_operand.vmem [shape: bf16[768,256], index: 1, kind: input, shape index: {}]   ;;  %s1871_s0 = inlined_call_operand.vmem [shape: f32[4,768], index: 0, kind: input, shape index: {}]   ;;  %s1872_s3 = inlined_call_operand.vmem [shape: bf16[256,256], index: 3, kind: input, shape index: {}]   ;;  %s1873_s2 = inlined_call_operand.vmem [shape: f32[1,256], index: 2, kind: input, shape index: {}]   ;;  %s1874_s8 = inlined_call_operand.vmem [shape: f32[1,256], index: 8, kind: input, shape index: {}]   ;;  %s1875_s4 = inlined_call_operand.vmem [shape: f32[1,256], index: 4, kind: input, shape index: {}]   ;;  %s1876_s7 = inlined_call_operand.vmem [shape: f32[1,256], index: 7, kind: input, shape index: {}]   ;;  %s1877_s5 = inlined_call_operand.vmem [shape: f32[1,256], index: 5, kind: input, shape index: {}]   ;;  %s1878_s6 = inlined_call_operand.vmem [shape: f32[1,256], index: 6, kind: input, shape index: {}]   ;;  %s1879_s9 = inlined_call_operand.vmem [shape: f32[4,256], index: 9, kind: output, shape index: {}]  }
   0x1   :  { %v1203_v0 = vld [vmem:[%s1870_s1 + $0x74] ss:$8 sps:$4 sm:$0xff]   ;;  %v1205_v1 = vld [vmem:[%s1870_s1 + $0x70] ss:$8 sps:$4 sm:$0xff]   ;;  %v1209_v4 = vld [vmem:[%s1870_s1 + $0x64] ss:$8 sps:$4 sm:$0xff]  }
   0x2   :  { %638 = vmatprep.subr.bf16.mxu0 %v1203_v0  ;;  %v1206_v2 = vld [vmem:[%s1870_s1 + $0x174] ss:$8 sps:$4 sm:$0xff]   ;;  %v1208_v3 = vld [vmem:[%s1870_s1 + $0x170] ss:$8 sps:$4 sm:$0xff]   ;;  %v1211_v5 = vld [vmem:[%s1870_s1 + $0x60] ss:$8 sps:$4 sm:$0xff]  }
   0x3   :  { %639 = vmatpush1.bf16.msra.mxu0 %v1205_v1  ;;  %679 = vmatprep.subr.bf16.mxu1 %v1206_v2  ;;  %v1212_v6 = vld [vmem:[%s1870_s1 + $0x164] ss:$8 sps:$4 sm:$0xff]   ;;  %v1214_v7 = vld [vmem:[%s1870_s1 + $0x160] ss:$8 sps:$4 sm:$0xff]   ;;  %v1215_v8 = vld [vmem:[%s1870_s1 + $0x54] ss:$8 sps:$4 sm:$0xff]  }
   0x4   :  { %680 = vmatpush1.bf16.msra.mxu1 %v1208_v3  ;;  %640 = vmatprep.subr.bf16.mxu0 %v1209_v4  ;;  %v1217_v9 = vld [vmem:[%s1870_s1 + $0x50] ss:$8 sps:$4 sm:$0xff]   ;;  %v1218_v10 = vld [vmem:[%s1870_s1 + $0x154] ss:$8 sps:$4 sm:$0xff]   ;;  %v1221_v11 = vld [vmem:[%s1870_s1 + $0x44] ss:$8 sps:$4 sm:$0xff]  }
   0x5   :  { %681 = vmatprep.subr.bf16.mxu1 %v1212_v6  ;;  %v1220_v12 = vld [vmem:[%s1870_s1 + $0x150] ss:$8 sps:$4 sm:$0xff]   ;;  %v1224_v13 = vld [vmem:[%s1870_s1 + $0x144] ss:$8 sps:$4 sm:$0xff]   ;;  %v1223_v14 = vld [vmem:[%s1870_s1 + $0x40] ss:$8 sps:$4 sm:$0xff]  }
   0x6   :  { %v1227_v15 = vld [vmem:[%s1870_s1 + $0x34] ss:$8 sps:$4 sm:$0xff]   ;;  %v1226_v16 = vld [vmem:[%s1870_s1 + $0x140] ss:$8 sps:$4 sm:$0xff]   ;;  %v1229_v18 = vld [vmem:[%s1870_s1 + $0x30] ss:$8 sps:$4 sm:$0xff]  }
   0x7   :  { %641 = vmatpush1.bf16.msra.mxu0 %v1211_v5  ;;  %v1230_v17 = vld [vmem:[%s1870_s1 + $0x134] ss:$8 sps:$4 sm:$0xff]   ;;  %v1233_v19 = vld [vmem:[%s1870_s1 + $0x24] ss:$8 sps:$4 sm:$0xff]   ;;  %v1232_v20 = vld [vmem:[%s1870_s1 + $0x130] ss:$8 sps:$4 sm:$0xff]  }
   0x8   :  { %642 = vmatprep.subr.bf16.mxu0 %v1215_v8  ;;  %682 = vmatpush1.bf16.msra.mxu1 %v1214_v7  ;;  %v1236_v21 = vld [vmem:[%s1870_s1 + $0x124] ss:$8 sps:$4 sm:$0xff]   ;;  %v1235_v22 = vld [vmem:[%s1870_s1 + $0x20] ss:$8 sps:$4 sm:$0xff]   ;;  %v1239_v23 = vld [vmem:[%s1870_s1 + $0x14] ss:$8 sps:$4 sm:$0xff]  }
   0x9   :  { %683 = vmatprep.subr.bf16.mxu1 %v1218_v10  ;;  %v1238_v24 = vld [vmem:[%s1870_s1 + $0x120] ss:$8 sps:$4 sm:$0xff]   ;;  %v1242_v25 = vld [vmem:[%s1870_s1 + $0x114] ss:$8 sps:$4 sm:$0xff]   ;;  %v1241_v26 = vld [vmem:[%s1870_s1 + $0x10] ss:$8 sps:$4 sm:$0xff]  }
   0xa   :  { %v1245_v27 = vld [vmem:[%s1870_s1 + $0x4] ss:$8 sps:$4 sm:$0xff]   ;;  %v1244_v28 = vld [vmem:[%s1870_s1 + $0x110] ss:$8 sps:$4 sm:$0xff]   ;;  %v1247_v30 = vld [vmem:[%s1870_s1] ss:$8 sps:$4 sm:$0xff]  }
   0xb   :  { %643 = vmatpush1.bf16.msra.mxu0 %v1217_v9  ;;  %v1248_v29 = vld [vmem:[%s1870_s1 + $0x104] ss:$8 sps:$4 sm:$0xff]   ;;  %v1251_v31 = vld [vmem:[%s1870_s1 + $0xf4] ss:$8 sps:$4 sm:$0xff]   ;;  %v1250_v32 = vld [vmem:[%s1870_s1 + $0x100] ss:$8 sps:$4 sm:$0xff]  }
   0xc   :  { %644 = vmatprep.subr.bf16.mxu0 %v1221_v11  ;;  %684 = vmatpush1.bf16.msra.mxu1 %v1220_v12  ;;  %v1254_v33 = vld [vmem:[%s1870_s1 + $0x1f4] ss:$8 sps:$4 sm:$0xff]   ;;  %v1253_v34 = vld [vmem:[%s1870_s1 + $0xf0] ss:$8 sps:$4 sm:$0xff]   ;;  %v1257_v35 = vld [vmem:[%s1870_s1 + $0xe4] ss:$8 sps:$4 sm:$0xff]  }
   0xd   :  { %685 = vmatprep.subr.bf16.mxu1 %v1224_v13  ;;  %v1256_v36 = vld [vmem:[%s1870_s1 + $0x1f0] ss:$8 sps:$4 sm:$0xff]   ;;  %v1260_v37 = vld [vmem:[%s1870_s1 + $0x1e4] ss:$8 sps:$4 sm:$0xff]   ;;  %v1259_v38 = vld [vmem:[%s1870_s1 + $0xe0] ss:$8 sps:$4 sm:$0xff]  }
   0xe   :  { %v1263_v39 = vld [vmem:[%s1870_s1 + $0xd4] ss:$8 sps:$4 sm:$0xff]   ;;  %v1262_v40 = vld [vmem:[%s1870_s1 + $0x1e0] ss:$8 sps:$4 sm:$0xff]   ;;  %v1265_v42 = vld [vmem:[%s1870_s1 + $0xd0] ss:$8 sps:$4 sm:$0xff]  }
   0xf   :  { %645 = vmatpush1.bf16.msra.mxu0 %v1223_v14  ;;  %v1266_v41 = vld [vmem:[%s1870_s1 + $0x1d4] ss:$8 sps:$4 sm:$0xff]   ;;  %v1269_v43 = vld [vmem:[%s1870_s1 + $0xc4] ss:$8 sps:$4 sm:$0xff]   ;;  %v1268_v44 = vld [vmem:[%s1870_s1 + $0x1d0] ss:$8 sps:$4 sm:$0xff]  }
  0x10   :  { %646 = vmatprep.subr.bf16.mxu0 %v1227_v15  ;;  %686 = vmatpush1.bf16.msra.mxu1 %v1226_v16  ;;  %v1272_v45 = vld [vmem:[%s1870_s1 + $0x1c4] ss:$8 sps:$4 sm:$0xff]   ;;  %v1271_v47 = vld [vmem:[%s1870_s1 + $0xc0] ss:$8 sps:$4 sm:$0xff]   ;;  %v1275_v49 = vld [vmem:[%s1870_s1 + $0xb4] ss:$8 sps:$4 sm:$0xff]  }
  0x11   :  { %687 = vmatprep.subr.bf16.mxu1 %v1230_v17  ;;  %v32_v46 = vld [vmem:[%s1871_s0] sm:$0xff]  ;;  %v33_v50 = vld [vmem:[%s1871_s0 + $0x8] sm:$0xff]  ;;  %v1278_v54 = vld [vmem:[%s1870_s1 + $0x1b4] ss:$8 sps:$4 sm:$0xff]  }
  0x12   :  { %v134_v48 = vcombine.high %v32_v46, %v32_v46  ;;  %v1274_v51 = vld [vmem:[%s1870_s1 + $0x1c0] ss:$8 sps:$4 sm:$0xff]   ;;  %v135_v53 = vcombine.high %v33_v50, %v33_v50  ;;  %v1277_v55 = vld [vmem:[%s1870_s1 + $0xb0] ss:$8 sps:$4 sm:$0xff]   ;;  %v1281_v57 = vld [vmem:[%s1870_s1 + $0xa4] ss:$8 sps:$4 sm:$0xff]   ;;  %v140_v7 = vpack.c.bf16 %v32_v46, %v32_v46  ;;  %v142_v9 = vpack.c.bf16 %v33_v50, %v33_v50 }
  0x13   :  { %647 = vmatpush1.bf16.msra.mxu0 %v1229_v18  ;;  %v1280_v58 = vld [vmem:[%s1870_s1 + $0x1b0] ss:$8 sps:$4 sm:$0xff]   ;;  %v1284_v59 = vld [vmem:[%s1870_s1 + $0x1a4] ss:$8 sps:$4 sm:$0xff]   ;;  %v1283_v60 = vld [vmem:[%s1870_s1 + $0xa0] ss:$8 sps:$4 sm:$0xff]  }
  0x14   :  { %648 = vmatprep.subr.bf16.mxu0 %v1233_v19  ;;  %688 = vmatpush1.bf16.msra.mxu1 %v1232_v20  ;;  %v141_v52 = vpack.c.bf16 %v134_v48, %v134_v48  ;;  %v143_v56 = vpack.c.bf16 %v135_v53, %v135_v53  ;;  %v1287_v61 = vld [vmem:[%s1870_s1 + $0x94] ss:$8 sps:$4 sm:$0xff]   ;;  %v1286_v62 = vld [vmem:[%s1870_s1 + $0x1a0] ss:$8 sps:$4 sm:$0xff]   ;;  %v1289_v0 = vld [vmem:[%s1870_s1 + $0x90] ss:$8 sps:$4 sm:$0xff]  }
  0x15   :  { %689 = vmatprep.subr.bf16.mxu1 %v1236_v21  ;;  %v1290_v63 = vld [vmem:[%s1870_s1 + $0x194] ss:$8 sps:$4 sm:$0xff]   ;;  %v1293_v1 = vld [vmem:[%s1870_s1 + $0x84] ss:$8 sps:$4 sm:$0xff]   ;;  %v1292_v2 = vld [vmem:[%s1870_s1 + $0x190] ss:$8 sps:$4 sm:$0xff]  }
  0x16   :  { %670 = vmatprep.mubr.bf16.mxu0 %v141_v52  ;;  %711 = vmatprep.mubr.bf16.mxu1 %v143_v56  ;;  %v1296_v3 = vld [vmem:[%s1870_s1 + $0x184] ss:$8 sps:$4 sm:$0xff]   ;;  %v1295_v4 = vld [vmem:[%s1870_s1 + $0x80] ss:$8 sps:$4 sm:$0xff]   ;;  %v1302_v5 = vld [vmem:[%s1870_s1 + $0x274] ss:$8 sps:$4 sm:$0xff]  }
  0x17   :  { %649 = vmatpush1.bf16.msra.mxu0 %v1235_v22  ;;  %v1299_v6 = vld [vmem:[%s1870_s1 + $0x180] ss:$8 sps:$4 sm:$0xff]   ;;  %v1300_v8 = vld [vmem:[%s1870_s1 + $0x270] ss:$8 sps:$4 sm:$0xff]   ;;  %v1306_v10 = vld [vmem:[%s1870_s1 + $0x264] ss:$8 sps:$4 sm:$0xff]  }
  0x18   :  { %650 = vmatprep.subr.bf16.mxu0 %v1239_v23  ;;  %690 = vmatpush1.bf16.msra.mxu1 %v1238_v24  ;;  %v1660_v11 = vld [vmem:[%s1871_s0 + $0x10] sm:$0xff]  ;;  %v1304_v13 = vld [vmem:[%s1870_s1 + $0x260] ss:$8 sps:$4 sm:$0xff]   ;;  %v1312_v17 = vld [vmem:[%s1870_s1 + $0x244] ss:$8 sps:$4 sm:$0xff]  }
  0x19   :  { %691 = vmatprep.subr.bf16.mxu1 %v1242_v25  ;;  %v136_v12 = vcombine.high %v1660_v11, %v1660_v11  ;;  %v1309_v15 = vld [vmem:[%s1870_s1 + $0x254] ss:$8 sps:$4 sm:$0xff]   ;;  %v1307_v16 = vld [vmem:[%s1870_s1 + $0x250] ss:$8 sps:$4 sm:$0xff]   ;;  %v1310_v18 = vld [vmem:[%s1870_s1 + $0x240] ss:$8 sps:$4 sm:$0xff]  }
  0x1a   :  { %v1315_v19 = vld [vmem:[%s1870_s1 + $0x234] ss:$8 sps:$4 sm:$0xff]   ;;  %v1313_v20 = vld [vmem:[%s1870_s1 + $0x230] ss:$8 sps:$4 sm:$0xff]   ;;  %v1318_v21 = vld [vmem:[%s1870_s1 + $0x224] ss:$8 sps:$4 sm:$0xff]  }
  0x1b   :  { %651 = vmatpush1.bf16.msra.mxu0 %v1241_v26  ;;  %v145_v14 = vpack.c.bf16 %v136_v12, %v136_v12  ;;  %v1316_v22 = vld [vmem:[%s1870_s1 + $0x220] ss:$8 sps:$4 sm:$0xff]   ;;  %v1321_v23 = vld [vmem:[%s1870_s1 + $0x214] ss:$8 sps:$4 sm:$0xff]   ;;  %v1319_v24 = vld [vmem:[%s1870_s1 + $0x210] ss:$8 sps:$4 sm:$0xff]  }
  0x1c   :  { %652 = vmatprep.subr.bf16.mxu0 %v1245_v27  ;;  %692 = vmatpush1.bf16.msra.mxu1 %v1244_v28  ;;  %v1324_v25 = vld [vmem:[%s1870_s1 + $0x204] ss:$8 sps:$4 sm:$0xff]   ;;  %v1322_v26 = vld [vmem:[%s1870_s1 + $0x200] ss:$8 sps:$4 sm:$0xff]   ;;  %v1327_v27 = vld [vmem:[%s1870_s1 + $0x2f4] ss:$8 sps:$4 sm:$0xff]  }
  0x1d   :  { %693 = vmatprep.subr.bf16.mxu1 %v1248_v29  ;;  %v1325_v28 = vld [vmem:[%s1870_s1 + $0x2f0] ss:$8 sps:$4 sm:$0xff]   ;;  %v1330_v29 = vld [vmem:[%s1870_s1 + $0x2e4] ss:$8 sps:$4 sm:$0xff]   ;;  %v1358_v48 = vld [vmem:[%s1872_s3 + $0x54] ss:$8 sps:$4 sm:$0xff]  }
  0x1e   :  { %v1355_v46 = vld [vmem:[%s1872_s3 + $0x64] ss:$8 sps:$4 sm:$0xff]   ;;  %v1364_v52 = vld [vmem:[%s1872_s3 + $0x34] ss:$8 sps:$4 sm:$0xff]   ;;  %v1362_v53 = vld [vmem:[%s1872_s3 + $0x30] ss:$8 sps:$4 sm:$0xff]  }
  0x1f   :  { %653 = vmatpush1.bf16.msra.mxu0 %v1247_v30  ;;  %v1328_v30 = vld [vmem:[%s1870_s1 + $0x2e0] ss:$8 sps:$4 sm:$0xff]   ;;  %v1361_v50 = vld [vmem:[%s1872_s3 + $0x44] ss:$8 sps:$4 sm:$0xff]   ;;  %v1370_v56 = vld [vmem:[%s1872_s3 + $0x14] ss:$8 sps:$4 sm:$0xff]  }
  0x20   :  { %654 = vmatprep.subr.bf16.mxu0 %v1251_v31  ;;  %694 = vmatpush1.bf16.msra.mxu1 %v1250_v32  ;;  %v1333_v31 = vld [vmem:[%s1870_s1 + $0x2d4] ss:$8 sps:$4 sm:$0xff]   ;;  %v1331_v32 = vld [vmem:[%s1870_s1 + $0x2d0] ss:$8 sps:$4 sm:$0xff]  }
  0x21   :  { %695 = vmatprep.subr.bf16.mxu1 %v1254_v33  ;;  %v1336_v33 = vld [vmem:[%s1870_s1 + $0x2c4] ss:$8 sps:$4 sm:$0xff]  }
  0x23   :  { %655 = vmatpush2.bf16.msra.mxu0 %v1253_v34  ;;  %v1334_v34 = vld [vmem:[%s1870_s1 + $0x2c0] ss:$8 sps:$4 sm:$0xff]  }
  0x24   :  { %656 = vmatprep.subr.bf16.mxu0 %v1257_v35  ;;  %696 = vmatpush2.bf16.msra.mxu1 %v1256_v36  ;;  %v1339_v35 = vld [vmem:[%s1870_s1 + $0x2b4] ss:$8 sps:$4 sm:$0xff]   ;;  %v1337_v36 = vld [vmem:[%s1870_s1 + $0x2b0] ss:$8 sps:$4 sm:$0xff]  }
  0x25   :  { %697 = vmatprep.subr.bf16.mxu1 %v1260_v37  ;;  %v1342_v37 = vld [vmem:[%s1870_s1 + $0x2a4] ss:$8 sps:$4 sm:$0xff]  }
  0x27   :  { %657 = vmatpush2.bf16.msra.mxu0 %v1259_v38  ;;  %v1340_v38 = vld [vmem:[%s1870_s1 + $0x2a0] ss:$8 sps:$4 sm:$0xff]  }
  0x28   :  { %658 = vmatprep.subr.bf16.mxu0 %v1263_v39  ;;  %698 = vmatpush2.bf16.msra.mxu1 %v1262_v40  ;;  %v1345_v39 = vld [vmem:[%s1870_s1 + $0x294] ss:$8 sps:$4 sm:$0xff]   ;;  %v1343_v40 = vld [vmem:[%s1870_s1 + $0x290] ss:$8 sps:$4 sm:$0xff]  }
  0x29   :  { %699 = vmatprep.subr.bf16.mxu1 %v1266_v41  ;;  %v1348_v41 = vld [vmem:[%s1870_s1 + $0x284] ss:$8 sps:$4 sm:$0xff]  }
  0x2b   :  { %659 = vmatpush2.bf16.msra.mxu0 %v1265_v42  ;;  %v1346_v42 = vld [vmem:[%s1870_s1 + $0x280] ss:$8 sps:$4 sm:$0xff]  }
  0x2c   :  { %660 = vmatprep.subr.bf16.mxu0 %v1269_v43  ;;  %700 = vmatpush2.bf16.msra.mxu1 %v1268_v44  ;;  %v144_v43 = vpack.c.bf16 %v1660_v11, %v1660_v11  ;;  %v1350_v44 = vld [vmem:[%s1872_s3 + $0x70] ss:$8 sps:$4 sm:$0xff]   ;;  %v1395_v11 = vld [vmem:[%s1872_s3 + $0x80] ss:$8 sps:$4 sm:$0xff]  }
  0x2d   :  { %701 = vmatprep.subr.bf16.mxu1 %v1272_v45  ;;  %v1352_v45 = vld [vmem:[%s1872_s3 + $0x74] ss:$8 sps:$4 sm:$0xff]  }
  0x2f   :  { %661 = vmatpush2.bf16.msra.mxu0 %v1271_v47  ;;  %v1353_v47 = vld [vmem:[%s1872_s3 + $0x60] ss:$8 sps:$4 sm:$0xff]  }
  0x30   :  { %662 = vmatprep.subr.bf16.mxu0 %v1275_v49  ;;  %702 = vmatpush2.bf16.msra.mxu1 %v1274_v51  ;;  %v1356_v49 = vld [vmem:[%s1872_s3 + $0x50] ss:$8 sps:$4 sm:$0xff]   ;;  %v1359_v51 = vld [vmem:[%s1872_s3 + $0x40] ss:$8 sps:$4 sm:$0xff]  }
  0x31   :  { %703 = vmatprep.subr.bf16.mxu1 %v1278_v54  ;;  %v1367_v54 = vld [vmem:[%s1872_s3 + $0x24] ss:$8 sps:$4 sm:$0xff]  }
  0x33   :  { %663 = vmatpush2.bf16.msra.mxu0 %v1277_v55  ;;  %v1365_v55 = vld [vmem:[%s1872_s3 + $0x20] ss:$8 sps:$4 sm:$0xff]  }
  0x34   :  { %664 = vmatprep.subr.bf16.mxu0 %v1281_v57  ;;  %704 = vmatpush2.bf16.msra.mxu1 %v1280_v58  ;;  %v1368_v57 = vld [vmem:[%s1872_s3 + $0x10] ss:$8 sps:$4 sm:$0xff]   ;;  %v1373_v58 = vld [vmem:[%s1872_s3 + $0x4] ss:$8 sps:$4 sm:$0xff]  }
  0x35   :  { %705 = vmatprep.subr.bf16.mxu1 %v1284_v59  ;;  %v1371_v59 = vld [vmem:[%s1872_s3] ss:$8 sps:$4 sm:$0xff]  }
  0x37   :  { %665 = vmatpush2.bf16.msra.mxu0 %v1283_v60  ;;  %v1376_v60 = vld [vmem:[%s1872_s3 + $0xf4] ss:$8 sps:$4 sm:$0xff]  }
  0x38   :  { %666 = vmatprep.subr.bf16.mxu0 %v1287_v61  ;;  %706 = vmatpush2.bf16.msra.mxu1 %v1286_v62  ;;  %v1374_v61 = vld [vmem:[%s1872_s3 + $0xf0] ss:$8 sps:$4 sm:$0xff]   ;;  %v1379_v62 = vld [vmem:[%s1872_s3 + $0xe4] ss:$8 sps:$4 sm:$0xff]  }
  0x39   :  { %707 = vmatprep.subr.bf16.mxu1 %v1290_v63  ;;  %v1377_v63 = vld [vmem:[%s1872_s3 + $0xe0] ss:$8 sps:$4 sm:$0xff]  }
  0x3b   :  { %667 = vmatpush2.bf16.msra.mxu0 %v1289_v0  ;;  %v1382_v0 = vld [vmem:[%s1872_s3 + $0xd4] ss:$8 sps:$4 sm:$0xff]  }
  0x3c   :  { %668 = vmatprep.subr.bf16.mxu0 %v1293_v1  ;;  %708 = vmatpush2.bf16.msra.mxu1 %v1292_v2  ;;  %v1380_v1 = vld [vmem:[%s1872_s3 + $0xd0] ss:$8 sps:$4 sm:$0xff]   ;;  %v1385_v2 = vld [vmem:[%s1872_s3 + $0xc4] ss:$8 sps:$4 sm:$0xff]  }
  0x3d   :  { %709 = vmatprep.subr.bf16.mxu1 %v1296_v3  ;;  %v1383_v3 = vld [vmem:[%s1872_s3 + $0xc0] ss:$8 sps:$4 sm:$0xff]  }
  0x3f   :  { %669 = vmatpush2.bf16.msra.mxu0 %v1295_v4  ;;  %v1388_v4 = vld [vmem:[%s1872_s3 + $0xb4] ss:$8 sps:$4 sm:$0xff]  }
  0x40   :  { %720 = vmatprep.subr.bf16.mxu0 %v1302_v5  ;;  %710 = vmatpush2.bf16.msra.mxu1 %v1299_v6  ;;  %v1386_v5 = vld [vmem:[%s1872_s3 + $0xb0] ss:$8 sps:$4 sm:$0xff]   ;;  %v1391_v6 = vld [vmem:[%s1872_s3 + $0xa4] ss:$8 sps:$4 sm:$0xff]  }
  0x41   :  { %967 = vmatprep.subr.bf16.mxu1 %v1352_v45 }
  0x42   :  { %671 = vmatmul.mubr.bf16.vlgmr.msra.gmra.mxu0 %v140_v7  ;;  %v1389_v7 = vld [vmem:[%s1872_s3 + $0xa0] ss:$8 sps:$4 sm:$0xff]  }
  0x43   :  { %721 = vmatpush1.bf16.msra.mxu0 %v1300_v8  ;;  %712 = vmatmul.mubr.bf16.vlgmr.msra.gmra.mxu1 %v142_v9  ;;  %v1394_v8 = vld [vmem:[%s1872_s3 + $0x94] ss:$8 sps:$4 sm:$0xff]   ;;  %v1392_v9 = vld [vmem:[%s1872_s3 + $0x90] ss:$8 sps:$4 sm:$0xff]  }
  0x44   :  { %722 = vmatprep.subr.bf16.mxu0 %v1306_v10  ;;  %752 = vmatprep.mubr.bf16.mxu0 %v145_v14  ;;  %v1397_v10 = vld [vmem:[%s1872_s3 + $0x84] ss:$8 sps:$4 sm:$0xff]  }
  0x45   :  { %968 = vmatpush1.bf16.msra.mxu1 %v1350_v44 }
  0x46   :  { %969 = vmatprep.subr.bf16.mxu1 %v1355_v46 }
  0x47   :  { %723 = vmatpush1.bf16.msra.mxu0 %v1304_v13 }
  0x48   :  { %724 = vmatprep.subr.bf16.mxu0 %v1309_v15 }
  0x49   :  { %970 = vmatpush1.bf16.msra.mxu1 %v1353_v47 }
  0x4a   :  { %971 = vmatprep.subr.bf16.mxu1 %v1358_v48  ;;  %v1008_v48 = vld [vmem:[%s1877_s5] sm:$0x3] }
  0x4b   :  { %725 = vmatpush1.bf16.msra.mxu0 %v1307_v16 }
  0x4c   :  { %726 = vmatprep.subr.bf16.mxu0 %v1312_v17 }
  0x4d   :  { %972 = vmatpush1.bf16.msra.mxu1 %v1356_v49 }
  0x4e   :  { %973 = vmatprep.subr.bf16.mxu1 %v1361_v50 }
  0x4f   :  { %727 = vmatpush1.bf16.msra.mxu0 %v1310_v18 }
  0x50   :  { %728 = vmatprep.subr.bf16.mxu0 %v1315_v19 }
  0x51   :  { %974 = vmatpush1.bf16.msra.mxu1 %v1359_v51 }
  0x52   :  { %975 = vmatprep.subr.bf16.mxu1 %v1364_v52 }
  0x53   :  { %729 = vmatpush1.bf16.msra.mxu0 %v1313_v20  ;;  %v148_v20 = vlaneseq }
  0x54   :  { %730 = vmatprep.subr.bf16.mxu0 %v1318_v21 }
  0x55   :  { %976 = vmatpush1.bf16.msra.mxu1 %v1362_v53  ;;  %v149_v21 = vshrl.u32 %v148_v20, 7 }
  0x56   :  { %977 = vmatprep.subr.bf16.mxu1 %v1367_v54 }
  0x57   :  { %731 = vmatpush1.bf16.msra.mxu0 %v1316_v22  ;;  %v150_v22 = vsub.s32 0, %v149_v21 }
  0x58   :  { %732 = vmatprep.subr.bf16.mxu0 %v1321_v23  ;;  %v146_v23 = vld [vmem:[%s1873_s2] sm:$0x3] }
  0x59   :  { %978 = vmatpush1.bf16.msra.mxu1 %v1365_v55  ;;  %v1044_v54 = vrot.slane %v1008_v48, %v150_v22 }
  0x5a   :  { %979 = vmatprep.subr.bf16.mxu1 %v1370_v56 }
  0x5b   :  { %733 = vmatpush1.bf16.msra.mxu0 %v1319_v24  ;;  %v154_v24 = vsub.s32 1, %v149_v21 }
  0x5c   :  { %734 = vmatprep.subr.bf16.mxu0 %v1324_v25  ;;  %v151_v25 = vrot.slane %v146_v23, %v150_v22 }
  0x5d   :  { %980 = vmatpush1.bf16.msra.mxu1 %v1368_v57  ;;  %v1009_v57 = vld [vmem:[%s1878_s6] sm:$0x3] }
  0x5e   :  { %981 = vmatprep.subr.bf16.mxu1 %v1373_v58 }
  0x5f   :  { %735 = vmatpush1.bf16.msra.mxu0 %v1322_v26  ;;  %v155_v26 = vrot.slane %v146_v23, %v154_v24 }
  0x60   :  { %736 = vmatprep.subr.bf16.mxu0 %v1327_v27 }
  0x61   :  { %982 = vmatpush1.bf16.msra.mxu1 %v1371_v59 }
  0x62   :  { %983 = vmatprep.subr.bf16.mxu1 %v1376_v60 }
  0x63   :  { %737 = vmatpush2.bf16.msra.mxu0 %v1325_v28 }
  0x64   :  { %738 = vmatprep.subr.bf16.mxu0 %v1330_v29 }
  0x65   :  { %984 = vmatpush2.bf16.msra.mxu1 %v1374_v61  ;;  %v1048_v61 = vrot.slane %v1008_v48, %v154_v24 }
  0x66   :  { %985 = vmatprep.subr.bf16.mxu1 %v1379_v62 }
  0x67   :  { %739 = vmatpush2.bf16.msra.mxu0 %v1328_v30 }
  0x68   :  { %740 = vmatprep.subr.bf16.mxu0 %v1333_v31 }
  0x69   :  { %986 = vmatpush2.bf16.msra.mxu1 %v1377_v63 }
  0x6a   :  { %987 = vmatprep.subr.bf16.mxu1 %v1382_v0  ;;  %v1057_v0 = vrot.slane %v1009_v57, %v150_v22 }
  0x6b   :  { %741 = vmatpush2.bf16.msra.mxu0 %v1331_v32 }
  0x6c   :  { %742 = vmatprep.subr.bf16.mxu0 %v1336_v33 }
  0x6d   :  { %988 = vmatpush2.bf16.msra.mxu1 %v1380_v1 }
  0x6e   :  { %989 = vmatprep.subr.bf16.mxu1 %v1385_v2  ;;  %v1061_v2 = vrot.slane %v1009_v57, %v154_v24 }
  0x6f   :  { %743 = vmatpush2.bf16.msra.mxu0 %v1334_v34 }
  0x70   :  { %744 = vmatprep.subr.bf16.mxu0 %v1339_v35 }
  0x71   :  { %990 = vmatpush2.bf16.msra.mxu1 %v1383_v3 }
  0x72   :  { %991 = vmatprep.subr.bf16.mxu1 %v1388_v4 }
  0x73   :  { %745 = vmatpush2.bf16.msra.mxu0 %v1337_v36 }
  0x74   :  { %746 = vmatprep.subr.bf16.mxu0 %v1342_v37 }
  0x75   :  { %992 = vmatpush2.bf16.msra.mxu1 %v1386_v5 }
  0x76   :  { %993 = vmatprep.subr.bf16.mxu1 %v1391_v6 }
  0x77   :  { %747 = vmatpush2.bf16.msra.mxu0 %v1340_v38 }
  0x78   :  { %748 = vmatprep.subr.bf16.mxu0 %v1345_v39  ;;  %v1011_v39 = vld [vmem:[%s1874_s8] sm:$0x3] }
  0x79   :  { %994 = vmatpush2.bf16.msra.mxu1 %v1389_v7 }
  0x7a   :  { %995 = vmatprep.subr.bf16.mxu1 %v1394_v8 }
  0x7b   :  { %749 = vmatpush2.bf16.msra.mxu0 %v1343_v40  ;;  %v1025_v40 = vadd.f32 1e-05, %v1011_v39 }
  0x7c   :  { %750 = vmatprep.subr.bf16.mxu0 %v1348_v41  ;;  %v795_v41 = vld [vmem:[%s1875_s4] sm:$0x3] }
  0x7d   :  { %996 = vmatpush2.bf16.msra.mxu1 %v1392_v9  ;;  %1398 = vrsqrt.f32 %v1025_v40  ;;  %v804_v46 = vrot.slane %v795_v41, %v154_v24 }
  0x7e   :  { %997 = vmatprep.subr.bf16.mxu1 %v1397_v10 }
  0x7f   :  { %751 = vmatpush2.bf16.msra.mxu0 %v1346_v42  ;;  %v1010_v42 = vld [vmem:[%s1876_s7] sm:$0x3] }
  0x80   :  { %v1016_v45 = vrot.slane %v1010_v42, %v150_v22  ;;  %v1020_v51 = vrot.slane %v1010_v42, %v154_v24 }
  0x81   :  { %998 = vmatpush2.bf16.msra.mxu1 %v1395_v11 }
  0x82   :  { %753 = vmatmul.mubr.bf16.vlgmr.msra.gmra.mxu0 %v144_v43  ;;  %v800_v43 = vrot.slane %v795_v41, %v150_v22 }
  0x8a   :  { %v1399_v44 = vpop.eup %1398 }
  0x8b   :  { %v1031_v50 = vrot.slane %v1399_v44, %v150_v22  ;;  %v1035_v56 = vrot.slane %v1399_v44, %v154_v24 }
 0x102   :  { %v672_v12 = vpop.f32.mrf.mxu0 }
 0x103   :  { %v713_v14 = vpop.f32.mrf.mxu1  ;;  %v673_v27 = vadd.f32 %v672_v12, %v151_v25 }
 0x104   :  { %v674_v13 = vpop.f32.mrf.mxu0 }
 0x105   :  { %v715_v16 = vpop.f32.mrf.mxu1  ;;  %v675_v28 = vadd.f32 %v674_v13, %v155_v26  ;;  %v714_v29 = vadd.f32 %v713_v14, %v673_v27 }
 0x106   :  { %v676_v15 = vpop.f32.mrf.mxu0 }
 0x107   :  { %v717_v18 = vpop.f32.mrf.mxu1  ;;  %v716_v31 = vadd.f32 %v715_v16, %v675_v28 }
 0x108   :  { %v677_v17 = vpop.f32.mrf.mxu0 }
 0x109   :  { %v718_v19 = vpop.f32.mrf.mxu1 }
 0x142   :  { %v754_v30 = vpop.f32.mrf.mxu0 }
 0x143   :  { %v755_v32 = vadd.f32 %v754_v30, %v714_v29 }
 0x144   :  { %v756_v33 = vpop.f32.mrf.mxu0 }
 0x145   :  { %v757_v34 = vadd.f32 %v756_v33, %v716_v31  ;;  %v793_v37 = vpack.c.bf16 %v755_v32, %v755_v32 }
 0x146   :  { %v758_v35 = vpop.f32.mrf.mxu0 }
 0x147   :  { %v794_v36 = vpack.c.bf16 %v757_v34, %v757_v34 }
 0x148   :  { %v759_v38 = vpop.f32.mrf.mxu0 }
 0x149   :  { %999 = vmatprep.mubr.bf16.mxu1 %v794_v36 }
 0x14a   :  { %1000 = vmatmul.mubr.bf16.vlgmr.msra.gmra.mxu1 %v793_v37 }
 0x20a   :  { %v1001_v47 = vpop.f32.mrf.mxu1 }
 0x20b   :  { %v1002_v49 = vadd.f32 %v1001_v47, %v800_v43 }
 0x20c   :  { %v1003_v52 = vpop.f32.mrf.mxu1 }
 0x20d   :  { %v1023_v53 = vsub.f32 %v1002_v49, %v1016_v45  ;;  %v1004_v55 = vadd.f32 %v1003_v52, %v804_v46 }
 0x20e   :  { %v1005_v58 = vpop.f32.mrf.mxu1 }
 0x20f   :  { %v1038_v59 = vmul.f32 %v1031_v50, %v1023_v53  ;;  %v1024_v60 = vsub.f32 %v1004_v55, %v1020_v51 }
 0x210   :  { %v1006_v62 = vpop.f32.mrf.mxu1 }
 0x211   :  { %v1051_v63 = vmul.f32 %v1044_v54, %v1038_v59  ;;  %v1039_v1 = vmul.f32 %v1035_v56, %v1024_v60 }
 0x213   :  { %v1052_v3 = vmul.f32 %v1048_v61, %v1039_v1  ;;  %v1064_v4 = vadd.f32 %v1057_v0, %v1051_v63 }
 0x215   :  { %v1065_v5 = vadd.f32 %v1061_v2, %v1052_v3 }
 0x217   :  { %v1068_v6 = vcombine.low %v1064_v4, %v1065_v5 }
 0x219   :  { %1070 = vst [vmem:[%s1879_s9] sm:$0xff] %v1068_v6 }

// kernel: _forward_core.11
= control target key start
LH: loop header
LB: loop body
LE: loop exit
PB: predicated region body
PF: predicated region fallthrough
CT: control target
= control target key end

     0   :  { %18 = vsyncpa [#allocation3], 0  ;;  %s961_s0 = inlined_call_operand.vmem [shape: f32[2,256], index: 0, kind: input, shape index: {}]   ;;  %s962_s1 = inlined_call_operand.vmem [shape: bf16[256,256], index: 1, kind: input, shape index: {}]   ;;  %s963_s2 = inlined_call_operand.vmem [shape: f32[1,256], index: 2, kind: input, shape index: {}]   ;;  %s964_s3 = inlined_call_operand.vmem [shape: f32[1,256], index: 3, kind: input, shape index: {}]   ;;  %s965_s4 = inlined_call_operand.vmem [shape: f32[1,256], index: 4, kind: input, shape index: {}]   ;;  %s966_s5 = inlined_call_operand.vmem [shape: f32[1,256], index: 5, kind: input, shape index: {}]   ;;  %s967_s6 = inlined_call_operand.vmem [shape: f32[1,256], index: 6, kind: input, shape index: {}]   ;;  %s968_s7 = inlined_call_operand.vmem [shape: f32[2,256], index: 7, kind: input, shape index: {}]   ;;  %s969_s8 = inlined_call_operand.vmem [shape: f32[2,256], index: 8, kind: input, shape index: {}]   ;;  %s970_s9 = inlined_call_operand.vmem [shape: f32[2,2,256], index: 9, kind: input, shape index: {}]   ;;  %s971_s10 = inlined_call_operand.vmem [shape: s32[2,1], index: 10, kind: input, shape index: {}]   ;;  %s972_s11 = inlined_call_operand.hbm [shape: f32[2,2], index: 11, kind: output, shape index: {0}]   ;;  %s973_s12 = inlined_call_operand.hbm [shape: f32[1,1], index: 12, kind: output, shape index: {1}]  }
   0x1   :  { %v620_v0 = vld [vmem:[%s962_s1 + $0x74] ss:$8 sps:$4 sm:$0xff]   ;;  %v622_v1 = vld [vmem:[%s962_s1 + $0x70] ss:$8 sps:$4 sm:$0xff]   ;;  %v623_v2 = vld [vmem:[%s962_s1 + $0x64] ss:$8 sps:$4 sm:$0xff]  }
   0x2   :  { %260 = vmatprep.subr.bf16.mxu0 %v620_v0  ;;  %v625_v3 = vld [vmem:[%s962_s1 + $0x60] ss:$8 sps:$4 sm:$0xff]   ;;  %v626_v4 = vld [vmem:[%s962_s1 + $0x54] ss:$8 sps:$4 sm:$0xff]   ;;  %v628_v5 = vld [vmem:[%s962_s1 + $0x50] ss:$8 sps:$4 sm:$0xff]  }
   0x3   :  { %261 = vmatpush1.bf16.msra.mxu0 %v622_v1  ;;  %v629_v6 = vld [vmem:[%s962_s1 + $0x44] ss:$8 sps:$4 sm:$0xff]   ;;  %v631_v7 = vld [vmem:[%s962_s1 + $0x40] ss:$8 sps:$4 sm:$0xff]   ;;  %v632_v8 = vld [vmem:[%s962_s1 + $0x34] ss:$8 sps:$4 sm:$0xff]  }
   0x4   :  { %262 = vmatprep.subr.bf16.mxu0 %v623_v2  ;;  %v634_v9 = vld [vmem:[%s962_s1 + $0x30] ss:$8 sps:$4 sm:$0xff]   ;;  %v635_v10 = vld [vmem:[%s962_s1 + $0x24] ss:$8 sps:$4 sm:$0xff]   ;;  %v637_v11 = vld [vmem:[%s962_s1 + $0x20] ss:$8 sps:$4 sm:$0xff]  }
   0x5   :  { %v638_v12 = vld [vmem:[%s962_s1 + $0x14] ss:$8 sps:$4 sm:$0xff]   ;;  %v576_v13 = vld.sshfl [vmem:[%s961_s0] sm:$0x33 pattern:$0x76325410] }
   0x6   :  { %v83_v14 = vcombine.high %v576_v13, %v576_v13 }
   0x7   :  { %263 = vmatpush1.bf16.msra.mxu0 %v625_v3 }
   0x8   :  { %264 = vmatprep.subr.bf16.mxu0 %v626_v4 }
   0xb   :  { %265 = vmatpush1.bf16.msra.mxu0 %v628_v5 }
   0xc   :  { %266 = vmatprep.subr.bf16.mxu0 %v629_v6 }
   0xf   :  { %267 = vmatpush1.bf16.msra.mxu0 %v631_v7 }
  0x10   :  { %268 = vmatprep.subr.bf16.mxu0 %v632_v8 }
  0x13   :  { %269 = vmatpush1.bf16.msra.mxu0 %v634_v9 }
  0x14   :  { %270 = vmatprep.subr.bf16.mxu0 %v635_v10 }
  0x15   :  { %19 = vsyncpa [#allocation5], 0  ;;  %v640_v15 = vld [vmem:[%s962_s1 + $0x10] ss:$8 sps:$4 sm:$0xff]   ;;  %v641_v16 = vld [vmem:[%s962_s1 + $0x4] ss:$8 sps:$4 sm:$0xff]   ;;  %v87_v17 = vpack.c.bf16 %v83_v14, %v83_v14  ;;  %v86_v35 = vpack.c.bf16 %v576_v13, %v576_v13  ;;  %v90_v38 = vlaneseq }
  0x16   :  { %v643_v18 = vld [vmem:[%s962_s1] ss:$8 sps:$4 sm:$0xff]   ;;  %v644_v19 = vld [vmem:[%s962_s1 + $0xf4] ss:$8 sps:$4 sm:$0xff]   ;;  %v646_v20 = vld [vmem:[%s962_s1 + $0xf0] ss:$8 sps:$4 sm:$0xff]  }
  0x17   :  { %271 = vmatpush1.bf16.msra.mxu0 %v637_v11  ;;  %292 = vmatprep.mubr.bf16.mxu0 %v87_v17  ;;  %v647_v21 = vld [vmem:[%s962_s1 + $0xe4] ss:$8 sps:$4 sm:$0xff]   ;;  %v649_v22 = vld [vmem:[%s962_s1 + $0xe0] ss:$8 sps:$4 sm:$0xff]   ;;  %v650_v23 = vld [vmem:[%s962_s1 + $0xd4] ss:$8 sps:$4 sm:$0xff]  }
  0x18   :  { %272 = vmatprep.subr.bf16.mxu0 %v638_v12  ;;  %v652_v24 = vld [vmem:[%s962_s1 + $0xd0] ss:$8 sps:$4 sm:$0xff]   ;;  %v653_v25 = vld [vmem:[%s962_s1 + $0xc4] ss:$8 sps:$4 sm:$0xff]   ;;  %v655_v26 = vld [vmem:[%s962_s1 + $0xc0] ss:$8 sps:$4 sm:$0xff]  }
  0x19   :  { %v656_v27 = vld [vmem:[%s962_s1 + $0xb4] ss:$8 sps:$4 sm:$0xff]   ;;  %v658_v28 = vld [vmem:[%s962_s1 + $0xb0] ss:$8 sps:$4 sm:$0xff]   ;;  %v659_v29 = vld [vmem:[%s962_s1 + $0xa4] ss:$8 sps:$4 sm:$0xff]  }
  0x1a   :  { %v661_v30 = vld [vmem:[%s962_s1 + $0xa0] ss:$8 sps:$4 sm:$0xff]   ;;  %v662_v31 = vld [vmem:[%s962_s1 + $0x94] ss:$8 sps:$4 sm:$0xff]   ;;  %v664_v32 = vld [vmem:[%s962_s1 + $0x90] ss:$8 sps:$4 sm:$0xff]  }
  0x1b   :  { %273 = vmatpush1.bf16.msra.mxu0 %v640_v15  ;;  %v665_v33 = vld [vmem:[%s962_s1 + $0x84] ss:$8 sps:$4 sm:$0xff]   ;;  %v667_v34 = vld [vmem:[%s962_s1 + $0x80] ss:$8 sps:$4 sm:$0xff]   ;;  %v894_v39 = vshrl.u32 %v90_v38, 7  ;;  %vm451_vm0 = vcmask 1041408  }
  0x1c   :  { %274 = vmatprep.subr.bf16.mxu0 %v641_v16  ;;  %v304_v36 = vld [vmem:[%s967_s6] sm:$0x3]  ;;  %v720_v5 = vmov 1983009808   ;;  %v721_v12 = vmov 1966171168  }
  0x1d   :  { %v318_v37 = vadd.f32 1e-05, %v304_v36  ;;  %v897_v40 = vsub.s32 0, %v894_v39  ;;  %v88_v41 = vld [vmem:[%s963_s2] sm:$0x3]  ;;  %v903_v42 = vsub.s32 1, %v894_v39  ;;  %v430_v6 = vunpack.c.l.s4 %v720_v5 }
  0x1e   :  { %v303_v43 = vld [vmem:[%s966_s5] sm:$0x3]  ;;  %v389_v13 = vunpack.c.l.s4 %v721_v12  ;;  %vm470_vm1 = vcmask 1041409   ;;  %vm473_vm2 = vcmask 9216   ;;  %vm531_vm4 = vcmask 1024  }
  0x1f   :  { %275 = vmatpush1.bf16.msra.mxu0 %v643_v18  ;;  %668 = vrsqrt.f32 %v318_v37  ;;  %v93_v44 = vrot.slane %v88_v41, %v897_v40  ;;  %v309_v46 = vrot.slane %v303_v43, %v897_v40  ;;  %v97_v47 = vrot.slane %v88_v41, %v903_v42  ;;  %v301_v49 = vld [vmem:[%s964_s3] sm:$0x3] }
  0x20   :  { %276 = vmatprep.subr.bf16.mxu0 %v644_v19  ;;  %v313_v52 = vrot.slane %v303_v43, %v903_v42  ;;  %v302_v53 = vld [vmem:[%s965_s4] sm:$0x3]  ;;  %v337_v56 = vrot.slane %v301_v49, %v897_v40  ;;  %v341_v0 = vrot.slane %v301_v49, %v903_v42  ;;  %v431_v14 = vunpack.c.0.s8 %v430_v6 }
  0x21   :  { %v350_v61 = vrot.slane %v302_v53, %v897_v40  ;;  %v359_v62 = vld [vmem:[%s968_s7] sm:$0xf]  ;;  %v354_v4 = vrot.slane %v302_v53, %v903_v42 }
  0x22   :  { %v364_v7 = vrot.slane %v359_v62, 2  ;;  %v360_v10 = vld [vmem:[%s969_s8] sm:$0xf] }
  0x23   :  { %277 = vmatpush2.bf16.msra.mxu0 %v646_v20  ;;  %v371_v17 = vrot.slane %v360_v10, 2  ;;  %v390_v20 = vunpack.c.0.s8 %v389_v13 }
  0x24   :  { %278 = vmatprep.subr.bf16.mxu0 %v647_v21  ;;  %v434_v21 = vsub.s32 %v431_v14, %v894_v39 }
  0x27   :  { %279 = vmatpush2.bf16.msra.mxu0 %v649_v22 }
  0x28   :  { %280 = vmatprep.subr.bf16.mxu0 %v650_v23 }
  0x2b   :  { %281 = vmatpush2.bf16.msra.mxu0 %v652_v24 }
  0x2c   :  { %282 = vmatprep.subr.bf16.mxu0 %v653_v25  ;;  %v669_v45 = vpop.eup %668 }
  0x2d   :  { %v324_v51 = vrot.slane %v669_v45, %v897_v40  ;;  %v328_v58 = vrot.slane %v669_v45, %v903_v42 }
  0x2f   :  { %283 = vmatpush2.bf16.msra.mxu0 %v655_v26  ;;  %v385_v26 = vld [vmem:[%s970_s9] sm:$0xf] }
  0x30   :  { %284 = vmatprep.subr.bf16.mxu0 %v656_v27 }
  0x33   :  { %285 = vmatpush2.bf16.msra.mxu0 %v658_v28 }
  0x34   :  { %286 = vmatprep.subr.bf16.mxu0 %v659_v29 }
  0x37   :  { %287 = vmatpush2.bf16.msra.mxu0 %v661_v30 }
  0x38   :  { %288 = vmatprep.subr.bf16.mxu0 %v662_v31  ;;  %v386_v31 = vld [vmem:[%s970_s9 + $0x4] sm:$0xf] }
  0x39   :  { %v443_v41 = vrot.slane %v386_v31, %v434_v21 }
  0x3b   :  { %289 = vmatpush2.bf16.msra.mxu0 %v664_v32  ;;  %v393_v32 = vsub.s32 %v390_v20, %v894_v39 }
  0x3c   :  { %290 = vmatprep.subr.bf16.mxu0 %v665_v33  ;;  %v435_v33 = vrot.slane %v385_v26, %v434_v21  ;;  %v723_v21 = vmov 0.0  }
  0x3f   :  { %291 = vmatpush2.bf16.msra.mxu0 %v667_v34 }
  0x42   :  { %293 = vmatmul.mubr.bf16.vlgmr.msra.gmra.mxu0 %v86_v35 }
 0x102   :  { %v294_v48 = vpop.f32.mrf.mxu0 }
 0x103   :  { %v295_v50 = vadd.f32 %v294_v48, %v93_v44  ;;  %v444_v48 = vcombine.high %v443_v41, %v443_v41 }
 0x104   :  { %v296_v54 = vpop.f32.mrf.mxu0 }
 0x105   :  { %v316_v55 = vsub.f32 %v295_v50, %v309_v46  ;;  %v297_v57 = vadd.f32 %v296_v54, %v97_v47  ;;  %v436_v47 = vcombine.high %v435_v33, %v435_v33 }
 0x106   :  { %v298_v59 = vpop.f32.mrf.mxu0 }
 0x107   :  { %v331_v60 = vmul.f32 %v324_v51, %v316_v55  ;;  %v317_v63 = vsub.f32 %v297_v57, %v313_v52 }
 0x108   :  { %v299_v1 = vpop.f32.mrf.mxu0 }
 0x109   :  { %v344_v2 = vmul.f32 %v337_v56, %v331_v60  ;;  %v332_v3 = vmul.f32 %v328_v58, %v317_v63  ;;  %v461_v63 = vand.u32 127, %v90_v38 }
 0x10b   :  { %v357_v8 = vadd.f32 %v350_v61, %v344_v2  ;;  %v345_v9 = vmul.f32 %v341_v0, %v332_v3  ;;  %v464_v1 = vsub.s32 %v461_v63, %v894_v39 }
 0x10d   :  { %v358_v11 = vadd.f32 %v354_v4, %v345_v9  ;;  %v361_v15 = vmul.f32 %v359_v62, %v357_v8  ;;  %v369_v16 = vmul.f32 %v364_v7, %v357_v8 }
 0x10f   :  { %v366_v18 = vmul.f32 %v364_v7, %v358_v11  ;;  %v375_v19 = vmul.f32 %v359_v62, %v358_v11  ;;  %v362_v22 = vmul.f32 %v361_v15, %v360_v10  ;;  %v378_v23 = vmul.f32 %v369_v16, %v360_v10 }
 0x110   :  { %v373_v27 = vmul.f32 %v371_v17, %v369_v16  ;;  %v381_v28 = vmul.f32 %v371_v17, %v361_v15  ;;  %v722_v7 = vmov 0   ;;  %v475_v15 = vld [vmem:[%s971_s10] sm:$0x3]  ;;  %s724_s10 = smov [#allocation2]  }
 0x111   :  { %v367_v24 = vmul.f32 %v366_v18, %v360_v10  ;;  %v379_v25 = vmul.f32 %v375_v19, %v360_v10  ;;  %v376_v35 = vmul.f32 %v375_v19, %v371_v17  ;;  %v383_v37 = vmul.f32 %v371_v17, %v366_v18  ;;  %619 = vset.pattern.permute.xlu0 %v722_v7  ;;  %s554_s23 = sshll.u32 %s724_s10, 4  ;;  %s555_s23 = int_to_ptr.vmem [resolvable:$true] %s554_s23 }
 0x112   :  { %618 = vset.pattern.permute.xlu1 %v722_v7  ;;  %s676_s24 = scalar_lea.vmem %s555_s23, 32  ;;  %p681_p1 = scmp.lt.s32.totalorder %s555_s23, %s555_s23 }
 0x113   :  { %v368_v29 = vsub.f32 %v362_v22, %v367_v24  ;;  %v380_v30 = vsub.f32 %v378_v23, %v379_v25  ;;  %p677_p0 = scmp.ne.s32.totalorder %s555_s23, %s676_s24  ;;  %p682_p2 = scmp.lt.s32.totalorder %s676_s24, %s676_s24 }
 0x115   :  { %v374_v34 = vsub.f32 %v368_v29, %v373_v27  ;;  %v382_v36 = vadd.f32 %v381_v28, %v380_v30  ;;  %p683_p3 = por %p682_p2, %p681_p1 }
 0x117   :  { %v377_v43 = vadd.f32 %v376_v35, %v374_v34  ;;  %v384_v44 = vsub.f32 %v382_v36, %v383_v37  ;;  %p684_p4 = pnand %p683_p3, %p677_p0 }
 0x119   :  { %v394_v45 = vrot.slane %v377_v43, %v393_v32  ;;  %v415_v46 = vrot.slane %v384_v44, %v393_v32 }
 0x11b   :  { %v399_v49 = vrot.slane %v394_v45, %v897_v40  ;;  %v420_v50 = vrot.slane %v415_v46, %v897_v40  ;;  %v395_v51 = vcombine.high %v394_v45, %v394_v45  ;;  %v416_v52 = vcombine.high %v415_v46, %v415_v46 }
 0x11d   :  { %v406_v53 = vmul.f32 %v399_v49, %v385_v26  ;;  %v447_v54 = vmul.f32 %v436_v47, %v420_v50  ;;  %v403_v55 = vrot.slane %v395_v51, %v897_v40  ;;  %v424_v56 = vrot.slane %v416_v52, %v897_v40 }
 0x11f   :  { %v449_v57 = vadd.f32 %v447_v54, %v406_v53  ;;  %v407_v58 = vmul.f32 %v403_v55, %v386_v31  ;;  %v448_v59 = vmul.f32 %v444_v48, %v424_v56 }
 0x121   :  { %v452_v60 = vsel %vm451_vm0, %v449_v57, 0.0  ;;  %v450_v61 = vadd.f32 %v448_v59, %v407_v58 }
 0x122   :  { %453 = vadd.xlane.f32.xlu0 %v452_v60 }
 0x123   :  { %v455_v62 = vsel %vm451_vm0, %v450_v61, 0.0 }
 0x126   :  { %456 = vadd.xlane.f32.xlu0 %v455_v62 }
 0x1ab   :  { %v454_v0 = vpop.xlane.xlu0 %453 }
 0x1ac   :  { %v465_v3 = vrot.slane %v454_v0, %v464_v1 }
 0x1af   :  { %v457_v2 = vpop.xlane.xlu0 %456 }
 0x1b0   :  { %v469_v4 = vrot.slane %v457_v2, %v464_v1 }
 0x1b2   :  { %v471_v5 = vsel %vm470_vm1, %v469_v4, %v465_v3 }
 0x1b3   :  { %v476_v6 = vsel %vm473_vm2, %v471_v5, -inf  ;;  %474 = vst.msk [vmem:[#allocation2] sm:$0x3] %vm473_vm2, %v471_v5 }
 0x1b4   :  { %477 = vmax.xlane.f32.xlu1 %v476_v6 }
 0x23d   :  { %v478_v8 = vpop.xlane.xlu1 %477 }
 0x23e   :  { %v483_v38 = vrot.slane %v478_v8, %v897_v40  ;;  %v487_v39 = vrot.slane %v478_v8, %v903_v42 }
 0x240   :  { %v490_v9 = vsub.f32 %v454_v0, %v483_v38  ;;  %v491_v10 = vsub.f32 %v457_v2, %v487_v39 }
 0x242   :  { %v492_v11 = vmul.f32 1.442695, %v490_v9  ;;  %v494_v12 = vmul.f32 1.442695, %v491_v10 }
 0x244   :  { %670 = vpow2.f32 %v492_v11 }
 0x245   :  { %672 = vpow2.f32 %v494_v12 }
 0x251   :  { %v671_v13 = vpop.eup %670 }
 0x252   :  { %v673_v14 = vpop.eup %672  ;;  %499 = vperm.xlu1 %618, %v671_v13  }
 0x253   :  { %502 = vperm.xlu0 %619, %v673_v14  }
 0x256   :  { %521 = vperm.xlu1 %618, %v475_v15  }
 0x2cd   :  { %v500_v16 = vpop.permute.xlu1 %499 }
 0x2ce   :  { %v503_v17 = vpop.permute.xlu0 %502  ;;  %v507_v40 = vrot.slane %v500_v16, %v464_v1 }
 0x2cf   :  { %v511_v18 = vrot.slane %v503_v17, %v464_v1 }
 0x2d1   :  { %v522_v42 = vpop.permute.xlu1 %521  ;;  %v512_v19 = vsel %vm470_vm1, %v511_v18, %v507_v40 }
 0x2d2   :  { %vm523_vm3 = vcmp.eq.s32.totalorder %v461_v63, %v522_v42  ;;  %v514_v20 = vsel %vm473_vm2, %v512_v19, 0.0 }
 0x2d3   :  { %v609_v22 = vsel %vm523_vm3, 1.0, %v723_v21  ;;  %515 = vadd.xlane.f32.xlu1 %v514_v20 }
 0x2d4   :  { %v526_v23 = vmul.f32 %v609_v22, %v471_v5 }
 0x2d6   :  { %v527_v24 = vsel %vm473_vm2, %v526_v23, 0.0 }
 0x2d7   :  { %528 = vadd.xlane.f32.xlu0 %v527_v24 }
 0x35c   :  { %v516_v25 = vpop.xlane.xlu1 %515 }
 0x35d   :  { %674 = vlog2.f32 %v516_v25 }
 0x360   :  { %v529_v29 = vpop.xlane.xlu0 %528 }
 0x36a   :  { %v675_v26 = vpop.eup %674 }
 0x36b   :  { %v518_v27 = vmul.f32 0.6931472, %v675_v26 }
 0x36d   :  { %v519_v28 = vadd.f32 %v518_v27, %v478_v8 }
 0x36f   :  { %v530_v30 = vsub.f32 %v519_v28, %v529_v29 }
 0x371   :  { %v532_v31 = vsel %vm531_vm4, %v530_v30, 0.0 }
 0x372   :  { %533 = vadd.xlane.f32.xlu1 %v532_v31 }
 0x373   :  { %687 = shalt.err (!%p684_p4)
}
 0x374   :  { %557 = dma.vmem_to_hbm [thread:$0]  %s555_s23, 32, %s972_s11, [#allocation3]   ;;  %vm546_vm5 = vcmask 0  }
 0x375   :  { %s725_s27 = smov [#allocation4]  }
 0x376   :  { %s564_s28 = sshll.u32 %s725_s27, 4  ;;  %s565_s28 = int_to_ptr.vmem [resolvable:$true] %s564_s28 }
 0x377   :  { %s696_s13 = scalar_lea.vmem %s565_s28, 16  ;;  %s700_s14 = scalar_lea.vmem %s565_s28, 32 }
 0x378   :  { %p697_p5 = scmp.ne.s32.totalorder %s565_s28, %s696_s13  ;;  %p701_p6 = scmp.lt.s32.totalorder %s565_s28, %s565_s28 }
 0x379   :  { %p702_p7 = scmp.lt.s32.totalorder %s700_s14, %s696_s13 }
 0x37b   :  { %p703_p8 = por %p702_p7, %p701_p6 }
 0x37d   :  { %p704_p9 = pnand %p703_p8, %p697_p5 }
 0x3fb   :  { %v534_v32 = vpop.xlane.xlu1 %533 }
 0x3fc   :  { %v535_v33 = vrot.slane %v534_v32, 4 }
 0x3fe   :  { %v536_v34 = vadd.f32 %v535_v33, %v534_v32 }
 0x400   :  { %v537_v35 = vrot.slane %v536_v34, 2 }
 0x402   :  { %v538_v36 = vadd.f32 %v537_v35, %v536_v34 }
 0x404   :  { %v539_v37 = vrot.slane %v538_v36, 1 }
 0x406   :  { %v540_v41 = vadd.f32 %v539_v37, %v538_v36 }
 0x408   :  { %610 = vpush %v540_v41 }
 0x439   :  { %s611_s29 = spop %610 }
 0x43a   :  { %s544_s30 = smul.f32 0.5, %s611_s29 }
 0x43c   :  { %v545_v43 = vstv %s544_s30 }
 0x43d   :  { %547 = vst.msk [vmem:[#allocation4] sm:$0x1] %vm546_vm5, %v545_v43 }
 0x43e   :  { %707 = shalt.err (!%p704_p9)
}
 0x43f   :  { %567 = dma.vmem_to_hbm [thread:$0]  %s565_s28, 16, %s973_s12, [#allocation5]  }
 0x440   :  { %716 = dma.done.wait [#allocation3], 32  }
 0x441   :  { %717 = vsyncadd [#allocation3], 4294967264 }
 0x442   :  { %718 = dma.done.wait [#allocation5], 16  }
 0x443   :  { %719 = vsyncadd [#allocation5], 4294967280 }
 0x444   :  { %574 = vsyncpa [#allocation3], 1 }
 0x445   :  { %575 = vsyncpa [#allocation5], 1 }

// kernel: _forward_core.9
= control target key start
LH: loop header
LB: loop body
LE: loop exit
PB: predicated region body
PF: predicated region fallthrough
CT: control target
= control target key end

     0   :  { %17 = vsyncpa [#allocation3], 0  ;;  %s1176_s0 = inlined_call_operand.vmem [shape: f32[2,256], index: 0, kind: input, shape index: {}]   ;;  %s1177_s1 = inlined_call_operand.vmem [shape: bf16[256,256], index: 1, kind: input, shape index: {}]   ;;  %s1178_s2 = inlined_call_operand.vmem [shape: f32[1,256], index: 2, kind: input, shape index: {}]   ;;  %s1179_s3 = inlined_call_operand.vmem [shape: f32[1,256], index: 3, kind: input, shape index: {}]   ;;  %s1180_s4 = inlined_call_operand.vmem [shape: f32[1,256], index: 4, kind: input, shape index: {}]   ;;  %s1181_s5 = inlined_call_operand.vmem [shape: f32[1,256], index: 5, kind: input, shape index: {}]   ;;  %s1182_s6 = inlined_call_operand.vmem [shape: f32[1,256], index: 6, kind: input, shape index: {}]   ;;  %s1183_s7 = inlined_call_operand.vmem [shape: f32[2,256], index: 7, kind: input, shape index: {}]   ;;  %s1184_s8 = inlined_call_operand.vmem [shape: f32[2,32,256], index: 8, kind: input, shape index: {}]   ;;  %s1185_s9 = inlined_call_operand.vmem [shape: s32[2,1], index: 9, kind: input, shape index: {}]   ;;  %s1186_s10 = inlined_call_operand.hbm [shape: f32[2,32], index: 10, kind: output, shape index: {0}]   ;;  %s1187_s11 = inlined_call_operand.hbm [shape: f32[1,1], index: 11, kind: output, shape index: {1}]  }
   0x1   :  { %v735_v0 = vld [vmem:[%s1177_s1 + $0x74] ss:$8 sps:$4 sm:$0xff]   ;;  %v737_v1 = vld [vmem:[%s1177_s1 + $0x70] ss:$8 sps:$4 sm:$0xff]   ;;  %v738_v2 = vld [vmem:[%s1177_s1 + $0x64] ss:$8 sps:$4 sm:$0xff]  }
   0x2   :  { %257 = vmatprep.subr.bf16.mxu0 %v735_v0  ;;  %v740_v3 = vld [vmem:[%s1177_s1 + $0x60] ss:$8 sps:$4 sm:$0xff]   ;;  %v741_v4 = vld [vmem:[%s1177_s1 + $0x54] ss:$8 sps:$4 sm:$0xff]   ;;  %v743_v5 = vld [vmem:[%s1177_s1 + $0x50] ss:$8 sps:$4 sm:$0xff]  }
   0x3   :  { %258 = vmatpush1.bf16.msra.mxu0 %v737_v1  ;;  %v744_v6 = vld [vmem:[%s1177_s1 + $0x44] ss:$8 sps:$4 sm:$0xff]   ;;  %v746_v7 = vld [vmem:[%s1177_s1 + $0x40] ss:$8 sps:$4 sm:$0xff]   ;;  %v747_v8 = vld [vmem:[%s1177_s1 + $0x34] ss:$8 sps:$4 sm:$0xff]  }
   0x4   :  { %259 = vmatprep.subr.bf16.mxu0 %v738_v2  ;;  %v749_v9 = vld [vmem:[%s1177_s1 + $0x30] ss:$8 sps:$4 sm:$0xff]   ;;  %v750_v10 = vld [vmem:[%s1177_s1 + $0x24] ss:$8 sps:$4 sm:$0xff]   ;;  %v752_v11 = vld [vmem:[%s1177_s1 + $0x20] ss:$8 sps:$4 sm:$0xff]  }
   0x5   :  { %v753_v12 = vld [vmem:[%s1177_s1 + $0x14] ss:$8 sps:$4 sm:$0xff]   ;;  %v692_v13 = vld.sshfl [vmem:[%s1176_s0] sm:$0x33 pattern:$0x76325410] }
   0x6   :  { %v80_v14 = vcombine.high %v692_v13, %v692_v13 }
   0x7   :  { %260 = vmatpush1.bf16.msra.mxu0 %v740_v3 }
   0x8   :  { %261 = vmatprep.subr.bf16.mxu0 %v741_v4 }
   0xb   :  { %262 = vmatpush1.bf16.msra.mxu0 %v743_v5 }
   0xc   :  { %263 = vmatprep.subr.bf16.mxu0 %v744_v6 }
   0xf   :  { %264 = vmatpush1.bf16.msra.mxu0 %v746_v7 }
  0x10   :  { %265 = vmatprep.subr.bf16.mxu0 %v747_v8 }
  0x13   :  { %266 = vmatpush1.bf16.msra.mxu0 %v749_v9 }
  0x14   :  { %267 = vmatprep.subr.bf16.mxu0 %v750_v10 }
  0x15   :  { %18 = vsyncpa [#allocation5], 0  ;;  %v755_v15 = vld [vmem:[%s1177_s1 + $0x10] ss:$8 sps:$4 sm:$0xff]   ;;  %v756_v16 = vld [vmem:[%s1177_s1 + $0x4] ss:$8 sps:$4 sm:$0xff]   ;;  %v84_v17 = vpack.c.bf16 %v80_v14, %v80_v14  ;;  %v83_v35 = vpack.c.bf16 %v692_v13, %v692_v13  ;;  %v87_v38 = vlaneseq }
  0x16   :  { %v758_v18 = vld [vmem:[%s1177_s1] ss:$8 sps:$4 sm:$0xff]   ;;  %v759_v19 = vld [vmem:[%s1177_s1 + $0xf4] ss:$8 sps:$4 sm:$0xff]   ;;  %v761_v20 = vld [vmem:[%s1177_s1 + $0xf0] ss:$8 sps:$4 sm:$0xff]  }
  0x17   :  { %268 = vmatpush1.bf16.msra.mxu0 %v752_v11  ;;  %289 = vmatprep.mubr.bf16.mxu0 %v84_v17  ;;  %v762_v21 = vld [vmem:[%s1177_s1 + $0xe4] ss:$8 sps:$4 sm:$0xff]   ;;  %v764_v22 = vld [vmem:[%s1177_s1 + $0xe0] ss:$8 sps:$4 sm:$0xff]   ;;  %v765_v23 = vld [vmem:[%s1177_s1 + $0xd4] ss:$8 sps:$4 sm:$0xff]  }
  0x18   :  { %269 = vmatprep.subr.bf16.mxu0 %v753_v12  ;;  %v767_v24 = vld [vmem:[%s1177_s1 + $0xd0] ss:$8 sps:$4 sm:$0xff]   ;;  %v768_v25 = vld [vmem:[%s1177_s1 + $0xc4] ss:$8 sps:$4 sm:$0xff]   ;;  %v770_v26 = vld [vmem:[%s1177_s1 + $0xc0] ss:$8 sps:$4 sm:$0xff]  }
  0x19   :  { %v771_v27 = vld [vmem:[%s1177_s1 + $0xb4] ss:$8 sps:$4 sm:$0xff]   ;;  %v773_v28 = vld [vmem:[%s1177_s1 + $0xb0] ss:$8 sps:$4 sm:$0xff]   ;;  %v774_v29 = vld [vmem:[%s1177_s1 + $0xa4] ss:$8 sps:$4 sm:$0xff]  }
  0x1a   :  { %v776_v30 = vld [vmem:[%s1177_s1 + $0xa0] ss:$8 sps:$4 sm:$0xff]   ;;  %v777_v31 = vld [vmem:[%s1177_s1 + $0x94] ss:$8 sps:$4 sm:$0xff]   ;;  %v779_v32 = vld [vmem:[%s1177_s1 + $0x90] ss:$8 sps:$4 sm:$0xff]  }
  0x1b   :  { %270 = vmatpush1.bf16.msra.mxu0 %v755_v15  ;;  %v780_v33 = vld [vmem:[%s1177_s1 + $0x84] ss:$8 sps:$4 sm:$0xff]   ;;  %v782_v34 = vld [vmem:[%s1177_s1 + $0x80] ss:$8 sps:$4 sm:$0xff]   ;;  %v1015_v39 = vshrl.u32 %v87_v38, 7  ;;  %vm479_vm0 = vcmask 130112  }
  0x1c   :  { %271 = vmatprep.subr.bf16.mxu0 %v756_v16  ;;  %v301_v36 = vld [vmem:[%s1182_s6] sm:$0x3]  ;;  %v847_v60 = vmov 1966171168   ;;  %vm486_vm1 = vcmask 195712   ;;  %vm493_vm2 = vcmask 261312  }
  0x1d   :  { %v315_v37 = vadd.f32 1e-05, %v301_v36  ;;  %v1018_v40 = vsub.s32 0, %v1015_v39  ;;  %v85_v41 = vld [vmem:[%s1178_s2] sm:$0x3]  ;;  %v1024_v42 = vsub.s32 1, %v1015_v39  ;;  %v384_v61 = vunpack.c.l.s4 %v847_v60 }
  0x1e   :  { %v300_v43 = vld [vmem:[%s1181_s5] sm:$0x3]  ;;  %v376_v36 = vld [vmem:[%s1184_s8 + $0x50] sm:$0xff]  ;;  %vm514_vm3 = vcmask 1041409   ;;  %vm517_vm4 = vcmask 254976   ;;  %vm647_vm6 = vcmask 1024  }
  0x1f   :  { %272 = vmatpush1.bf16.msra.mxu0 %v758_v18  ;;  %783 = vrsqrt.f32 %v315_v37  ;;  %v90_v44 = vrot.slane %v85_v41, %v1018_v40  ;;  %v306_v46 = vrot.slane %v300_v43, %v1018_v40  ;;  %v94_v47 = vrot.slane %v85_v41, %v1024_v42  ;;  %v298_v49 = vld [vmem:[%s1179_s3] sm:$0x3]  ;;  %v377_v37 = vld [vmem:[%s1184_s8 + $0x58] sm:$0xff] }
  0x20   :  { %273 = vmatprep.subr.bf16.mxu0 %v759_v19  ;;  %v310_v52 = vrot.slane %v300_v43, %v1024_v42  ;;  %v299_v53 = vld [vmem:[%s1180_s4] sm:$0x3]  ;;  %v334_v56 = vrot.slane %v298_v49, %v1018_v40  ;;  %v338_v1 = vrot.slane %v298_v49, %v1024_v42  ;;  %v385_v7 = vunpack.c.0.s8 %v384_v61  ;;  %v380_v61 = vld [vmem:[%s1184_s8 + $0x70] sm:$0xff] }
  0x21   :  { %v347_v63 = vrot.slane %v299_v53, %v1018_v40  ;;  %v356_v2 = vld [vmem:[%s1183_s7] sm:$0xf]  ;;  %v351_v6 = vrot.slane %v299_v53, %v1024_v42 }
  0x22   :  { %v359_v9 = vrot.slane %v356_v2, 2  ;;  %v388_v12 = vsub.s32 %v385_v7, %v1015_v39 }
  0x23   :  { %274 = vmatpush2.bf16.msra.mxu0 %v761_v20 }
  0x24   :  { %275 = vmatprep.subr.bf16.mxu0 %v762_v21  ;;  %v366_v21 = vld [vmem:[%s1184_s8] sm:$0xff] }
  0x27   :  { %276 = vmatpush2.bf16.msra.mxu0 %v764_v22  ;;  %v367_v22 = vld [vmem:[%s1184_s8 + $0x8] sm:$0xff] }
  0x28   :  { %277 = vmatprep.subr.bf16.mxu0 %v765_v23 }
  0x2b   :  { %278 = vmatpush2.bf16.msra.mxu0 %v767_v24 }
  0x2c   :  { %279 = vmatprep.subr.bf16.mxu0 %v768_v25  ;;  %v784_v45 = vpop.eup %783 }
  0x2d   :  { %v321_v51 = vrot.slane %v784_v45, %v1018_v40  ;;  %v325_v58 = vrot.slane %v784_v45, %v1024_v42 }
  0x2f   :  { %280 = vmatpush2.bf16.msra.mxu0 %v770_v26 }
  0x30   :  { %281 = vmatprep.subr.bf16.mxu0 %v771_v27  ;;  %v368_v27 = vld [vmem:[%s1184_s8 + $0x10] sm:$0xff] }
  0x33   :  { %282 = vmatpush2.bf16.msra.mxu0 %v773_v28  ;;  %v374_v28 = vld [vmem:[%s1184_s8 + $0x40] sm:$0xff] }
  0x34   :  { %283 = vmatprep.subr.bf16.mxu0 %v774_v29  ;;  %v375_v29 = vld [vmem:[%s1184_s8 + $0x48] sm:$0xff] }
  0x37   :  { %284 = vmatpush2.bf16.msra.mxu0 %v776_v30  ;;  %v369_v30 = vld [vmem:[%s1184_s8 + $0x18] sm:$0xff] }
  0x38   :  { %285 = vmatprep.subr.bf16.mxu0 %v777_v31 }
  0x3b   :  { %286 = vmatpush2.bf16.msra.mxu0 %v779_v32 }
  0x3c   :  { %287 = vmatprep.subr.bf16.mxu0 %v780_v33 }
  0x3f   :  { %288 = vmatpush2.bf16.msra.mxu0 %v782_v34 }
  0x42   :  { %290 = vmatmul.mubr.bf16.vlgmr.msra.gmra.mxu0 %v83_v35 }
 0x102   :  { %v291_v48 = vpop.f32.mrf.mxu0 }
 0x103   :  { %v292_v50 = vadd.f32 %v291_v48, %v90_v44 }
 0x104   :  { %v293_v54 = vpop.f32.mrf.mxu0 }
 0x105   :  { %v313_v55 = vsub.f32 %v292_v50, %v306_v46  ;;  %v294_v57 = vadd.f32 %v293_v54, %v94_v47  ;;  %v370_v46 = vld [vmem:[%s1184_s8 + $0x20] sm:$0xff]  ;;  %v371_v47 = vld [vmem:[%s1184_s8 + $0x28] sm:$0xff] }
 0x106   :  { %v295_v59 = vpop.f32.mrf.mxu0 }
 0x107   :  { %v328_v62 = vmul.f32 %v321_v51, %v313_v55  ;;  %v314_v0 = vsub.f32 %v294_v57, %v310_v52  ;;  %v378_v51 = vld [vmem:[%s1184_s8 + $0x60] sm:$0xff]  ;;  %v379_v52 = vld [vmem:[%s1184_s8 + $0x68] sm:$0xff]  ;;  %v373_v57 = vld [vmem:[%s1184_s8 + $0x38] sm:$0xff] }
 0x108   :  { %v296_v3 = vpop.f32.mrf.mxu0 }
 0x109   :  { %v341_v4 = vmul.f32 %v334_v56, %v328_v62  ;;  %v329_v5 = vmul.f32 %v325_v58, %v314_v0  ;;  %v372_v56 = vld [vmem:[%s1184_s8 + $0x30] sm:$0xff]  ;;  %v381_v62 = vld [vmem:[%s1184_s8 + $0x78] sm:$0xff] }
 0x10b   :  { %v354_v8 = vadd.f32 %v347_v63, %v341_v4  ;;  %v342_v10 = vmul.f32 %v338_v1, %v329_v5 }
 0x10d   :  { %v355_v11 = vadd.f32 %v351_v6, %v342_v10  ;;  %v357_v13 = vmul.f32 %v356_v2, %v354_v8  ;;  %v364_v14 = vmul.f32 %v359_v9, %v354_v8  ;;  %v1102_v8 = vand.u32 127, %v87_v38 }
 0x10f   :  { %v361_v15 = vmul.f32 %v359_v9, %v355_v11  ;;  %v363_v16 = vmul.f32 %v356_v2, %v355_v11  ;;  %v474_v10 = vadd.s32 4294967288, %v1102_v8  ;;  %v1115_v38 = vsub.s32 %v1102_v8, %v1015_v39 }
 0x111   :  { %v362_v17 = vsub.f32 %v357_v13, %v361_v15  ;;  %v365_v18 = vadd.f32 %v364_v14, %v363_v16  ;;  %v488_v13 = vadd.s32 4294967272, %v1102_v8  ;;  %v1108_v15 = vsub.s32 %v474_v10, %v1015_v39 }
 0x113   :  { %v389_v19 = vrot.slane %v362_v17, %v388_v12  ;;  %v416_v20 = vrot.slane %v365_v18, %v388_v12  ;;  %v481_v12 = vadd.s32 4294967280, %v1102_v8  ;;  %v1118_v18 = vsub.s32 %v488_v13, %v1015_v39 }
 0x115   :  { %v394_v23 = vrot.slane %v389_v19, %v1018_v40  ;;  %v421_v24 = vrot.slane %v416_v20, %v1018_v40  ;;  %v390_v25 = vcombine.high %v389_v19, %v389_v19  ;;  %v417_v26 = vcombine.high %v416_v20, %v416_v20 }
 0x116   :  { %v1111_v16 = vsub.s32 %v481_v12, %v1015_v39 }
 0x117   :  { %v401_v31 = vmul.f32 %v394_v23, %v366_v21  ;;  %v428_v32 = vmul.f32 %v421_v24, %v367_v22  ;;  %v398_v33 = vrot.slane %v390_v25, %v1018_v40  ;;  %v425_v34 = vrot.slane %v417_v26, %v1018_v40 }
 0x118   :  { %v402_v35 = vmul.f32 %v394_v23, %v368_v27  ;;  %v429_v45 = vmul.f32 %v421_v24, %v369_v30  ;;  %v403_v54 = vmul.f32 %v394_v23, %v370_v46  ;;  %v430_v55 = vmul.f32 %v421_v24, %v371_v47 }
 0x119   :  { %v436_v41 = vadd.f32 %v428_v32, %v401_v31  ;;  %v405_v43 = vmul.f32 %v398_v33, %v374_v28  ;;  %v432_v44 = vmul.f32 %v425_v34, %v375_v29  ;;  %v406_v49 = vmul.f32 %v398_v33, %v376_v36 }
 0x11a   :  { %v433_v50 = vmul.f32 %v425_v34, %v377_v37  ;;  %v437_v53 = vadd.f32 %v429_v45, %v402_v35  ;;  %v407_v59 = vmul.f32 %v398_v33, %v378_v51  ;;  %v434_v60 = vmul.f32 %v425_v34, %v379_v52 }
 0x11b   :  { %444 = vadd.xlane.f32.xlu0 %v436_v41  ;;  %v440_v48 = vadd.f32 %v432_v44, %v405_v43  ;;  %v438_v63 = vadd.f32 %v430_v55, %v403_v54  ;;  %v404_v0 = vmul.f32 %v394_v23, %v372_v56  ;;  %v431_v1 = vmul.f32 %v421_v24, %v373_v57 }
 0x11c   :  { %v441_v58 = vadd.f32 %v433_v50, %v406_v49  ;;  %v442_v2 = vadd.f32 %v434_v60, %v407_v59  ;;  %v408_v3 = vmul.f32 %v398_v33, %v380_v61  ;;  %v435_v4 = vmul.f32 %v425_v34, %v381_v62 }
 0x11d   :  { %452 = vadd.xlane.f32.xlu1 %v440_v48  ;;  %v439_v5 = vadd.f32 %v431_v1, %v404_v0  ;;  %v848_v37 = vmov 0  }
 0x11e   :  { %v443_v6 = vadd.f32 %v435_v4, %v408_v3  ;;  %734 = vset.pattern.permute.xlu0 %v848_v37  ;;  %733 = vset.pattern.permute.xlu1 %v848_v37  ;;  %v519_v3 = vld [vmem:[%s1185_s9] sm:$0x3]  ;;  %s850_s9 = smov [#allocation2]  }
 0x11f   :  { %446 = vadd.xlane.f32.xlu0 %v437_v53  ;;  %s670_s15 = sshll.u32 %s850_s9, 4  ;;  %s671_s15 = int_to_ptr.vmem [resolvable:$true] %s670_s15 }
 0x120   :  { %s803_s16 = scalar_lea.vmem %s671_s15, 32  ;;  %p808_p1 = scmp.lt.s32.totalorder %s671_s15, %s671_s15 }
 0x121   :  { %454 = vadd.xlane.f32.xlu1 %v441_v58  ;;  %p804_p0 = scmp.ne.s32.totalorder %s671_s15, %s803_s16  ;;  %p809_p2 = scmp.lt.s32.totalorder %s803_s16, %s803_s16 }
 0x123   :  { %448 = vadd.xlane.f32.xlu0 %v438_v63  ;;  %p810_p3 = por %p809_p2, %p808_p1 }
 0x125   :  { %456 = vadd.xlane.f32.xlu1 %v442_v2  ;;  %p811_p4 = pnand %p810_p3, %p804_p0 }
 0x127   :  { %450 = vadd.xlane.f32.xlu0 %v439_v5 }
 0x129   :  { %458 = vadd.xlane.f32.xlu1 %v443_v6 }
 0x1a4   :  { %v445_v7 = vpop.xlane.xlu0 %444 }
 0x1a5   :  { %v473_v25 = vrot.slane %v445_v7, %v1115_v38 }
 0x1a6   :  { %v453_v9 = vpop.xlane.xlu1 %452 }
 0x1a7   :  { %v498_v26 = vrot.slane %v453_v9, %v1115_v38 }
 0x1a8   :  { %v447_v11 = vpop.xlane.xlu0 %446 }
 0x1a9   :  { %v478_v20 = vrot.slane %v447_v11, %v1108_v15 }
 0x1aa   :  { %v455_v14 = vpop.xlane.xlu1 %454 }
 0x1ab   :  { %v502_v21 = vrot.slane %v455_v14, %v1108_v15  ;;  %v480_v28 = vsel %vm479_vm0, %v478_v20, %v473_v25 }
 0x1ac   :  { %v449_v17 = vpop.xlane.xlu0 %448 }
 0x1ad   :  { %v485_v22 = vrot.slane %v449_v17, %v1111_v16  ;;  %v503_v29 = vsel %vm479_vm0, %v502_v21, %v498_v26 }
 0x1ae   :  { %v457_v19 = vpop.xlane.xlu1 %456 }
 0x1af   :  { %v507_v23 = vrot.slane %v457_v19, %v1111_v16  ;;  %v487_v31 = vsel %vm486_vm1, %v485_v22, %v480_v28 }
 0x1b0   :  { %v451_v24 = vpop.xlane.xlu0 %450 }
 0x1b1   :  { %v492_v27 = vrot.slane %v451_v24, %v1118_v18  ;;  %v508_v32 = vsel %vm486_vm1, %v507_v23, %v503_v29  ;;  %v849_v29 = vmov 0.0  }
 0x1b2   :  { %v459_v39 = vpop.xlane.xlu1 %458 }
 0x1b3   :  { %v512_v30 = vrot.slane %v459_v39, %v1118_v18  ;;  %v494_v33 = vsel %vm493_vm2, %v492_v27, %v487_v31 }
 0x1b5   :  { %v513_v34 = vsel %vm493_vm2, %v512_v30, %v508_v32 }
 0x1b6   :  { %v1135_v35 = vsel %vm514_vm3, %v513_v34, %v494_v33 }
 0x1b7   :  { %v520_v36 = vsel %vm517_vm4, %v1135_v35, -inf  ;;  %518 = vst.msk [vmem:[#allocation2] sm:$0x3] %vm517_vm4, %v1135_v35 }
 0x1b8   :  { %521 = vmax.xlane.f32.xlu0 %v520_v36 }
 0x241   :  { %v1141_v41 = vpop.xlane.xlu0 %521 }
 0x242   :  { %v527_v43 = vrot.slane %v1141_v41, %v1018_v40  ;;  %v531_v44 = vrot.slane %v1141_v41, %v1024_v42 }
 0x244   :  { %v534_v45 = vsub.f32 %v445_v7, %v527_v43  ;;  %v535_v46 = vsub.f32 %v447_v11, %v527_v43  ;;  %v538_v47 = vsub.f32 %v453_v9, %v531_v44  ;;  %v539_v50 = vsub.f32 %v455_v14, %v531_v44 }
 0x245   :  { %v536_v52 = vsub.f32 %v449_v17, %v527_v43  ;;  %v540_v54 = vsub.f32 %v457_v19, %v531_v44  ;;  %v537_v56 = vsub.f32 %v451_v24, %v527_v43  ;;  %v541_v58 = vsub.f32 %v459_v39, %v531_v44 }
 0x246   :  { %v542_v48 = vmul.f32 1.442695, %v534_v45  ;;  %v544_v49 = vmul.f32 1.442695, %v535_v46  ;;  %v550_v51 = vmul.f32 1.442695, %v538_v47 }
 0x247   :  { %v552_v53 = vmul.f32 1.442695, %v539_v50  ;;  %v546_v55 = vmul.f32 1.442695, %v536_v52  ;;  %v554_v40 = vmul.f32 1.442695, %v540_v54 }
 0x248   :  { %785 = vpow2.f32 %v542_v48  ;;  %v548_v59 = vmul.f32 1.442695, %v537_v56  ;;  %v556_v61 = vmul.f32 1.442695, %v541_v58 }
 0x249   :  { %787 = vpow2.f32 %v544_v49 }
 0x24a   :  { %789 = vpow2.f32 %v550_v51 }
 0x24b   :  { %791 = vpow2.f32 %v552_v53 }
 0x24c   :  { %793 = vpow2.f32 %v546_v55 }
 0x24d   :  { %795 = vpow2.f32 %v554_v40 }
 0x24e   :  { %797 = vpow2.f32 %v548_v59 }
 0x24f   :  { %799 = vpow2.f32 %v556_v61 }
 0x255   :  { %v786_v57 = vpop.eup %785 }
 0x256   :  { %v788_v42 = vpop.eup %787  ;;  %567 = vperm.xlu1 %733, %v786_v57  }
 0x257   :  { %570 = vperm.xlu0 %734, %v788_v42   ;;  %v790_v60 = vpop.eup %789 }
 0x258   :  { %v792_v62 = vpop.eup %791 }
 0x259   :  { %v794_v63 = vpop.eup %793 }
 0x25a   :  { %579 = vperm.xlu1 %733, %v790_v60   ;;  %v796_v0 = vpop.eup %795 }
 0x25b   :  { %v798_v1 = vpop.eup %797 }
 0x25c   :  { %v800_v2 = vpop.eup %799 }
 0x25e   :  { %582 = vperm.xlu1 %733, %v792_v62  }
 0x262   :  { %573 = vperm.xlu1 %733, %v794_v63  }
 0x266   :  { %585 = vperm.xlu1 %733, %v796_v0  }
 0x26a   :  { %576 = vperm.xlu1 %733, %v798_v1  }
 0x26e   :  { %588 = vperm.xlu1 %733, %v800_v2  }
 0x272   :  { %637 = vperm.xlu1 %733, %v519_v3  }
 0x2d1   :  { %v568_v4 = vpop.permute.xlu1 %567 }
 0x2d2   :  { %v571_v10 = vpop.permute.xlu0 %570  ;;  %v593_v13 = vrot.slane %v568_v4, %v1115_v38 }
 0x2d3   :  { %v597_v12 = vrot.slane %v571_v10, %v1108_v15 }
 0x2d5   :  { %v580_v5 = vpop.permute.xlu1 %579  ;;  %v598_v23 = vsel %vm479_vm0, %v597_v12, %v593_v13 }
 0x2d6   :  { %v612_v20 = vrot.slane %v580_v5, %v1115_v38 }
 0x2d9   :  { %v583_v6 = vpop.permute.xlu1 %582 }
 0x2da   :  { %v616_v14 = vrot.slane %v583_v6, %v1108_v15 }
 0x2dc   :  { %v617_v24 = vsel %vm479_vm0, %v616_v14, %v612_v20 }
 0x2dd   :  { %v574_v7 = vpop.permute.xlu1 %573 }
 0x2de   :  { %v602_v17 = vrot.slane %v574_v7, %v1111_v16 }
 0x2e0   :  { %v603_v26 = vsel %vm486_vm1, %v602_v17, %v598_v23 }
 0x2e1   :  { %v586_v9 = vpop.permute.xlu1 %585 }
 0x2e2   :  { %v621_v19 = vrot.slane %v586_v9, %v1111_v16 }
 0x2e4   :  { %v622_v27 = vsel %vm486_vm1, %v621_v19, %v617_v24 }
 0x2e5   :  { %v577_v11 = vpop.permute.xlu1 %576 }
 0x2e6   :  { %v607_v21 = vrot.slane %v577_v11, %v1118_v18 }
 0x2e8   :  { %v608_v15 = vsel %vm493_vm2, %v607_v21, %v603_v26 }
 0x2e9   :  { %v589_v22 = vpop.permute.xlu1 %588 }
 0x2ea   :  { %v626_v25 = vrot.slane %v589_v22, %v1118_v18 }
 0x2ec   :  { %v627_v39 = vsel %vm493_vm2, %v626_v25, %v622_v27 }
 0x2ed   :  { %v638_v16 = vpop.permute.xlu1 %637  ;;  %v628_v38 = vsel %vm514_vm3, %v627_v39, %v608_v15 }
 0x2ee   :  { %vm639_vm5 = vcmp.eq.s32.totalorder %v1102_v8, %v638_v16  ;;  %v630_v28 = vsel %vm517_vm4, %v628_v38, 0.0 }
 0x2ef   :  { %v725_v30 = vsel %vm639_vm5, 1.0, %v849_v29  ;;  %631 = vadd.xlane.f32.xlu1 %v630_v28 }
 0x2f0   :  { %v642_v18 = vmul.f32 %v725_v30, %v1135_v35 }
 0x2f2   :  { %v643_v31 = vsel %vm517_vm4, %v642_v18, 0.0 }
 0x2f3   :  { %644 = vadd.xlane.f32.xlu0 %v643_v31 }
 0x378   :  { %v632_v32 = vpop.xlane.xlu1 %631 }
 0x379   :  { %801 = vlog2.f32 %v632_v32 }
 0x37c   :  { %v645_v37 = vpop.xlane.xlu0 %644 }
 0x386   :  { %v802_v33 = vpop.eup %801 }
 0x387   :  { %v634_v34 = vmul.f32 0.6931472, %v802_v33 }
 0x389   :  { %v635_v36 = vadd.f32 %v634_v34, %v1141_v41 }
 0x38b   :  { %v646_v43 = vsub.f32 %v635_v36, %v645_v37 }
 0x38d   :  { %v648_v8 = vsel %vm647_vm6, %v646_v43, 0.0 }
 0x38e   :  { %649 = vadd.xlane.f32.xlu0 %v648_v8 }
 0x38f   :  { %814 = shalt.err (!%p811_p4)
}
 0x390   :  { %673 = dma.vmem_to_hbm [thread:$0]  %s671_s15, 32, %s1186_s10, [#allocation3]   ;;  %vm662_vm7 = vcmask 0  }
 0x391   :  { %s851_s19 = smov [#allocation4]  }
 0x392   :  { %s680_s20 = sshll.u32 %s851_s19, 4  ;;  %s681_s20 = int_to_ptr.vmem [resolvable:$true] %s680_s20 }
 0x393   :  { %s823_s23 = scalar_lea.vmem %s681_s20, 16  ;;  %s827_s24 = scalar_lea.vmem %s681_s20, 32 }
 0x394   :  { %p824_p5 = scmp.ne.s32.totalorder %s681_s20, %s823_s23  ;;  %p828_p6 = scmp.lt.s32.totalorder %s681_s20, %s681_s20 }
 0x395   :  { %p829_p7 = scmp.lt.s32.totalorder %s827_s24, %s823_s23 }
 0x397   :  { %p830_p8 = por %p829_p7, %p828_p6 }
 0x399   :  { %p831_p9 = pnand %p830_p8, %p824_p5 }
 0x417   :  { %v650_v35 = vpop.xlane.xlu0 %649 }
 0x418   :  { %v651_v41 = vrot.slane %v650_v35, 4 }
 0x41a   :  { %v652_v44 = vadd.f32 %v651_v41, %v650_v35 }
 0x41c   :  { %v653_v45 = vrot.slane %v652_v44, 2 }
 0x41e   :  { %v654_v46 = vadd.f32 %v653_v45, %v652_v44 }
 0x420   :  { %v655_v47 = vrot.slane %v654_v46, 1 }
 0x422   :  { %v656_v48 = vadd.f32 %v655_v47, %v654_v46 }
 0x424   :  { %726 = vpush %v656_v48 }
 0x455   :  { %s727_s21 = spop %726 }
 0x456   :  { %s660_s22 = smul.f32 0.5, %s727_s21 }
 0x458   :  { %v661_v49 = vstv %s660_s22 }
 0x459   :  { %663 = vst.msk [vmem:[#allocation4] sm:$0x1] %vm662_vm7, %v661_v49 }
 0x45a   :  { %834 = shalt.err (!%p831_p9)
}
 0x45b   :  { %683 = dma.vmem_to_hbm [thread:$0]  %s681_s20, 16, %s1187_s11, [#allocation5]  }
 0x45c   :  { %843 = dma.done.wait [#allocation3], 32  }
 0x45d   :  { %844 = vsyncadd [#allocation3], 4294967264 }
 0x45e   :  { %845 = dma.done.wait [#allocation5], 16  }
 0x45f   :  { %846 = vsyncadd [#allocation5], 4294967280 }
 0x460   :  { %690 = vsyncpa [#allocation3], 1 }
 0x461   :  { %691 = vsyncpa [#allocation5], 1 }

</bundles_post_ra>
